<compile_context>
chip_gen: v6e
topology: v6e:2x2x1
jax: 0.10.0
libtpu: 0.0.40
codegen_flags: <defaults>
</compile_context>

<pallas_src>
import functools

import jax
import jax.numpy as jnp
from jax.experimental import pallas as pl
from jax.experimental.pallas import tpu as pltpu

# ---- static LeNet-5 geometry (1x32x32 input) ----
IMG_H = IMG_W = 32
LANES = 128

C1_ROWS = 896            # conv1 rows r = y*32 + x, y in [0,28) (896 = 28*32)
C1_CHUNK = 128
C1_K = 32                # 25 im2col taps + 1 bias lane + pad

P1_H = P1_W = 14         # pool1 spatial
P1_PITCH = 16            # act1 row pitch: r = py*16 + px
ACT1P_ROWS = P1_H * P1_PITCH        # 224
ACT1R_ROWS = ACT1P_ROWS + 8         # 232 (zeroed tail rows for the dx-shifted pack reads)

C2_ROWS = 160            # conv2 rows r = oy*16 + ox, oy in [0,10)
C2_CHUNK = 80
C2_K = 48                # 5 dx groups of 8 lanes (6 ch valid) + bias lane + pad
C2_BIAS_LANE = 40

P2_H = P2_W = 5
P2_PITCH = 8
ACT2_ROWS = P2_H * P2_PITCH         # 40
C3_K = 32                # 16 ch x 2 branches (residual folded into the weights)

NEG_INF = -1e30


# ------------------------------ fused kernel ------------------------------

def lenet5_kernel(img_ref, w1_ref, w2_ref, w3_ref, b3_ref, w4_ref, b4_ref, w5_ref,
                  out_ref, acc1_ref, act1r_ref, act1p_ref, acc2_ref, act2_ref, rm_ref):
    f32 = jnp.float32
    bf16 = jnp.bfloat16

    # ---- C1: conv(1->6, 5x5) + bias + ReLU --------------------------------------
    # Host did the full 25-tap im2col (+ constant-1 bias lane): one dot per 128-row
    # chunk.  The weight slab replicates the 6 output channels into 5 lane groups
    # (lanes g*8+co) so the conv2 im2col pack below needs no cross-lane shuffles.
    for r0 in range(0, C1_ROWS, C1_CHUNK):
        y = jnp.dot(img_ref[r0:r0 + C1_CHUNK, :], w1_ref[...],
                    preferred_element_type=f32)
        acc1_ref[r0:r0 + C1_CHUNK, :] = jnp.maximum(y, 0.0)

    # ---- S1: 2x2 max-pool stride 2 (lane-replicated channels, row pitch 16) -----
    for py in range(P1_H):
        base = 2 * py * IMG_W                       # 64*py (8-aligned)
        ymax = jnp.maximum(acc1_ref[base:base + IMG_W, :],
                           acc1_ref[base + IMG_W:base + 2 * IMG_W, :])
        rm_ref[...] = ymax                          # (32,128) aligned store
        pooled = jnp.maximum(rm_ref[pl.ds(0, P1_PITCH, stride=2), :],
                             rm_ref[pl.ds(1, P1_PITCH, stride=2), :])
        act1r_ref[py * P1_PITCH:(py + 1) * P1_PITCH, :] = pooled   # aligned 16-row store
    # zero the tail rows touched by the dx-shifted pack reads of the last pool row
    act1r_ref[ACT1P_ROWS:ACT1R_ROWS, :] = jnp.zeros((ACT1R_ROWS - ACT1P_ROWS, LANES), f32)

    # ---- pack conv2's x-tap im2col into lanes -----------------------------------
    # act1p[py*16+px, dx*8+ci] = pool1[ci, py, px+dx];  lane 40 = 1 (carries b2).
    # Channels are already replicated per lane group, so each dx only needs a
    # row-shifted read masked to its own lane group (no lane rotates / concats).
    lane = jax.lax.broadcasted_iota(jnp.int32, (P1_PITCH, LANES), 1)
    bias_lane = (lane == C2_BIAS_LANE).astype(f32)
    group_masks = [((lane >= dx * 8) & (lane < dx * 8 + 8)).astype(f32) for dx in range(5)]
    for py in range(P1_H):
        base = py * P1_PITCH
        packed = act1r_ref[base:base + P1_PITCH, :] * group_masks[0] + bias_lane
        for dx in range(1, 5):
            piece = act1r_ref[pl.ds(base + dx, P1_PITCH), :]
            packed = packed + piece * group_masks[dx]
        act1p_ref[base:base + P1_PITCH, :] = packed.astype(bf16)

    # ---- C2_1 + C2_2 merged: conv(6->32, 5x5) + bias + ReLU ----------------------
    # 5 dy-tap dots of (80,48)@(48,128) at 16-row-aligned offsets; bias folded via
    # lane 40 (only in the dy=0 weight slab).  Output lanes: c2_1 -> 0..15, c2_2 -> 16..31.
    for m0 in range(0, C2_ROWS, C2_CHUNK):
        acc = jnp.zeros((C2_CHUNK, LANES), f32)
        for dy in range(5):
            lhs = act1p_ref[pl.ds(m0 + dy * P1_PITCH, C2_CHUNK), 0:C2_K]
            acc = acc + jnp.dot(lhs, w2_ref[dy], preferred_element_type=f32)
        acc2_ref[m0:m0 + C2_CHUNK, :] = jnp.maximum(acc, 0.0)

    # ---- S2: 2x2 max-pool stride 2 (both branches, row pitch 8) ------------------
    for py2 in range(P2_H):
        base = 2 * py2 * P1_PITCH                   # 32*py2 (8-aligned)
        ymax = jnp.maximum(acc2_ref[base:base + P1_PITCH, :],
                           acc2_ref[base + P1_PITCH:base + 2 * P1_PITCH, :])
        rm_ref[0:P1_PITCH, :] = ymax
        pooled = jnp.maximum(rm_ref[pl.ds(0, P2_PITCH, stride=2), :],
                             rm_ref[pl.ds(1, P2_PITCH, stride=2), :])
        act2_ref[py2 * P2_PITCH:(py2 + 1) * P2_PITCH, :] = pooled   # aligned 8-row store

    # ---- residual add + C3: conv(16->120, 5x5) + ReLU ----------------------------
    # "output += x" is folded into w3 (rows 0..15 and 16..31 of every K=32 tap slab
    # carry the same 16 channel weights).  Output spatial is 1x1 (serial tail).
    y3 = jnp.zeros((1, LANES), f32)
    for t in range(25):
        row = (t // 5) * P2_PITCH + (t % 5)
        lhs = act2_ref[pl.ds(row, 1), 0:C3_K].astype(bf16)
        y3 = y3 + jnp.dot(lhs, w3_ref[t], preferred_element_type=f32)
    act3 = jnp.maximum(y3 + b3_ref[...], 0.0)        # lane 120 == 1 -> picks up b4 in F4

    # ---- F4: Linear(120->84) + ReLU ----------------------------------------------
    act4 = jnp.maximum(
        jnp.dot(act3.astype(bf16), w4_ref[...], preferred_element_type=f32)
        + b4_ref[...], 0.0)                          # lane 84 == 1 -> picks up b5 + pad mask

    # ---- F5: Linear(84->10) + LogSoftmax ------------------------------------------
    # Padded logit lanes receive -1e30 from w5's bias row, so they vanish from the
    # max and the logsumexp.
    logits = jnp.dot(act4.astype(bf16), w5_ref[...], preferred_element_type=f32)
    m = jnp.max(logits, axis=-1, keepdims=True)
    z = logits - m
    lse = jnp.log(jnp.sum(jnp.exp(z), axis=-1, keepdims=True))
    out_ref[...] = z - lse


# ------------------------------ pallas wrapper ------------------------------

def _const_spec(shape):
    nd = len(shape)
    return pl.BlockSpec(shape, lambda b: (0,) * nd)


def lenet5_pallas(img32, packed):
    batch = img32.shape[0]
    grid_spec = pltpu.PrefetchScalarGridSpec(
        num_scalar_prefetch=0,
        grid=(batch,),                                    # one image per grid step
        in_specs=[pl.BlockSpec((None, C1_ROWS, C1_K), lambda b: (b, 0, 0))]
                 + [_const_spec(p.shape) for p in packed],
        out_specs=pl.BlockSpec((None, 1, LANES), lambda b: (b, 0, 0)),
        scratch_shapes=[
            pltpu.VMEM((C1_ROWS, LANES), jnp.float32),    # conv1 output (pitch 32)
            pltpu.VMEM((ACT1R_ROWS, LANES), jnp.float32), # pool1, channel-replicated (pitch 16)
            pltpu.VMEM((ACT1P_ROWS, LANES), jnp.bfloat16),# pool1, x-taps packed into lanes
            pltpu.VMEM((C2_ROWS, LANES), jnp.float32),    # conv2 output (pitch 16)
            pltpu.VMEM((ACT2_ROWS, LANES), jnp.float32),  # pool2 (pitch 8)
            pltpu.VMEM((IMG_W, LANES), jnp.float32),      # pool row-max staging
        ],
    )
    return pl.pallas_call(
        lenet5_kernel,
        out_shape=jax.ShapeDtypeStruct((batch, 1, LANES), jnp.float32),
        grid_spec=grid_spec,
        compiler_params=pltpu.CompilerParams(
            dimension_semantics=("parallel",)),           # v7x: 2 TCs split the batch
    )(img32, *packed)


# --------------------------- host-side weight packing ---------------------------

def pack_params(params):
    """Pack PyTorch-layout params into K-trimmed, bf16, lane-dense matmul slabs (once)."""
    (w1, b1) = params["c1"]
    (w21, b21) = params["c2_1"]
    (w22, b22) = params["c2_2"]
    (w3, b3) = params["c3"]
    (w4, b4) = params["f4"]
    (w5, b5) = params["f5"]
    f32, bf16 = jnp.float32, jnp.bfloat16

    # C1: (32,128).  Rows 0..24 = im2col taps (dy*5+dx), row 25 = bias (constant-1 lane).
    # The 6 output channels are replicated into 5 lane groups (lanes g*8+co).
    t1 = jnp.transpose(w1[:, 0], (1, 2, 0)).reshape(25, 6)    # [dy*5+dx, co]
    w1s = jnp.zeros((C1_K, LANES), f32)
    for g in range(5):
        w1s = w1s.at[:25, g * 8:g * 8 + 6].set(t1)
        w1s = w1s.at[25, g * 8:g * 8 + 6].set(b1)

    # C2 (branches merged on output lanes): one K=48 slab per dy.
    # Row dx*8+ci <- w2[co, ci, dy, dx]; row 40 = bias (dy=0 slab only).
    w2m = jnp.concatenate([w21, w22], axis=0)                  # (32,6,5,5)
    t2 = jnp.transpose(w2m, (2, 3, 1, 0))                      # (dy, dx, ci, co)
    t2 = jnp.pad(t2, ((0, 0), (0, 0), (0, 2), (0, 0)))         # ci 6 -> 8
    w2s = jnp.zeros((5, C2_K, LANES), f32)
    w2s = w2s.at[:, :40, :32].set(t2.reshape(5, 40, 32))
    w2s = w2s.at[0, C2_BIAS_LANE, :32].set(jnp.concatenate([b21, b22]))

    # C3: K=32; residual fold by duplicating the 16 input-channel rows for both branches.
    t3 = jnp.transpose(w3, (2, 3, 1, 0)).reshape(25, 16, 120)  # (tap, ci, co)
    w3s = jnp.zeros((25, C3_K, LANES), f32)
    w3s = w3s.at[:, :16, :120].set(t3).at[:, 16:32, :120].set(t3)
    b3p = jnp.zeros((1, LANES), f32).at[0, :120].set(b3).at[0, 120].set(1.0)

    # F4: row 120 carries b4 (act3 lane 120 == 1).
    w4p = jnp.zeros((LANES, LANES), f32).at[:120, :84].set(w4.T).at[120, :84].set(b4)
    b4p = jnp.zeros((1, LANES), f32).at[0, 84].set(1.0)
    # F5: row 84 carries b5 plus the -1e30 padded-logit mask (act4 lane 84 == 1).
    w5p = jnp.zeros((LANES, LANES), f32).at[:84, :10].set(w5.T)
    w5p = w5p.at[84, :10].set(b5).at[84, 10:].set(NEG_INF)

    return (w1s.astype(bf16), w2s.astype(bf16), w3s.astype(bf16), b3p,
            w4p.astype(bf16), b4p, w5p.astype(bf16))


# --------------------------------- forward ---------------------------------

def lenet5_forward(packed, img):
    """img: (B, 1, 32, 32) NCHW float32 -> (B, 10) log-probabilities."""
    batch = img.shape[0]
    # Host-side conv1 im2col: 25 (dy,dx)-shifted copies + a constant-1 bias lane, bf16.
    flat = img.reshape(batch, IMG_H * IMG_W).astype(jnp.float32)
    flat = jnp.pad(flat, ((0, 0), (0, 4 * IMG_W + 4)))
    taps = [flat[:, dy * IMG_W + dx: dy * IMG_W + dx + C1_ROWS]
            for dy in range(5) for dx in range(5)]
    taps.append(jnp.ones((batch, C1_ROWS), jnp.float32))        # bias lane (25)
    img32 = jnp.stack(taps, axis=-1)                             # (B, 896, 26)
    img32 = jnp.pad(img32, ((0, 0), (0, 0), (0, C1_K - 26)))     # (B, 896, 32)
    img32 = img32.astype(jnp.bfloat16)

    out = lenet5_pallas(img32, packed)                           # (B, 1, 128)
    return out[:, 0, :10]                                        # slice padded lanes once


# ------------------------- pure-JAX reference (f32) -------------------------

def lenet5_reference(params, img):
    (w1, b1) = params["c1"]
    (w21, b21) = params["c2_1"]
    (w22, b22) = params["c2_2"]
    (w3, b3) = params["c3"]
    (w4, b4) = params["f4"]
    (w5, b5) = params["f5"]

    def conv(x, w, b):
        y = jax.lax.conv_general_dilated(x, w, (1, 1), "VALID",
                                         dimension_numbers=("NCHW", "OIHW", "NCHW"))
        return y + b[None, :, None, None]

    def pool(x):
        return jax.lax.reduce_window(x, -jnp.inf, jax.lax.max,
                                     (1, 1, 2, 2), (1, 1, 2, 2), "VALID")

    h = pool(jax.nn.relu(conv(img, w1, b1)))
    x1 = pool(jax.nn.relu(conv(h, w21, b21)))
    x2 = pool(jax.nn.relu(conv(h, w22, b22)))
    s = x2 + x1
    h3 = jax.nn.relu(conv(s, w3, b3)).reshape(img.shape[0], -1)
    h4 = jax.nn.relu(h3 @ w4.T + b4)
    logits = h4 @ w5.T + b5
    return jax.nn.log_softmax(logits, axis=-1)


# ------------------------------ params & main ------------------------------

def init_params(key):
    ks = jax.random.split(key, 6)

    def conv(k, cout, cin):
        kw_, kb_ = jax.random.split(k)
        s = 1.0 / jnp.sqrt(cin * 25.0)
        return (jax.random.uniform(kw_, (cout, cin, 5, 5), jnp.float32, -s, s),
                jax.random.uniform(kb_, (cout,), jnp.float32, -s, s))

    def lin(k, out, inp):
        kw_, kb_ = jax.random.split(k)
        s = 1.0 / jnp.sqrt(float(inp))
        return (jax.random.uniform(kw_, (out, inp), jnp.float32, -s, s),
                jax.random.uniform(kb_, (out,), jnp.float32, -s, s))

    return {
        "c1": conv(ks[0], 6, 1),
        "c2_1": conv(ks[1], 16, 6),
        "c2_2": conv(ks[2], 16, 6),
        "c3": conv(ks[3], 120, 16),
        "f4": lin(ks[4], 84, 120),
        "f5": lin(ks[5], 10, 84),
    }


if __name__ == "__main__":
    key = jax.random.PRNGKey(0)
    pkey, xkey = jax.random.split(key)
    params = init_params(pkey)
    packed = pack_params(params)          # one-time host packing (outside jit)

    # LeNet5 requires 32x32 single-channel input (NCHW).
    img = jax.random.normal(xkey, (2, 1, 32, 32), jnp.float32)

    fwd = jax.jit(functools.partial(lenet5_forward, packed))
    out = jax.block_until_ready(fwd(img))

    assert out.shape == (2, 10)
    assert bool(jnp.all(jnp.isfinite(out)))
    # log-softmax rows must normalise to 1 (padded lanes excluded correctly)
    assert bool(jnp.allclose(jnp.sum(jnp.exp(out), axis=-1), 1.0, atol=1e-3))
    # bf16-weight kernel vs f32 reference (loose tolerance for the bf16 cast)
    ref = lenet5_reference(params, img)
    max_diff = float(jnp.max(jnp.abs(out - ref)))
    assert max_diff < 0.25, f"kernel deviates from reference by {max_diff}"
    print("KERNEL_OK")
</pallas_src>

<mosaic_0001>
module attributes {stable_mosaic.version = 11 : i64} {
  func.func @lenet5_kernel(%arg0: i32, %arg1: memref<1x896x32xbf16, #tpu.memory_space<vmem>>, %arg2: memref<32x128xbf16, #tpu.memory_space<vmem>>, %arg3: memref<5x48x128xbf16, #tpu.memory_space<vmem>>, %arg4: memref<25x32x128xbf16, #tpu.memory_space<vmem>>, %arg5: memref<1x128xf32, #tpu.memory_space<vmem>>, %arg6: memref<128x128xbf16, #tpu.memory_space<vmem>>, %arg7: memref<1x128xf32, #tpu.memory_space<vmem>>, %arg8: memref<128x128xbf16, #tpu.memory_space<vmem>>, %arg9: memref<1x1x128xf32, #tpu.memory_space<vmem>>, %arg10: memref<896x128xf32, #tpu.memory_space<vmem>>, %arg11: memref<232x128xf32, #tpu.memory_space<vmem>>, %arg12: memref<224x128xbf16, #tpu.memory_space<vmem>>, %arg13: memref<160x128xf32, #tpu.memory_space<vmem>>, %arg14: memref<40x128xf32, #tpu.memory_space<vmem>>, %arg15: memref<32x128xf32, #tpu.memory_space<vmem>>) attributes {dimension_semantics = [#tpu.dimension_semantics<parallel>], iteration_bounds = array<i64: 2>, scalar_prefetch = 0 : i64, scratch_operands = 6 : i64, tpu.core_type = #tpu.core_type<tc>, window_params = [{transform_indices = @transform_0, window_bounds = array<i64: 1, 896, 32>}, {pipeline_mode = #tpu.pipeline_mode<synchronous>, transform_indices = @transform_1, window_bounds = array<i64: 32, 128>}, {pipeline_mode = #tpu.pipeline_mode<synchronous>, transform_indices = @transform_2, window_bounds = array<i64: 5, 48, 128>}, {pipeline_mode = #tpu.pipeline_mode<synchronous>, transform_indices = @transform_3, window_bounds = array<i64: 25, 32, 128>}, {pipeline_mode = #tpu.pipeline_mode<synchronous>, transform_indices = @transform_4, window_bounds = array<i64: 1, 128>}, {pipeline_mode = #tpu.pipeline_mode<synchronous>, transform_indices = @transform_5, window_bounds = array<i64: 128, 128>}, {pipeline_mode = #tpu.pipeline_mode<synchronous>, transform_indices = @transform_6, window_bounds = array<i64: 1, 128>}, {pipeline_mode = #tpu.pipeline_mode<synchronous>, transform_indices = @transform_7, window_bounds = array<i64: 128, 128>}, {transform_indices = @transform_8, window_bounds = array<i64: 1, 1, 128>}]} {
    %c0 = arith.constant 0 : index
    %c0_0 = arith.constant 0 : index
    %c0_1 = arith.constant 0 : index
    %0 = vector.load %arg1[%c0, %c0_0, %c0_1] : memref<1x896x32xbf16, #tpu.memory_space<vmem>>, vector<1x128x32xbf16>
    %1 = vector.shape_cast %0 : vector<1x128x32xbf16> to vector<128x32xbf16>
    %c0_2 = arith.constant 0 : index
    %c0_3 = arith.constant 0 : index
    %2 = vector.load %arg2[%c0_2, %c0_3] : memref<32x128xbf16, #tpu.memory_space<vmem>>, vector<32x128xbf16>
    %cst = arith.constant dense<0.000000e+00> : vector<128x128xf32>
    %3 = tpu.matmul %1, %2, %cst {dimension_numbers = #tpu.dot_dimension_numbers<[1], [0], [0], [1], [0, 0, 1, 1], [], []>} : vector<128x32xbf16>, vector<32x128xbf16>, vector<128x128xf32> -> vector<128x128xf32>
    %cst_4 = arith.constant 0.000000e+00 : f32
    %4 = vector.broadcast %cst_4 : f32 to vector<128x128xf32>
    %5 = arith.maximumf %3, %4 : vector<128x128xf32>
    %c0_5 = arith.constant 0 : index
    %c0_6 = arith.constant 0 : index
    %6 = vector.load %arg10[%c0_5, %c0_6] : memref<896x128xf32, #tpu.memory_space<vmem>>, vector<128x128xf32>
    tpu.vector_store %arg10[%c0_5, %c0_6], %5 {strides = array<i32>} : memref<896x128xf32, #tpu.memory_space<vmem>>, vector<128x128xf32>,
    %c0_7 = arith.constant 0 : index
    %c128 = arith.constant 128 : index
    %c0_8 = arith.constant 0 : index
    %7 = vector.load %arg1[%c0_7, %c128, %c0_8] : memref<1x896x32xbf16, #tpu.memory_space<vmem>>, vector<1x128x32xbf16>
    %8 = vector.shape_cast %7 : vector<1x128x32xbf16> to vector<128x32xbf16>
    %c0_9 = arith.constant 0 : index
    %c0_10 = arith.constant 0 : index
    %9 = vector.load %arg2[%c0_9, %c0_10] : memref<32x128xbf16, #tpu.memory_space<vmem>>, vector<32x128xbf16>
    %cst_11 = arith.constant dense<0.000000e+00> : vector<128x128xf32>
    %10 = tpu.matmul %8, %9, %cst_11 {dimension_numbers = #tpu.dot_dimension_numbers<[1], [0], [0], [1], [0, 0, 1, 1], [], []>} : vector<128x32xbf16>, vector<32x128xbf16>, vector<128x128xf32> -> vector<128x128xf32>
    %cst_12 = arith.constant 0.000000e+00 : f32
    %11 = vector.broadcast %cst_12 : f32 to vector<128x128xf32>
    %12 = arith.maximumf %10, %11 : vector<128x128xf32>
    %c128_13 = arith.constant 128 : index
    %c0_14 = arith.constant 0 : index
    %13 = vector.load %arg10[%c128_13, %c0_14] : memref<896x128xf32, #tpu.memory_space<vmem>>, vector<128x128xf32>
    tpu.vector_store %arg10[%c128_13, %c0_14], %12 {strides = array<i32>} : memref<896x128xf32, #tpu.memory_space<vmem>>, vector<128x128xf32>,
    %c0_15 = arith.constant 0 : index
    %c256 = arith.constant 256 : index
    %c0_16 = arith.constant 0 : index
    %14 = vector.load %arg1[%c0_15, %c256, %c0_16] : memref<1x896x32xbf16, #tpu.memory_space<vmem>>, vector<1x128x32xbf16>
    %15 = vector.shape_cast %14 : vector<1x128x32xbf16> to vector<128x32xbf16>
    %c0_17 = arith.constant 0 : index
    %c0_18 = arith.constant 0 : index
    %16 = vector.load %arg2[%c0_17, %c0_18] : memref<32x128xbf16, #tpu.memory_space<vmem>>, vector<32x128xbf16>
    %cst_19 = arith.constant dense<0.000000e+00> : vector<128x128xf32>
    %17 = tpu.matmul %15, %16, %cst_19 {dimension_numbers = #tpu.dot_dimension_numbers<[1], [0], [0], [1], [0, 0, 1, 1], [], []>} : vector<128x32xbf16>, vector<32x128xbf16>, vector<128x128xf32> -> vector<128x128xf32>
    %cst_20 = arith.constant 0.000000e+00 : f32
    %18 = vector.broadcast %cst_20 : f32 to vector<128x128xf32>
    %19 = arith.maximumf %17, %18 : vector<128x128xf32>
    %c256_21 = arith.constant 256 : index
    %c0_22 = arith.constant 0 : index
    %20 = vector.load %arg10[%c256_21, %c0_22] : memref<896x128xf32, #tpu.memory_space<vmem>>, vector<128x128xf32>
    tpu.vector_store %arg10[%c256_21, %c0_22], %19 {strides = array<i32>} : memref<896x128xf32, #tpu.memory_space<vmem>>, vector<128x128xf32>,
    %c0_23 = arith.constant 0 : index
    %c384 = arith.constant 384 : index
    %c0_24 = arith.constant 0 : index
    %21 = vector.load %arg1[%c0_23, %c384, %c0_24] : memref<1x896x32xbf16, #tpu.memory_space<vmem>>, vector<1x128x32xbf16>
    %22 = vector.shape_cast %21 : vector<1x128x32xbf16> to vector<128x32xbf16>
    %c0_25 = arith.constant 0 : index
    %c0_26 = arith.constant 0 : index
    %23 = vector.load %arg2[%c0_25, %c0_26] : memref<32x128xbf16, #tpu.memory_space<vmem>>, vector<32x128xbf16>
    %cst_27 = arith.constant dense<0.000000e+00> : vector<128x128xf32>
    %24 = tpu.matmul %22, %23, %cst_27 {dimension_numbers = #tpu.dot_dimension_numbers<[1], [0], [0], [1], [0, 0, 1, 1], [], []>} : vector<128x32xbf16>, vector<32x128xbf16>, vector<128x128xf32> -> vector<128x128xf32>
    %cst_28 = arith.constant 0.000000e+00 : f32
    %25 = vector.broadcast %cst_28 : f32 to vector<128x128xf32>
    %26 = arith.maximumf %24, %25 : vector<128x128xf32>
    %c384_29 = arith.constant 384 : index
    %c0_30 = arith.constant 0 : index
    %27 = vector.load %arg10[%c384_29, %c0_30] : memref<896x128xf32, #tpu.memory_space<vmem>>, vector<128x128xf32>
    tpu.vector_store %arg10[%c384_29, %c0_30], %26 {strides = array<i32>} : memref<896x128xf32, #tpu.memory_space<vmem>>, vector<128x128xf32>,
    %c0_31 = arith.constant 0 : index
    %c512 = arith.constant 512 : index
    %c0_32 = arith.constant 0 : index
    %28 = vector.load %arg1[%c0_31, %c512, %c0_32] : memref<1x896x32xbf16, #tpu.memory_space<vmem>>, vector<1x128x32xbf16>
    %29 = vector.shape_cast %28 : vector<1x128x32xbf16> to vector<128x32xbf16>
    %c0_33 = arith.constant 0 : index
    %c0_34 = arith.constant 0 : index
    %30 = vector.load %arg2[%c0_33, %c0_34] : memref<32x128xbf16, #tpu.memory_space<vmem>>, vector<32x128xbf16>
    %cst_35 = arith.constant dense<0.000000e+00> : vector<128x128xf32>
    %31 = tpu.matmul %29, %30, %cst_35 {dimension_numbers = #tpu.dot_dimension_numbers<[1], [0], [0], [1], [0, 0, 1, 1], [], []>} : vector<128x32xbf16>, vector<32x128xbf16>, vector<128x128xf32> -> vector<128x128xf32>
    %cst_36 = arith.constant 0.000000e+00 : f32
    %32 = vector.broadcast %cst_36 : f32 to vector<128x128xf32>
    %33 = arith.maximumf %31, %32 : vector<128x128xf32>
    %c512_37 = arith.constant 512 : index
    %c0_38 = arith.constant 0 : index
    %34 = vector.load %arg10[%c512_37, %c0_38] : memref<896x128xf32, #tpu.memory_space<vmem>>, vector<128x128xf32>
    tpu.vector_store %arg10[%c512_37, %c0_38], %33 {strides = array<i32>} : memref<896x128xf32, #tpu.memory_space<vmem>>, vector<128x128xf32>,
    %c0_39 = arith.constant 0 : index
    %c640 = arith.constant 640 : index
    %c0_40 = arith.constant 0 : index
    %35 = vector.load %arg1[%c0_39, %c640, %c0_40] : memref<1x896x32xbf16, #tpu.memory_space<vmem>>, vector<1x128x32xbf16>
    %36 = vector.shape_cast %35 : vector<1x128x32xbf16> to vector<128x32xbf16>
    %c0_41 = arith.constant 0 : index
    %c0_42 = arith.constant 0 : index
    %37 = vector.load %arg2[%c0_41, %c0_42] : memref<32x128xbf16, #tpu.memory_space<vmem>>, vector<32x128xbf16>
    %cst_43 = arith.constant dense<0.000000e+00> : vector<128x128xf32>
    %38 = tpu.matmul %36, %37, %cst_43 {dimension_numbers = #tpu.dot_dimension_numbers<[1], [0], [0], [1], [0, 0, 1, 1], [], []>} : vector<128x32xbf16>, vector<32x128xbf16>, vector<128x128xf32> -> vector<128x128xf32>
    %cst_44 = arith.constant 0.000000e+00 : f32
    %39 = vector.broadcast %cst_44 : f32 to vector<128x128xf32>
    %40 = arith.maximumf %38, %39 : vector<128x128xf32>
    %c640_45 = arith.constant 640 : index
    %c0_46 = arith.constant 0 : index
    %41 = vector.load %arg10[%c640_45, %c0_46] : memref<896x128xf32, #tpu.memory_space<vmem>>, vector<128x128xf32>
    tpu.vector_store %arg10[%c640_45, %c0_46], %40 {strides = array<i32>} : memref<896x128xf32, #tpu.memory_space<vmem>>, vector<128x128xf32>,
    %c0_47 = arith.constant 0 : index
    %c768 = arith.constant 768 : index
    %c0_48 = arith.constant 0 : index
    %42 = vector.load %arg1[%c0_47, %c768, %c0_48] : memref<1x896x32xbf16, #tpu.memory_space<vmem>>, vector<1x128x32xbf16>
    %43 = vector.shape_cast %42 : vector<1x128x32xbf16> to vector<128x32xbf16>
    %c0_49 = arith.constant 0 : index
    %c0_50 = arith.constant 0 : index
    %44 = vector.load %arg2[%c0_49, %c0_50] : memref<32x128xbf16, #tpu.memory_space<vmem>>, vector<32x128xbf16>
    %cst_51 = arith.constant dense<0.000000e+00> : vector<128x128xf32>
    %45 = tpu.matmul %43, %44, %cst_51 {dimension_numbers = #tpu.dot_dimension_numbers<[1], [0], [0], [1], [0, 0, 1, 1], [], []>} : vector<128x32xbf16>, vector<32x128xbf16>, vector<128x128xf32> -> vector<128x128xf32>
    %cst_52 = arith.constant 0.000000e+00 : f32
    %46 = vector.broadcast %cst_52 : f32 to vector<128x128xf32>
    %47 = arith.maximumf %45, %46 : vector<128x128xf32>
    %c768_53 = arith.constant 768 : index
    %c0_54 = arith.constant 0 : index
    %48 = vector.load %arg10[%c768_53, %c0_54] : memref<896x128xf32, #tpu.memory_space<vmem>>, vector<128x128xf32>
    tpu.vector_store %arg10[%c768_53, %c0_54], %47 {strides = array<i32>} : memref<896x128xf32, #tpu.memory_space<vmem>>, vector<128x128xf32>,
    %c0_55 = arith.constant 0 : index
    %c0_56 = arith.constant 0 : index
    %49 = vector.load %arg10[%c0_55, %c0_56] : memref<896x128xf32, #tpu.memory_space<vmem>>, vector<32x128xf32>
    %c32 = arith.constant 32 : index
    %c0_57 = arith.constant 0 : index
    %50 = vector.load %arg10[%c32, %c0_57] : memref<896x128xf32, #tpu.memory_space<vmem>>, vector<32x128xf32>
    %51 = arith.maximumf %49, %50 : vector<32x128xf32>
    %c0_58 = arith.constant 0 : index
    %c0_59 = arith.constant 0 : index
    %52 = vector.load %arg15[%c0_58, %c0_59] : memref<32x128xf32, #tpu.memory_space<vmem>>, vector<32x128xf32>
    tpu.vector_store %arg15[%c0_58, %c0_59], %51 {strides = array<i32>} : memref<32x128xf32, #tpu.memory_space<vmem>>, vector<32x128xf32>,
    %c0_60 = arith.constant 0 : index
    %c0_61 = arith.constant 0 : index
    %53 = tpu.strided_load %arg15[%c0_60, %c0_61] {strides = array<i32: 2, 1>} : memref<32x128xf32, #tpu.memory_space<vmem>>, vector<16x128xf32>
    %c1 = arith.constant 1 : index
    %c0_62 = arith.constant 0 : index
    %54 = tpu.strided_load %arg15[%c1, %c0_62] {strides = array<i32: 2, 1>} : memref<32x128xf32, #tpu.memory_space<vmem>>, vector<16x128xf32>
    %55 = arith.maximumf %53, %54 : vector<16x128xf32>
    %c0_63 = arith.constant 0 : index
    %c0_64 = arith.constant 0 : index
    %56 = vector.load %arg11[%c0_63, %c0_64] : memref<232x128xf32, #tpu.memory_space<vmem>>, vector<16x128xf32>
    tpu.vector_store %arg11[%c0_63, %c0_64], %55 {strides = array<i32>} : memref<232x128xf32, #tpu.memory_space<vmem>>, vector<16x128xf32>,
    %c64 = arith.constant 64 : index
    %c0_65 = arith.constant 0 : index
    %57 = vector.load %arg10[%c64, %c0_65] : memref<896x128xf32, #tpu.memory_space<vmem>>, vector<32x128xf32>
    %c96 = arith.constant 96 : index
    %c0_66 = arith.constant 0 : index
    %58 = vector.load %arg10[%c96, %c0_66] : memref<896x128xf32, #tpu.memory_space<vmem>>, vector<32x128xf32>
    %59 = arith.maximumf %57, %58 : vector<32x128xf32>
    %c0_67 = arith.constant 0 : index
    %c0_68 = arith.constant 0 : index
    %60 = vector.load %arg15[%c0_67, %c0_68] : memref<32x128xf32, #tpu.memory_space<vmem>>, vector<32x128xf32>
    tpu.vector_store %arg15[%c0_67, %c0_68], %59 {strides = array<i32>} : memref<32x128xf32, #tpu.memory_space<vmem>>, vector<32x128xf32>,
    %c0_69 = arith.constant 0 : index
    %c0_70 = arith.constant 0 : index
    %61 = tpu.strided_load %arg15[%c0_69, %c0_70] {strides = array<i32: 2, 1>} : memref<32x128xf32, #tpu.memory_space<vmem>>, vector<16x128xf32>
    %c1_71 = arith.constant 1 : index
    %c0_72 = arith.constant 0 : index
    %62 = tpu.strided_load %arg15[%c1_71, %c0_72] {strides = array<i32: 2, 1>} : memref<32x128xf32, #tpu.memory_space<vmem>>, vector<16x128xf32>
    %63 = arith.maximumf %61, %62 : vector<16x128xf32>
    %c16 = arith.constant 16 : index
    %c0_73 = arith.constant 0 : index
    %64 = vector.load %arg11[%c16, %c0_73] : memref<232x128xf32, #tpu.memory_space<vmem>>, vector<16x128xf32>
    tpu.vector_store %arg11[%c16, %c0_73], %63 {strides = array<i32>} : memref<232x128xf32, #tpu.memory_space<vmem>>, vector<16x128xf32>,
    %c128_74 = arith.constant 128 : index
    %c0_75 = arith.constant 0 : index
    %65 = vector.load %arg10[%c128_74, %c0_75] : memref<896x128xf32, #tpu.memory_space<vmem>>, vector<32x128xf32>
    %c160 = arith.constant 160 : index
    %c0_76 = arith.constant 0 : index
    %66 = vector.load %arg10[%c160, %c0_76] : memref<896x128xf32, #tpu.memory_space<vmem>>, vector<32x128xf32>
    %67 = arith.maximumf %65, %66 : vector<32x128xf32>
    %c0_77 = arith.constant 0 : index
    %c0_78 = arith.constant 0 : index
    %68 = vector.load %arg15[%c0_77, %c0_78] : memref<32x128xf32, #tpu.memory_space<vmem>>, vector<32x128xf32>
    tpu.vector_store %arg15[%c0_77, %c0_78], %67 {strides = array<i32>} : memref<32x128xf32, #tpu.memory_space<vmem>>, vector<32x128xf32>,
    %c0_79 = arith.constant 0 : index
    %c0_80 = arith.constant 0 : index
    %69 = tpu.strided_load %arg15[%c0_79, %c0_80] {strides = array<i32: 2, 1>} : memref<32x128xf32, #tpu.memory_space<vmem>>, vector<16x128xf32>
    %c1_81 = arith.constant 1 : index
    %c0_82 = arith.constant 0 : index
    %70 = tpu.strided_load %arg15[%c1_81, %c0_82] {strides = array<i32: 2, 1>} : memref<32x128xf32, #tpu.memory_space<vmem>>, vector<16x128xf32>
    %71 = arith.maximumf %69, %70 : vector<16x128xf32>
    %c32_83 = arith.constant 32 : index
    %c0_84 = arith.constant 0 : index
    %72 = vector.load %arg11[%c32_83, %c0_84] : memref<232x128xf32, #tpu.memory_space<vmem>>, vector<16x128xf32>
    tpu.vector_store %arg11[%c32_83, %c0_84], %71 {strides = array<i32>} : memref<232x128xf32, #tpu.memory_space<vmem>>, vector<16x128xf32>,
    %c192 = arith.constant 192 : index
    %c0_85 = arith.constant 0 : index
    %73 = vector.load %arg10[%c192, %c0_85] : memref<896x128xf32, #tpu.memory_space<vmem>>, vector<32x128xf32>
    %c224 = arith.constant 224 : index
    %c0_86 = arith.constant 0 : index
    %74 = vector.load %arg10[%c224, %c0_86] : memref<896x128xf32, #tpu.memory_space<vmem>>, vector<32x128xf32>
    %75 = arith.maximumf %73, %74 : vector<32x128xf32>
    %c0_87 = arith.constant 0 : index
    %c0_88 = arith.constant 0 : index
    %76 = vector.load %arg15[%c0_87, %c0_88] : memref<32x128xf32, #tpu.memory_space<vmem>>, vector<32x128xf32>
    tpu.vector_store %arg15[%c0_87, %c0_88], %75 {strides = array<i32>} : memref<32x128xf32, #tpu.memory_space<vmem>>, vector<32x128xf32>,
    %c0_89 = arith.constant 0 : index
    %c0_90 = arith.constant 0 : index
    %77 = tpu.strided_load %arg15[%c0_89, %c0_90] {strides = array<i32: 2, 1>} : memref<32x128xf32, #tpu.memory_space<vmem>>, vector<16x128xf32>
    %c1_91 = arith.constant 1 : index
    %c0_92 = arith.constant 0 : index
    %78 = tpu.strided_load %arg15[%c1_91, %c0_92] {strides = array<i32: 2, 1>} : memref<32x128xf32, #tpu.memory_space<vmem>>, vector<16x128xf32>
    %79 = arith.maximumf %77, %78 : vector<16x128xf32>
    %c48 = arith.constant 48 : index
    %c0_93 = arith.constant 0 : index
    %80 = vector.load %arg11[%c48, %c0_93] : memref<232x128xf32, #tpu.memory_space<vmem>>, vector<16x128xf32>
    tpu.vector_store %arg11[%c48, %c0_93], %79 {strides = array<i32>} : memref<232x128xf32, #tpu.memory_space<vmem>>, vector<16x128xf32>,
    %c256_94 = arith.constant 256 : index
    %c0_95 = arith.constant 0 : index
    %81 = vector.load %arg10[%c256_94, %c0_95] : memref<896x128xf32, #tpu.memory_space<vmem>>, vector<32x128xf32>
    %c288 = arith.constant 288 : index
    %c0_96 = arith.constant 0 : index
    %82 = vector.load %arg10[%c288, %c0_96] : memref<896x128xf32, #tpu.memory_space<vmem>>, vector<32x128xf32>
    %83 = arith.maximumf %81, %82 : vector<32x128xf32>
    %c0_97 = arith.constant 0 : index
    %c0_98 = arith.constant 0 : index
    %84 = vector.load %arg15[%c0_97, %c0_98] : memref<32x128xf32, #tpu.memory_space<vmem>>, vector<32x128xf32>
    tpu.vector_store %arg15[%c0_97, %c0_98], %83 {strides = array<i32>} : memref<32x128xf32, #tpu.memory_space<vmem>>, vector<32x128xf32>,
    %c0_99 = arith.constant 0 : index
    %c0_100 = arith.constant 0 : index
    %85 = tpu.strided_load %arg15[%c0_99, %c0_100] {strides = array<i32: 2, 1>} : memref<32x128xf32, #tpu.memory_space<vmem>>, vector<16x128xf32>
    %c1_101 = arith.constant 1 : index
    %c0_102 = arith.constant 0 : index
    %86 = tpu.strided_load %arg15[%c1_101, %c0_102] {strides = array<i32: 2, 1>} : memref<32x128xf32, #tpu.memory_space<vmem>>, vector<16x128xf32>
    %87 = arith.maximumf %85, %86 : vector<16x128xf32>
    %c64_103 = arith.constant 64 : index
    %c0_104 = arith.constant 0 : index
    %88 = vector.load %arg11[%c64_103, %c0_104] : memref<232x128xf32, #tpu.memory_space<vmem>>, vector<16x128xf32>
    tpu.vector_store %arg11[%c64_103, %c0_104], %87 {strides = array<i32>} : memref<232x128xf32, #tpu.memory_space<vmem>>, vector<16x128xf32>,
    %c320 = arith.constant 320 : index
    %c0_105 = arith.constant 0 : index
    %89 = vector.load %arg10[%c320, %c0_105] : memref<896x128xf32, #tpu.memory_space<vmem>>, vector<32x128xf32>
    %c352 = arith.constant 352 : index
    %c0_106 = arith.constant 0 : index
    %90 = vector.load %arg10[%c352, %c0_106] : memref<896x128xf32, #tpu.memory_space<vmem>>, vector<32x128xf32>
    %91 = arith.maximumf %89, %90 : vector<32x128xf32>
    %c0_107 = arith.constant 0 : index
    %c0_108 = arith.constant 0 : index
    %92 = vector.load %arg15[%c0_107, %c0_108] : memref<32x128xf32, #tpu.memory_space<vmem>>, vector<32x128xf32>
    tpu.vector_store %arg15[%c0_107, %c0_108], %91 {strides = array<i32>} : memref<32x128xf32, #tpu.memory_space<vmem>>, vector<32x128xf32>,
    %c0_109 = arith.constant 0 : index
    %c0_110 = arith.constant 0 : index
    %93 = tpu.strided_load %arg15[%c0_109, %c0_110] {strides = array<i32: 2, 1>} : memref<32x128xf32, #tpu.memory_space<vmem>>, vector<16x128xf32>
    %c1_111 = arith.constant 1 : index
    %c0_112 = arith.constant 0 : index
    %94 = tpu.strided_load %arg15[%c1_111, %c0_112] {strides = array<i32: 2, 1>} : memref<32x128xf32, #tpu.memory_space<vmem>>, vector<16x128xf32>
    %95 = arith.maximumf %93, %94 : vector<16x128xf32>
    %c80 = arith.constant 80 : index
    %c0_113 = arith.constant 0 : index
    %96 = vector.load %arg11[%c80, %c0_113] : memref<232x128xf32, #tpu.memory_space<vmem>>, vector<16x128xf32>
    tpu.vector_store %arg11[%c80, %c0_113], %95 {strides = array<i32>} : memref<232x128xf32, #tpu.memory_space<vmem>>, vector<16x128xf32>,
    %c384_114 = arith.constant 384 : index
    %c0_115 = arith.constant 0 : index
    %97 = vector.load %arg10[%c384_114, %c0_115] : memref<896x128xf32, #tpu.memory_space<vmem>>, vector<32x128xf32>
    %c416 = arith.constant 416 : index
    %c0_116 = arith.constant 0 : index
    %98 = vector.load %arg10[%c416, %c0_116] : memref<896x128xf32, #tpu.memory_space<vmem>>, vector<32x128xf32>
    %99 = arith.maximumf %97, %98 : vector<32x128xf32>
    %c0_117 = arith.constant 0 : index
    %c0_118 = arith.constant 0 : index
    %100 = vector.load %arg15[%c0_117, %c0_118] : memref<32x128xf32, #tpu.memory_space<vmem>>, vector<32x128xf32>
    tpu.vector_store %arg15[%c0_117, %c0_118], %99 {strides = array<i32>} : memref<32x128xf32, #tpu.memory_space<vmem>>, vector<32x128xf32>,
    %c0_119 = arith.constant 0 : index
    %c0_120 = arith.constant 0 : index
    %101 = tpu.strided_load %arg15[%c0_119, %c0_120] {strides = array<i32: 2, 1>} : memref<32x128xf32, #tpu.memory_space<vmem>>, vector<16x128xf32>
    %c1_121 = arith.constant 1 : index
    %c0_122 = arith.constant 0 : index
    %102 = tpu.strided_load %arg15[%c1_121, %c0_122] {strides = array<i32: 2, 1>} : memref<32x128xf32, #tpu.memory_space<vmem>>, vector<16x128xf32>
    %103 = arith.maximumf %101, %102 : vector<16x128xf32>
    %c96_123 = arith.constant 96 : index
    %c0_124 = arith.constant 0 : index
    %104 = vector.load %arg11[%c96_123, %c0_124] : memref<232x128xf32, #tpu.memory_space<vmem>>, vector<16x128xf32>
    tpu.vector_store %arg11[%c96_123, %c0_124], %103 {strides = array<i32>} : memref<232x128xf32, #tpu.memory_space<vmem>>, vector<16x128xf32>,
    %c448 = arith.constant 448 : index
    %c0_125 = arith.constant 0 : index
    %105 = vector.load %arg10[%c448, %c0_125] : memref<896x128xf32, #tpu.memory_space<vmem>>, vector<32x128xf32>
    %c480 = arith.constant 480 : index
    %c0_126 = arith.constant 0 : index
    %106 = vector.load %arg10[%c480, %c0_126] : memref<896x128xf32, #tpu.memory_space<vmem>>, vector<32x128xf32>
    %107 = arith.maximumf %105, %106 : vector<32x128xf32>
    %c0_127 = arith.constant 0 : index
    %c0_128 = arith.constant 0 : index
    %108 = vector.load %arg15[%c0_127, %c0_128] : memref<32x128xf32, #tpu.memory_space<vmem>>, vector<32x128xf32>
    tpu.vector_store %arg15[%c0_127, %c0_128], %107 {strides = array<i32>} : memref<32x128xf32, #tpu.memory_space<vmem>>, vector<32x128xf32>,
    %c0_129 = arith.constant 0 : index
    %c0_130 = arith.constant 0 : index
    %109 = tpu.strided_load %arg15[%c0_129, %c0_130] {strides = array<i32: 2, 1>} : memref<32x128xf32, #tpu.memory_space<vmem>>, vector<16x128xf32>
    %c1_131 = arith.constant 1 : index
    %c0_132 = arith.constant 0 : index
    %110 = tpu.strided_load %arg15[%c1_131, %c0_132] {strides = array<i32: 2, 1>} : memref<32x128xf32, #tpu.memory_space<vmem>>, vector<16x128xf32>
    %111 = arith.maximumf %109, %110 : vector<16x128xf32>
    %c112 = arith.constant 112 : index
    %c0_133 = arith.constant 0 : index
    %112 = vector.load %arg11[%c112, %c0_133] : memref<232x128xf32, #tpu.memory_space<vmem>>, vector<16x128xf32>
    tpu.vector_store %arg11[%c112, %c0_133], %111 {strides = array<i32>} : memref<232x128xf32, #tpu.memory_space<vmem>>, vector<16x128xf32>,
    %c512_134 = arith.constant 512 : index
    %c0_135 = arith.constant 0 : index
    %113 = vector.load %arg10[%c512_134, %c0_135] : memref<896x128xf32, #tpu.memory_space<vmem>>, vector<32x128xf32>
    %c544 = arith.constant 544 : index
    %c0_136 = arith.constant 0 : index
    %114 = vector.load %arg10[%c544, %c0_136] : memref<896x128xf32, #tpu.memory_space<vmem>>, vector<32x128xf32>
    %115 = arith.maximumf %113, %114 : vector<32x128xf32>
    %c0_137 = arith.constant 0 : index
    %c0_138 = arith.constant 0 : index
    %116 = vector.load %arg15[%c0_137, %c0_138] : memref<32x128xf32, #tpu.memory_space<vmem>>, vector<32x128xf32>
    tpu.vector_store %arg15[%c0_137, %c0_138], %115 {strides = array<i32>} : memref<32x128xf32, #tpu.memory_space<vmem>>, vector<32x128xf32>,
    %c0_139 = arith.constant 0 : index
    %c0_140 = arith.constant 0 : index
    %117 = tpu.strided_load %arg15[%c0_139, %c0_140] {strides = array<i32: 2, 1>} : memref<32x128xf32, #tpu.memory_space<vmem>>, vector<16x128xf32>
    %c1_141 = arith.constant 1 : index
    %c0_142 = arith.constant 0 : index
    %118 = tpu.strided_load %arg15[%c1_141, %c0_142] {strides = array<i32: 2, 1>} : memref<32x128xf32, #tpu.memory_space<vmem>>, vector<16x128xf32>
    %119 = arith.maximumf %117, %118 : vector<16x128xf32>
    %c128_143 = arith.constant 128 : index
    %c0_144 = arith.constant 0 : index
    %120 = vector.load %arg11[%c128_143, %c0_144] : memref<232x128xf32, #tpu.memory_space<vmem>>, vector<16x128xf32>
    tpu.vector_store %arg11[%c128_143, %c0_144], %119 {strides = array<i32>} : memref<232x128xf32, #tpu.memory_space<vmem>>, vector<16x128xf32>,
    %c576 = arith.constant 576 : index
    %c0_145 = arith.constant 0 : index
    %121 = vector.load %arg10[%c576, %c0_145] : memref<896x128xf32, #tpu.memory_space<vmem>>, vector<32x128xf32>
    %c608 = arith.constant 608 : index
    %c0_146 = arith.constant 0 : index
    %122 = vector.load %arg10[%c608, %c0_146] : memref<896x128xf32, #tpu.memory_space<vmem>>, vector<32x128xf32>
    %123 = arith.maximumf %121, %122 : vector<32x128xf32>
    %c0_147 = arith.constant 0 : index
    %c0_148 = arith.constant 0 : index
    %124 = vector.load %arg15[%c0_147, %c0_148] : memref<32x128xf32, #tpu.memory_space<vmem>>, vector<32x128xf32>
    tpu.vector_store %arg15[%c0_147, %c0_148], %123 {strides = array<i32>} : memref<32x128xf32, #tpu.memory_space<vmem>>, vector<32x128xf32>,
    %c0_149 = arith.constant 0 : index
    %c0_150 = arith.constant 0 : index
    %125 = tpu.strided_load %arg15[%c0_149, %c0_150] {strides = array<i32: 2, 1>} : memref<32x128xf32, #tpu.memory_space<vmem>>, vector<16x128xf32>
    %c1_151 = arith.constant 1 : index
    %c0_152 = arith.constant 0 : index
    %126 = tpu.strided_load %arg15[%c1_151, %c0_152] {strides = array<i32: 2, 1>} : memref<32x128xf32, #tpu.memory_space<vmem>>, vector<16x128xf32>
    %127 = arith.maximumf %125, %126 : vector<16x128xf32>
    %c144 = arith.constant 144 : index
    %c0_153 = arith.constant 0 : index
    %128 = vector.load %arg11[%c144, %c0_153] : memref<232x128xf32, #tpu.memory_space<vmem>>, vector<16x128xf32>
    tpu.vector_store %arg11[%c144, %c0_153], %127 {strides = array<i32>} : memref<232x128xf32, #tpu.memory_space<vmem>>, vector<16x128xf32>,
    %c640_154 = arith.constant 640 : index
    %c0_155 = arith.constant 0 : index
    %129 = vector.load %arg10[%c640_154, %c0_155] : memref<896x128xf32, #tpu.memory_space<vmem>>, vector<32x128xf32>
    %c672 = arith.constant 672 : index
    %c0_156 = arith.constant 0 : index
    %130 = vector.load %arg10[%c672, %c0_156] : memref<896x128xf32, #tpu.memory_space<vmem>>, vector<32x128xf32>
    %131 = arith.maximumf %129, %130 : vector<32x128xf32>
    %c0_157 = arith.constant 0 : index
    %c0_158 = arith.constant 0 : index
    %132 = vector.load %arg15[%c0_157, %c0_158] : memref<32x128xf32, #tpu.memory_space<vmem>>, vector<32x128xf32>
    tpu.vector_store %arg15[%c0_157, %c0_158], %131 {strides = array<i32>} : memref<32x128xf32, #tpu.memory_space<vmem>>, vector<32x128xf32>,
    %c0_159 = arith.constant 0 : index
    %c0_160 = arith.constant 0 : index
    %133 = tpu.strided_load %arg15[%c0_159, %c0_160] {strides = array<i32: 2, 1>} : memref<32x128xf32, #tpu.memory_space<vmem>>, vector<16x128xf32>
    %c1_161 = arith.constant 1 : index
    %c0_162 = arith.constant 0 : index
    %134 = tpu.strided_load %arg15[%c1_161, %c0_162] {strides = array<i32: 2, 1>} : memref<32x128xf32, #tpu.memory_space<vmem>>, vector<16x128xf32>
    %135 = arith.maximumf %133, %134 : vector<16x128xf32>
    %c160_163 = arith.constant 160 : index
    %c0_164 = arith.constant 0 : index
    %136 = vector.load %arg11[%c160_163, %c0_164] : memref<232x128xf32, #tpu.memory_space<vmem>>, vector<16x128xf32>
    tpu.vector_store %arg11[%c160_163, %c0_164], %135 {strides = array<i32>} : memref<232x128xf32, #tpu.memory_space<vmem>>, vector<16x128xf32>,
    %c704 = arith.constant 704 : index
    %c0_165 = arith.constant 0 : index
    %137 = vector.load %arg10[%c704, %c0_165] : memref<896x128xf32, #tpu.memory_space<vmem>>, vector<32x128xf32>
    %c736 = arith.constant 736 : index
    %c0_166 = arith.constant 0 : index
    %138 = vector.load %arg10[%c736, %c0_166] : memref<896x128xf32, #tpu.memory_space<vmem>>, vector<32x128xf32>
    %139 = arith.maximumf %137, %138 : vector<32x128xf32>
    %c0_167 = arith.constant 0 : index
    %c0_168 = arith.constant 0 : index
    %140 = vector.load %arg15[%c0_167, %c0_168] : memref<32x128xf32, #tpu.memory_space<vmem>>, vector<32x128xf32>
    tpu.vector_store %arg15[%c0_167, %c0_168], %139 {strides = array<i32>} : memref<32x128xf32, #tpu.memory_space<vmem>>, vector<32x128xf32>,
    %c0_169 = arith.constant 0 : index
    %c0_170 = arith.constant 0 : index
    %141 = tpu.strided_load %arg15[%c0_169, %c0_170] {strides = array<i32: 2, 1>} : memref<32x128xf32, #tpu.memory_space<vmem>>, vector<16x128xf32>
    %c1_171 = arith.constant 1 : index
    %c0_172 = arith.constant 0 : index
    %142 = tpu.strided_load %arg15[%c1_171, %c0_172] {strides = array<i32: 2, 1>} : memref<32x128xf32, #tpu.memory_space<vmem>>, vector<16x128xf32>
    %143 = arith.maximumf %141, %142 : vector<16x128xf32>
    %c176 = arith.constant 176 : index
    %c0_173 = arith.constant 0 : index
    %144 = vector.load %arg11[%c176, %c0_173] : memref<232x128xf32, #tpu.memory_space<vmem>>, vector<16x128xf32>
    tpu.vector_store %arg11[%c176, %c0_173], %143 {strides = array<i32>} : memref<232x128xf32, #tpu.memory_space<vmem>>, vector<16x128xf32>,
    %c768_174 = arith.constant 768 : index
    %c0_175 = arith.constant 0 : index
    %145 = vector.load %arg10[%c768_174, %c0_175] : memref<896x128xf32, #tpu.memory_space<vmem>>, vector<32x128xf32>
    %c800 = arith.constant 800 : index
    %c0_176 = arith.constant 0 : index
    %146 = vector.load %arg10[%c800, %c0_176] : memref<896x128xf32, #tpu.memory_space<vmem>>, vector<32x128xf32>
    %147 = arith.maximumf %145, %146 : vector<32x128xf32>
    %c0_177 = arith.constant 0 : index
    %c0_178 = arith.constant 0 : index
    %148 = vector.load %arg15[%c0_177, %c0_178] : memref<32x128xf32, #tpu.memory_space<vmem>>, vector<32x128xf32>
    tpu.vector_store %arg15[%c0_177, %c0_178], %147 {strides = array<i32>} : memref<32x128xf32, #tpu.memory_space<vmem>>, vector<32x128xf32>,
    %c0_179 = arith.constant 0 : index
    %c0_180 = arith.constant 0 : index
    %149 = tpu.strided_load %arg15[%c0_179, %c0_180] {strides = array<i32: 2, 1>} : memref<32x128xf32, #tpu.memory_space<vmem>>, vector<16x128xf32>
    %c1_181 = arith.constant 1 : index
    %c0_182 = arith.constant 0 : index
    %150 = tpu.strided_load %arg15[%c1_181, %c0_182] {strides = array<i32: 2, 1>} : memref<32x128xf32, #tpu.memory_space<vmem>>, vector<16x128xf32>
    %151 = arith.maximumf %149, %150 : vector<16x128xf32>
    %c192_183 = arith.constant 192 : index
    %c0_184 = arith.constant 0 : index
    %152 = vector.load %arg11[%c192_183, %c0_184] : memref<232x128xf32, #tpu.memory_space<vmem>>, vector<16x128xf32>
    tpu.vector_store %arg11[%c192_183, %c0_184], %151 {strides = array<i32>} : memref<232x128xf32, #tpu.memory_space<vmem>>, vector<16x128xf32>,
    %c832 = arith.constant 832 : index
    %c0_185 = arith.constant 0 : index
    %153 = vector.load %arg10[%c832, %c0_185] : memref<896x128xf32, #tpu.memory_space<vmem>>, vector<32x128xf32>
    %c864 = arith.constant 864 : index
    %c0_186 = arith.constant 0 : index
    %154 = vector.load %arg10[%c864, %c0_186] : memref<896x128xf32, #tpu.memory_space<vmem>>, vector<32x128xf32>
    %155 = arith.maximumf %153, %154 : vector<32x128xf32>
    %c0_187 = arith.constant 0 : index
    %c0_188 = arith.constant 0 : index
    %156 = vector.load %arg15[%c0_187, %c0_188] : memref<32x128xf32, #tpu.memory_space<vmem>>, vector<32x128xf32>
    tpu.vector_store %arg15[%c0_187, %c0_188], %155 {strides = array<i32>} : memref<32x128xf32, #tpu.memory_space<vmem>>, vector<32x128xf32>,
    %c0_189 = arith.constant 0 : index
    %c0_190 = arith.constant 0 : index
    %157 = tpu.strided_load %arg15[%c0_189, %c0_190] {strides = array<i32: 2, 1>} : memref<32x128xf32, #tpu.memory_space<vmem>>, vector<16x128xf32>
    %c1_191 = arith.constant 1 : index
    %c0_192 = arith.constant 0 : index
    %158 = tpu.strided_load %arg15[%c1_191, %c0_192] {strides = array<i32: 2, 1>} : memref<32x128xf32, #tpu.memory_space<vmem>>, vector<16x128xf32>
    %159 = arith.maximumf %157, %158 : vector<16x128xf32>
    %c208 = arith.constant 208 : index
    %c0_193 = arith.constant 0 : index
    %160 = vector.load %arg11[%c208, %c0_193] : memref<232x128xf32, #tpu.memory_space<vmem>>, vector<16x128xf32>
    tpu.vector_store %arg11[%c208, %c0_193], %159 {strides = array<i32>} : memref<232x128xf32, #tpu.memory_space<vmem>>, vector<16x128xf32>,
    %cst_194 = arith.constant 0.000000e+00 : f32
    %161 = vector.broadcast %cst_194 : f32 to vector<8x128xf32>
    %c224_195 = arith.constant 224 : index
    %c0_196 = arith.constant 0 : index
    %162 = vector.load %arg11[%c224_195, %c0_196] : memref<232x128xf32, #tpu.memory_space<vmem>>, vector<8x128xf32>
    tpu.vector_store %arg11[%c224_195, %c0_196], %161 {strides = array<i32>} : memref<232x128xf32, #tpu.memory_space<vmem>>, vector<8x128xf32>,
    %163 = tpu.iota {dimensions = array<i32: 1>} : vector<16x128xi32>
    %c40_i32 = arith.constant 40 : i32
    %164 = vector.broadcast %c40_i32 : i32 to vector<16x128xi32>
    %165 = arith.cmpi eq, %163, %164 : vector<16x128xi32>
    %166 = arith.extui %165 : vector<16x128xi1> to vector<16x128xi32>
    %167 = arith.sitofp %166 : vector<16x128xi32> to vector<16x128xf32>
    %c0_i32 = arith.constant 0 : i32
    %168 = vector.broadcast %c0_i32 : i32 to vector<16x128xi32>
    %169 = arith.cmpi sge, %163, %168 : vector<16x128xi32>
    %c8_i32 = arith.constant 8 : i32
    %170 = vector.broadcast %c8_i32 : i32 to vector<16x128xi32>
    %171 = arith.cmpi slt, %163, %170 : vector<16x128xi32>
    %172 = arith.andi %169, %171 : vector<16x128xi1>
    %173 = arith.extui %172 : vector<16x128xi1> to vector<16x128xi32>
    %174 = arith.sitofp %173 : vector<16x128xi32> to vector<16x128xf32>
    %c8_i32_197 = arith.constant 8 : i32
    %175 = vector.broadcast %c8_i32_197 : i32 to vector<16x128xi32>
    %176 = arith.cmpi sge, %163, %175 : vector<16x128xi32>
    %c16_i32 = arith.constant 16 : i32
    %177 = vector.broadcast %c16_i32 : i32 to vector<16x128xi32>
    %178 = arith.cmpi slt, %163, %177 : vector<16x128xi32>
    %179 = arith.andi %176, %178 : vector<16x128xi1>
    %180 = arith.extui %179 : vector<16x128xi1> to vector<16x128xi32>
    %181 = arith.sitofp %180 : vector<16x128xi32> to vector<16x128xf32>
    %c16_i32_198 = arith.constant 16 : i32
    %182 = vector.broadcast %c16_i32_198 : i32 to vector<16x128xi32>
    %183 = arith.cmpi sge, %163, %182 : vector<16x128xi32>
    %c24_i32 = arith.constant 24 : i32
    %184 = vector.broadcast %c24_i32 : i32 to vector<16x128xi32>
    %185 = arith.cmpi slt, %163, %184 : vector<16x128xi32>
    %186 = arith.andi %183, %185 : vector<16x128xi1>
    %187 = arith.extui %186 : vector<16x128xi1> to vector<16x128xi32>
    %188 = arith.sitofp %187 : vector<16x128xi32> to vector<16x128xf32>
    %c24_i32_199 = arith.constant 24 : i32
    %189 = vector.broadcast %c24_i32_199 : i32 to vector<16x128xi32>
    %190 = arith.cmpi sge, %163, %189 : vector<16x128xi32>
    %c32_i32 = arith.constant 32 : i32
    %191 = vector.broadcast %c32_i32 : i32 to vector<16x128xi32>
    %192 = arith.cmpi slt, %163, %191 : vector<16x128xi32>
    %193 = arith.andi %190, %192 : vector<16x128xi1>
    %194 = arith.extui %193 : vector<16x128xi1> to vector<16x128xi32>
    %195 = arith.sitofp %194 : vector<16x128xi32> to vector<16x128xf32>
    %c32_i32_200 = arith.constant 32 : i32
    %196 = vector.broadcast %c32_i32_200 : i32 to vector<16x128xi32>
    %197 = arith.cmpi sge, %163, %196 : vector<16x128xi32>
    %c40_i32_201 = arith.constant 40 : i32
    %198 = vector.broadcast %c40_i32_201 : i32 to vector<16x128xi32>
    %199 = arith.cmpi slt, %163, %198 : vector<16x128xi32>
    %200 = arith.andi %197, %199 : vector<16x128xi1>
    %201 = arith.extui %200 : vector<16x128xi1> to vector<16x128xi32>
    %202 = arith.sitofp %201 : vector<16x128xi32> to vector<16x128xf32>
    %c0_202 = arith.constant 0 : index
    %c0_203 = arith.constant 0 : index
    %203 = vector.load %arg11[%c0_202, %c0_203] : memref<232x128xf32, #tpu.memory_space<vmem>>, vector<16x128xf32>
    %204 = arith.mulf %203, %174 : vector<16x128xf32>
    %205 = arith.addf %204, %167 : vector<16x128xf32>
    %c1_204 = arith.constant 1 : index
    %c0_205 = arith.constant 0 : index
    %206 = vector.load %arg11[%c1_204, %c0_205] : memref<232x128xf32, #tpu.memory_space<vmem>>, vector<16x128xf32>
    %207 = arith.mulf %206, %181 : vector<16x128xf32>
    %208 = arith.addf %205, %207 : vector<16x128xf32>
    %c2 = arith.constant 2 : index
    %c0_206 = arith.constant 0 : index
    %209 = vector.load %arg11[%c2, %c0_206] : memref<232x128xf32, #tpu.memory_space<vmem>>, vector<16x128xf32>
    %210 = arith.mulf %209, %188 : vector<16x128xf32>
    %211 = arith.addf %208, %210 : vector<16x128xf32>
    %c3 = arith.constant 3 : index
    %c0_207 = arith.constant 0 : index
    %212 = vector.load %arg11[%c3, %c0_207] : memref<232x128xf32, #tpu.memory_space<vmem>>, vector<16x128xf32>
    %213 = arith.mulf %212, %195 : vector<16x128xf32>
    %214 = arith.addf %211, %213 : vector<16x128xf32>
    %c4 = arith.constant 4 : index
    %c0_208 = arith.constant 0 : index
    %215 = vector.load %arg11[%c4, %c0_208] : memref<232x128xf32, #tpu.memory_space<vmem>>, vector<16x128xf32>
    %216 = arith.mulf %215, %202 : vector<16x128xf32>
    %217 = arith.addf %214, %216 : vector<16x128xf32>
    %218 = arith.truncf %217 : vector<16x128xf32> to vector<16x128xbf16>
    %c0_209 = arith.constant 0 : index
    %c0_210 = arith.constant 0 : index
    %219 = vector.load %arg12[%c0_209, %c0_210] : memref<224x128xbf16, #tpu.memory_space<vmem>>, vector<16x128xbf16>
    tpu.vector_store %arg12[%c0_209, %c0_210], %218 {strides = array<i32>} : memref<224x128xbf16, #tpu.memory_space<vmem>>, vector<16x128xbf16>,
    %c16_211 = arith.constant 16 : index
    %c0_212 = arith.constant 0 : index
    %220 = vector.load %arg11[%c16_211, %c0_212] : memref<232x128xf32, #tpu.memory_space<vmem>>, vector<16x128xf32>
    %221 = arith.mulf %220, %174 : vector<16x128xf32>
    %222 = arith.addf %221, %167 : vector<16x128xf32>
    %c17 = arith.constant 17 : index
    %c0_213 = arith.constant 0 : index
    %223 = vector.load %arg11[%c17, %c0_213] : memref<232x128xf32, #tpu.memory_space<vmem>>, vector<16x128xf32>
    %224 = arith.mulf %223, %181 : vector<16x128xf32>
    %225 = arith.addf %222, %224 : vector<16x128xf32>
    %c18 = arith.constant 18 : index
    %c0_214 = arith.constant 0 : index
    %226 = vector.load %arg11[%c18, %c0_214] : memref<232x128xf32, #tpu.memory_space<vmem>>, vector<16x128xf32>
    %227 = arith.mulf %226, %188 : vector<16x128xf32>
    %228 = arith.addf %225, %227 : vector<16x128xf32>
    %c19 = arith.constant 19 : index
    %c0_215 = arith.constant 0 : index
    %229 = vector.load %arg11[%c19, %c0_215] : memref<232x128xf32, #tpu.memory_space<vmem>>, vector<16x128xf32>
    %230 = arith.mulf %229, %195 : vector<16x128xf32>
    %231 = arith.addf %228, %230 : vector<16x128xf32>
    %c20 = arith.constant 20 : index
    %c0_216 = arith.constant 0 : index
    %232 = vector.load %arg11[%c20, %c0_216] : memref<232x128xf32, #tpu.memory_space<vmem>>, vector<16x128xf32>
    %233 = arith.mulf %232, %202 : vector<16x128xf32>
    %234 = arith.addf %231, %233 : vector<16x128xf32>
    %235 = arith.truncf %234 : vector<16x128xf32> to vector<16x128xbf16>
    %c16_217 = arith.constant 16 : index
    %c0_218 = arith.constant 0 : index
    %236 = vector.load %arg12[%c16_217, %c0_218] : memref<224x128xbf16, #tpu.memory_space<vmem>>, vector<16x128xbf16>
    tpu.vector_store %arg12[%c16_217, %c0_218], %235 {strides = array<i32>} : memref<224x128xbf16, #tpu.memory_space<vmem>>, vector<16x128xbf16>,
    %c32_219 = arith.constant 32 : index
    %c0_220 = arith.constant 0 : index
    %237 = vector.load %arg11[%c32_219, %c0_220] : memref<232x128xf32, #tpu.memory_space<vmem>>, vector<16x128xf32>
    %238 = arith.mulf %237, %174 : vector<16x128xf32>
    %239 = arith.addf %238, %167 : vector<16x128xf32>
    %c33 = arith.constant 33 : index
    %c0_221 = arith.constant 0 : index
    %240 = vector.load %arg11[%c33, %c0_221] : memref<232x128xf32, #tpu.memory_space<vmem>>, vector<16x128xf32>
    %241 = arith.mulf %240, %181 : vector<16x128xf32>
    %242 = arith.addf %239, %241 : vector<16x128xf32>
    %c34 = arith.constant 34 : index
    %c0_222 = arith.constant 0 : index
    %243 = vector.load %arg11[%c34, %c0_222] : memref<232x128xf32, #tpu.memory_space<vmem>>, vector<16x128xf32>
    %244 = arith.mulf %243, %188 : vector<16x128xf32>
    %245 = arith.addf %242, %244 : vector<16x128xf32>
    %c35 = arith.constant 35 : index
    %c0_223 = arith.constant 0 : index
    %246 = vector.load %arg11[%c35, %c0_223] : memref<232x128xf32, #tpu.memory_space<vmem>>, vector<16x128xf32>
    %247 = arith.mulf %246, %195 : vector<16x128xf32>
    %248 = arith.addf %245, %247 : vector<16x128xf32>
    %c36 = arith.constant 36 : index
    %c0_224 = arith.constant 0 : index
    %249 = vector.load %arg11[%c36, %c0_224] : memref<232x128xf32, #tpu.memory_space<vmem>>, vector<16x128xf32>
    %250 = arith.mulf %249, %202 : vector<16x128xf32>
    %251 = arith.addf %248, %250 : vector<16x128xf32>
    %252 = arith.truncf %251 : vector<16x128xf32> to vector<16x128xbf16>
    %c32_225 = arith.constant 32 : index
    %c0_226 = arith.constant 0 : index
    %253 = vector.load %arg12[%c32_225, %c0_226] : memref<224x128xbf16, #tpu.memory_space<vmem>>, vector<16x128xbf16>
    tpu.vector_store %arg12[%c32_225, %c0_226], %252 {strides = array<i32>} : memref<224x128xbf16, #tpu.memory_space<vmem>>, vector<16x128xbf16>,
    %c48_227 = arith.constant 48 : index
    %c0_228 = arith.constant 0 : index
    %254 = vector.load %arg11[%c48_227, %c0_228] : memref<232x128xf32, #tpu.memory_space<vmem>>, vector<16x128xf32>
    %255 = arith.mulf %254, %174 : vector<16x128xf32>
    %256 = arith.addf %255, %167 : vector<16x128xf32>
    %c49 = arith.constant 49 : index
    %c0_229 = arith.constant 0 : index
    %257 = vector.load %arg11[%c49, %c0_229] : memref<232x128xf32, #tpu.memory_space<vmem>>, vector<16x128xf32>
    %258 = arith.mulf %257, %181 : vector<16x128xf32>
    %259 = arith.addf %256, %258 : vector<16x128xf32>
    %c50 = arith.constant 50 : index
    %c0_230 = arith.constant 0 : index
    %260 = vector.load %arg11[%c50, %c0_230] : memref<232x128xf32, #tpu.memory_space<vmem>>, vector<16x128xf32>
    %261 = arith.mulf %260, %188 : vector<16x128xf32>
    %262 = arith.addf %259, %261 : vector<16x128xf32>
    %c51 = arith.constant 51 : index
    %c0_231 = arith.constant 0 : index
    %263 = vector.load %arg11[%c51, %c0_231] : memref<232x128xf32, #tpu.memory_space<vmem>>, vector<16x128xf32>
    %264 = arith.mulf %263, %195 : vector<16x128xf32>
    %265 = arith.addf %262, %264 : vector<16x128xf32>
    %c52 = arith.constant 52 : index
    %c0_232 = arith.constant 0 : index
    %266 = vector.load %arg11[%c52, %c0_232] : memref<232x128xf32, #tpu.memory_space<vmem>>, vector<16x128xf32>
    %267 = arith.mulf %266, %202 : vector<16x128xf32>
    %268 = arith.addf %265, %267 : vector<16x128xf32>
    %269 = arith.truncf %268 : vector<16x128xf32> to vector<16x128xbf16>
    %c48_233 = arith.constant 48 : index
    %c0_234 = arith.constant 0 : index
    %270 = vector.load %arg12[%c48_233, %c0_234] : memref<224x128xbf16, #tpu.memory_space<vmem>>, vector<16x128xbf16>
    tpu.vector_store %arg12[%c48_233, %c0_234], %269 {strides = array<i32>} : memref<224x128xbf16, #tpu.memory_space<vmem>>, vector<16x128xbf16>,
    %c64_235 = arith.constant 64 : index
    %c0_236 = arith.constant 0 : index
    %271 = vector.load %arg11[%c64_235, %c0_236] : memref<232x128xf32, #tpu.memory_space<vmem>>, vector<16x128xf32>
    %272 = arith.mulf %271, %174 : vector<16x128xf32>
    %273 = arith.addf %272, %167 : vector<16x128xf32>
    %c65 = arith.constant 65 : index
    %c0_237 = arith.constant 0 : index
    %274 = vector.load %arg11[%c65, %c0_237] : memref<232x128xf32, #tpu.memory_space<vmem>>, vector<16x128xf32>
    %275 = arith.mulf %274, %181 : vector<16x128xf32>
    %276 = arith.addf %273, %275 : vector<16x128xf32>
    %c66 = arith.constant 66 : index
    %c0_238 = arith.constant 0 : index
    %277 = vector.load %arg11[%c66, %c0_238] : memref<232x128xf32, #tpu.memory_space<vmem>>, vector<16x128xf32>
    %278 = arith.mulf %277, %188 : vector<16x128xf32>
    %279 = arith.addf %276, %278 : vector<16x128xf32>
    %c67 = arith.constant 67 : index
    %c0_239 = arith.constant 0 : index
    %280 = vector.load %arg11[%c67, %c0_239] : memref<232x128xf32, #tpu.memory_space<vmem>>, vector<16x128xf32>
    %281 = arith.mulf %280, %195 : vector<16x128xf32>
    %282 = arith.addf %279, %281 : vector<16x128xf32>
    %c68 = arith.constant 68 : index
    %c0_240 = arith.constant 0 : index
    %283 = vector.load %arg11[%c68, %c0_240] : memref<232x128xf32, #tpu.memory_space<vmem>>, vector<16x128xf32>
    %284 = arith.mulf %283, %202 : vector<16x128xf32>
    %285 = arith.addf %282, %284 : vector<16x128xf32>
    %286 = arith.truncf %285 : vector<16x128xf32> to vector<16x128xbf16>
    %c64_241 = arith.constant 64 : index
    %c0_242 = arith.constant 0 : index
    %287 = vector.load %arg12[%c64_241, %c0_242] : memref<224x128xbf16, #tpu.memory_space<vmem>>, vector<16x128xbf16>
    tpu.vector_store %arg12[%c64_241, %c0_242], %286 {strides = array<i32>} : memref<224x128xbf16, #tpu.memory_space<vmem>>, vector<16x128xbf16>,
    %c80_243 = arith.constant 80 : index
    %c0_244 = arith.constant 0 : index
    %288 = vector.load %arg11[%c80_243, %c0_244] : memref<232x128xf32, #tpu.memory_space<vmem>>, vector<16x128xf32>
    %289 = arith.mulf %288, %174 : vector<16x128xf32>
    %290 = arith.addf %289, %167 : vector<16x128xf32>
    %c81 = arith.constant 81 : index
    %c0_245 = arith.constant 0 : index
    %291 = vector.load %arg11[%c81, %c0_245] : memref<232x128xf32, #tpu.memory_space<vmem>>, vector<16x128xf32>
    %292 = arith.mulf %291, %181 : vector<16x128xf32>
    %293 = arith.addf %290, %292 : vector<16x128xf32>
    %c82 = arith.constant 82 : index
    %c0_246 = arith.constant 0 : index
    %294 = vector.load %arg11[%c82, %c0_246] : memref<232x128xf32, #tpu.memory_space<vmem>>, vector<16x128xf32>
    %295 = arith.mulf %294, %188 : vector<16x128xf32>
    %296 = arith.addf %293, %295 : vector<16x128xf32>
    %c83 = arith.constant 83 : index
    %c0_247 = arith.constant 0 : index
    %297 = vector.load %arg11[%c83, %c0_247] : memref<232x128xf32, #tpu.memory_space<vmem>>, vector<16x128xf32>
    %298 = arith.mulf %297, %195 : vector<16x128xf32>
    %299 = arith.addf %296, %298 : vector<16x128xf32>
    %c84 = arith.constant 84 : index
    %c0_248 = arith.constant 0 : index
    %300 = vector.load %arg11[%c84, %c0_248] : memref<232x128xf32, #tpu.memory_space<vmem>>, vector<16x128xf32>
    %301 = arith.mulf %300, %202 : vector<16x128xf32>
    %302 = arith.addf %299, %301 : vector<16x128xf32>
    %303 = arith.truncf %302 : vector<16x128xf32> to vector<16x128xbf16>
    %c80_249 = arith.constant 80 : index
    %c0_250 = arith.constant 0 : index
    %304 = vector.load %arg12[%c80_249, %c0_250] : memref<224x128xbf16, #tpu.memory_space<vmem>>, vector<16x128xbf16>
    tpu.vector_store %arg12[%c80_249, %c0_250], %303 {strides = array<i32>} : memref<224x128xbf16, #tpu.memory_space<vmem>>, vector<16x128xbf16>,
    %c96_251 = arith.constant 96 : index
    %c0_252 = arith.constant 0 : index
    %305 = vector.load %arg11[%c96_251, %c0_252] : memref<232x128xf32, #tpu.memory_space<vmem>>, vector<16x128xf32>
    %306 = arith.mulf %305, %174 : vector<16x128xf32>
    %307 = arith.addf %306, %167 : vector<16x128xf32>
    %c97 = arith.constant 97 : index
    %c0_253 = arith.constant 0 : index
    %308 = vector.load %arg11[%c97, %c0_253] : memref<232x128xf32, #tpu.memory_space<vmem>>, vector<16x128xf32>
    %309 = arith.mulf %308, %181 : vector<16x128xf32>
    %310 = arith.addf %307, %309 : vector<16x128xf32>
    %c98 = arith.constant 98 : index
    %c0_254 = arith.constant 0 : index
    %311 = vector.load %arg11[%c98, %c0_254] : memref<232x128xf32, #tpu.memory_space<vmem>>, vector<16x128xf32>
    %312 = arith.mulf %311, %188 : vector<16x128xf32>
    %313 = arith.addf %310, %312 : vector<16x128xf32>
    %c99 = arith.constant 99 : index
    %c0_255 = arith.constant 0 : index
    %314 = vector.load %arg11[%c99, %c0_255] : memref<232x128xf32, #tpu.memory_space<vmem>>, vector<16x128xf32>
    %315 = arith.mulf %314, %195 : vector<16x128xf32>
    %316 = arith.addf %313, %315 : vector<16x128xf32>
    %c100 = arith.constant 100 : index
    %c0_256 = arith.constant 0 : index
    %317 = vector.load %arg11[%c100, %c0_256] : memref<232x128xf32, #tpu.memory_space<vmem>>, vector<16x128xf32>
    %318 = arith.mulf %317, %202 : vector<16x128xf32>
    %319 = arith.addf %316, %318 : vector<16x128xf32>
    %320 = arith.truncf %319 : vector<16x128xf32> to vector<16x128xbf16>
    %c96_257 = arith.constant 96 : index
    %c0_258 = arith.constant 0 : index
    %321 = vector.load %arg12[%c96_257, %c0_258] : memref<224x128xbf16, #tpu.memory_space<vmem>>, vector<16x128xbf16>
    tpu.vector_store %arg12[%c96_257, %c0_258], %320 {strides = array<i32>} : memref<224x128xbf16, #tpu.memory_space<vmem>>, vector<16x128xbf16>,
    %c112_259 = arith.constant 112 : index
    %c0_260 = arith.constant 0 : index
    %322 = vector.load %arg11[%c112_259, %c0_260] : memref<232x128xf32, #tpu.memory_space<vmem>>, vector<16x128xf32>
    %323 = arith.mulf %322, %174 : vector<16x128xf32>
    %324 = arith.addf %323, %167 : vector<16x128xf32>
    %c113 = arith.constant 113 : index
    %c0_261 = arith.constant 0 : index
    %325 = vector.load %arg11[%c113, %c0_261] : memref<232x128xf32, #tpu.memory_space<vmem>>, vector<16x128xf32>
    %326 = arith.mulf %325, %181 : vector<16x128xf32>
    %327 = arith.addf %324, %326 : vector<16x128xf32>
    %c114 = arith.constant 114 : index
    %c0_262 = arith.constant 0 : index
    %328 = vector.load %arg11[%c114, %c0_262] : memref<232x128xf32, #tpu.memory_space<vmem>>, vector<16x128xf32>
    %329 = arith.mulf %328, %188 : vector<16x128xf32>
    %330 = arith.addf %327, %329 : vector<16x128xf32>
    %c115 = arith.constant 115 : index
    %c0_263 = arith.constant 0 : index
    %331 = vector.load %arg11[%c115, %c0_263] : memref<232x128xf32, #tpu.memory_space<vmem>>, vector<16x128xf32>
    %332 = arith.mulf %331, %195 : vector<16x128xf32>
    %333 = arith.addf %330, %332 : vector<16x128xf32>
    %c116 = arith.constant 116 : index
    %c0_264 = arith.constant 0 : index
    %334 = vector.load %arg11[%c116, %c0_264] : memref<232x128xf32, #tpu.memory_space<vmem>>, vector<16x128xf32>
    %335 = arith.mulf %334, %202 : vector<16x128xf32>
    %336 = arith.addf %333, %335 : vector<16x128xf32>
    %337 = arith.truncf %336 : vector<16x128xf32> to vector<16x128xbf16>
    %c112_265 = arith.constant 112 : index
    %c0_266 = arith.constant 0 : index
    %338 = vector.load %arg12[%c112_265, %c0_266] : memref<224x128xbf16, #tpu.memory_space<vmem>>, vector<16x128xbf16>
    tpu.vector_store %arg12[%c112_265, %c0_266], %337 {strides = array<i32>} : memref<224x128xbf16, #tpu.memory_space<vmem>>, vector<16x128xbf16>,
    %c128_267 = arith.constant 128 : index
    %c0_268 = arith.constant 0 : index
    %339 = vector.load %arg11[%c128_267, %c0_268] : memref<232x128xf32, #tpu.memory_space<vmem>>, vector<16x128xf32>
    %340 = arith.mulf %339, %174 : vector<16x128xf32>
    %341 = arith.addf %340, %167 : vector<16x128xf32>
    %c129 = arith.constant 129 : index
    %c0_269 = arith.constant 0 : index
    %342 = vector.load %arg11[%c129, %c0_269] : memref<232x128xf32, #tpu.memory_space<vmem>>, vector<16x128xf32>
    %343 = arith.mulf %342, %181 : vector<16x128xf32>
    %344 = arith.addf %341, %343 : vector<16x128xf32>
    %c130 = arith.constant 130 : index
    %c0_270 = arith.constant 0 : index
    %345 = vector.load %arg11[%c130, %c0_270] : memref<232x128xf32, #tpu.memory_space<vmem>>, vector<16x128xf32>
    %346 = arith.mulf %345, %188 : vector<16x128xf32>
    %347 = arith.addf %344, %346 : vector<16x128xf32>
    %c131 = arith.constant 131 : index
    %c0_271 = arith.constant 0 : index
    %348 = vector.load %arg11[%c131, %c0_271] : memref<232x128xf32, #tpu.memory_space<vmem>>, vector<16x128xf32>
    %349 = arith.mulf %348, %195 : vector<16x128xf32>
    %350 = arith.addf %347, %349 : vector<16x128xf32>
    %c132 = arith.constant 132 : index
    %c0_272 = arith.constant 0 : index
    %351 = vector.load %arg11[%c132, %c0_272] : memref<232x128xf32, #tpu.memory_space<vmem>>, vector<16x128xf32>
    %352 = arith.mulf %351, %202 : vector<16x128xf32>
    %353 = arith.addf %350, %352 : vector<16x128xf32>
    %354 = arith.truncf %353 : vector<16x128xf32> to vector<16x128xbf16>
    %c128_273 = arith.constant 128 : index
    %c0_274 = arith.constant 0 : index
    %355 = vector.load %arg12[%c128_273, %c0_274] : memref<224x128xbf16, #tpu.memory_space<vmem>>, vector<16x128xbf16>
    tpu.vector_store %arg12[%c128_273, %c0_274], %354 {strides = array<i32>} : memref<224x128xbf16, #tpu.memory_space<vmem>>, vector<16x128xbf16>,
    %c144_275 = arith.constant 144 : index
    %c0_276 = arith.constant 0 : index
    %356 = vector.load %arg11[%c144_275, %c0_276] : memref<232x128xf32, #tpu.memory_space<vmem>>, vector<16x128xf32>
    %357 = arith.mulf %356, %174 : vector<16x128xf32>
    %358 = arith.addf %357, %167 : vector<16x128xf32>
    %c145 = arith.constant 145 : index
    %c0_277 = arith.constant 0 : index
    %359 = vector.load %arg11[%c145, %c0_277] : memref<232x128xf32, #tpu.memory_space<vmem>>, vector<16x128xf32>
    %360 = arith.mulf %359, %181 : vector<16x128xf32>
    %361 = arith.addf %358, %360 : vector<16x128xf32>
    %c146 = arith.constant 146 : index
    %c0_278 = arith.constant 0 : index
    %362 = vector.load %arg11[%c146, %c0_278] : memref<232x128xf32, #tpu.memory_space<vmem>>, vector<16x128xf32>
    %363 = arith.mulf %362, %188 : vector<16x128xf32>
    %364 = arith.addf %361, %363 : vector<16x128xf32>
    %c147 = arith.constant 147 : index
    %c0_279 = arith.constant 0 : index
    %365 = vector.load %arg11[%c147, %c0_279] : memref<232x128xf32, #tpu.memory_space<vmem>>, vector<16x128xf32>
    %366 = arith.mulf %365, %195 : vector<16x128xf32>
    %367 = arith.addf %364, %366 : vector<16x128xf32>
    %c148 = arith.constant 148 : index
    %c0_280 = arith.constant 0 : index
    %368 = vector.load %arg11[%c148, %c0_280] : memref<232x128xf32, #tpu.memory_space<vmem>>, vector<16x128xf32>
    %369 = arith.mulf %368, %202 : vector<16x128xf32>
    %370 = arith.addf %367, %369 : vector<16x128xf32>
    %371 = arith.truncf %370 : vector<16x128xf32> to vector<16x128xbf16>
    %c144_281 = arith.constant 144 : index
    %c0_282 = arith.constant 0 : index
    %372 = vector.load %arg12[%c144_281, %c0_282] : memref<224x128xbf16, #tpu.memory_space<vmem>>, vector<16x128xbf16>
    tpu.vector_store %arg12[%c144_281, %c0_282], %371 {strides = array<i32>} : memref<224x128xbf16, #tpu.memory_space<vmem>>, vector<16x128xbf16>,
    %c160_283 = arith.constant 160 : index
    %c0_284 = arith.constant 0 : index
    %373 = vector.load %arg11[%c160_283, %c0_284] : memref<232x128xf32, #tpu.memory_space<vmem>>, vector<16x128xf32>
    %374 = arith.mulf %373, %174 : vector<16x128xf32>
    %375 = arith.addf %374, %167 : vector<16x128xf32>
    %c161 = arith.constant 161 : index
    %c0_285 = arith.constant 0 : index
    %376 = vector.load %arg11[%c161, %c0_285] : memref<232x128xf32, #tpu.memory_space<vmem>>, vector<16x128xf32>
    %377 = arith.mulf %376, %181 : vector<16x128xf32>
    %378 = arith.addf %375, %377 : vector<16x128xf32>
    %c162 = arith.constant 162 : index
    %c0_286 = arith.constant 0 : index
    %379 = vector.load %arg11[%c162, %c0_286] : memref<232x128xf32, #tpu.memory_space<vmem>>, vector<16x128xf32>
    %380 = arith.mulf %379, %188 : vector<16x128xf32>
    %381 = arith.addf %378, %380 : vector<16x128xf32>
    %c163 = arith.constant 163 : index
    %c0_287 = arith.constant 0 : index
    %382 = vector.load %arg11[%c163, %c0_287] : memref<232x128xf32, #tpu.memory_space<vmem>>, vector<16x128xf32>
    %383 = arith.mulf %382, %195 : vector<16x128xf32>
    %384 = arith.addf %381, %383 : vector<16x128xf32>
    %c164 = arith.constant 164 : index
    %c0_288 = arith.constant 0 : index
    %385 = vector.load %arg11[%c164, %c0_288] : memref<232x128xf32, #tpu.memory_space<vmem>>, vector<16x128xf32>
    %386 = arith.mulf %385, %202 : vector<16x128xf32>
    %387 = arith.addf %384, %386 : vector<16x128xf32>
    %388 = arith.truncf %387 : vector<16x128xf32> to vector<16x128xbf16>
    %c160_289 = arith.constant 160 : index
    %c0_290 = arith.constant 0 : index
    %389 = vector.load %arg12[%c160_289, %c0_290] : memref<224x128xbf16, #tpu.memory_space<vmem>>, vector<16x128xbf16>
    tpu.vector_store %arg12[%c160_289, %c0_290], %388 {strides = array<i32>} : memref<224x128xbf16, #tpu.memory_space<vmem>>, vector<16x128xbf16>,
    %c176_291 = arith.constant 176 : index
    %c0_292 = arith.constant 0 : index
    %390 = vector.load %arg11[%c176_291, %c0_292] : memref<232x128xf32, #tpu.memory_space<vmem>>, vector<16x128xf32>
    %391 = arith.mulf %390, %174 : vector<16x128xf32>
    %392 = arith.addf %391, %167 : vector<16x128xf32>
    %c177 = arith.constant 177 : index
    %c0_293 = arith.constant 0 : index
    %393 = vector.load %arg11[%c177, %c0_293] : memref<232x128xf32, #tpu.memory_space<vmem>>, vector<16x128xf32>
    %394 = arith.mulf %393, %181 : vector<16x128xf32>
    %395 = arith.addf %392, %394 : vector<16x128xf32>
    %c178 = arith.constant 178 : index
    %c0_294 = arith.constant 0 : index
    %396 = vector.load %arg11[%c178, %c0_294] : memref<232x128xf32, #tpu.memory_space<vmem>>, vector<16x128xf32>
    %397 = arith.mulf %396, %188 : vector<16x128xf32>
    %398 = arith.addf %395, %397 : vector<16x128xf32>
    %c179 = arith.constant 179 : index
    %c0_295 = arith.constant 0 : index
    %399 = vector.load %arg11[%c179, %c0_295] : memref<232x128xf32, #tpu.memory_space<vmem>>, vector<16x128xf32>
    %400 = arith.mulf %399, %195 : vector<16x128xf32>
    %401 = arith.addf %398, %400 : vector<16x128xf32>
    %c180 = arith.constant 180 : index
    %c0_296 = arith.constant 0 : index
    %402 = vector.load %arg11[%c180, %c0_296] : memref<232x128xf32, #tpu.memory_space<vmem>>, vector<16x128xf32>
    %403 = arith.mulf %402, %202 : vector<16x128xf32>
    %404 = arith.addf %401, %403 : vector<16x128xf32>
    %405 = arith.truncf %404 : vector<16x128xf32> to vector<16x128xbf16>
    %c176_297 = arith.constant 176 : index
    %c0_298 = arith.constant 0 : index
    %406 = vector.load %arg12[%c176_297, %c0_298] : memref<224x128xbf16, #tpu.memory_space<vmem>>, vector<16x128xbf16>
    tpu.vector_store %arg12[%c176_297, %c0_298], %405 {strides = array<i32>} : memref<224x128xbf16, #tpu.memory_space<vmem>>, vector<16x128xbf16>,
    %c192_299 = arith.constant 192 : index
    %c0_300 = arith.constant 0 : index
    %407 = vector.load %arg11[%c192_299, %c0_300] : memref<232x128xf32, #tpu.memory_space<vmem>>, vector<16x128xf32>
    %408 = arith.mulf %407, %174 : vector<16x128xf32>
    %409 = arith.addf %408, %167 : vector<16x128xf32>
    %c193 = arith.constant 193 : index
    %c0_301 = arith.constant 0 : index
    %410 = vector.load %arg11[%c193, %c0_301] : memref<232x128xf32, #tpu.memory_space<vmem>>, vector<16x128xf32>
    %411 = arith.mulf %410, %181 : vector<16x128xf32>
    %412 = arith.addf %409, %411 : vector<16x128xf32>
    %c194 = arith.constant 194 : index
    %c0_302 = arith.constant 0 : index
    %413 = vector.load %arg11[%c194, %c0_302] : memref<232x128xf32, #tpu.memory_space<vmem>>, vector<16x128xf32>
    %414 = arith.mulf %413, %188 : vector<16x128xf32>
    %415 = arith.addf %412, %414 : vector<16x128xf32>
    %c195 = arith.constant 195 : index
    %c0_303 = arith.constant 0 : index
    %416 = vector.load %arg11[%c195, %c0_303] : memref<232x128xf32, #tpu.memory_space<vmem>>, vector<16x128xf32>
    %417 = arith.mulf %416, %195 : vector<16x128xf32>
    %418 = arith.addf %415, %417 : vector<16x128xf32>
    %c196 = arith.constant 196 : index
    %c0_304 = arith.constant 0 : index
    %419 = vector.load %arg11[%c196, %c0_304] : memref<232x128xf32, #tpu.memory_space<vmem>>, vector<16x128xf32>
    %420 = arith.mulf %419, %202 : vector<16x128xf32>
    %421 = arith.addf %418, %420 : vector<16x128xf32>
    %422 = arith.truncf %421 : vector<16x128xf32> to vector<16x128xbf16>
    %c192_305 = arith.constant 192 : index
    %c0_306 = arith.constant 0 : index
    %423 = vector.load %arg12[%c192_305, %c0_306] : memref<224x128xbf16, #tpu.memory_space<vmem>>, vector<16x128xbf16>
    tpu.vector_store %arg12[%c192_305, %c0_306], %422 {strides = array<i32>} : memref<224x128xbf16, #tpu.memory_space<vmem>>, vector<16x128xbf16>,
    %c208_307 = arith.constant 208 : index
    %c0_308 = arith.constant 0 : index
    %424 = vector.load %arg11[%c208_307, %c0_308] : memref<232x128xf32, #tpu.memory_space<vmem>>, vector<16x128xf32>
    %425 = arith.mulf %424, %174 : vector<16x128xf32>
    %426 = arith.addf %425, %167 : vector<16x128xf32>
    %c209 = arith.constant 209 : index
    %c0_309 = arith.constant 0 : index
    %427 = vector.load %arg11[%c209, %c0_309] : memref<232x128xf32, #tpu.memory_space<vmem>>, vector<16x128xf32>
    %428 = arith.mulf %427, %181 : vector<16x128xf32>
    %429 = arith.addf %426, %428 : vector<16x128xf32>
    %c210 = arith.constant 210 : index
    %c0_310 = arith.constant 0 : index
    %430 = vector.load %arg11[%c210, %c0_310] : memref<232x128xf32, #tpu.memory_space<vmem>>, vector<16x128xf32>
    %431 = arith.mulf %430, %188 : vector<16x128xf32>
    %432 = arith.addf %429, %431 : vector<16x128xf32>
    %c211 = arith.constant 211 : index
    %c0_311 = arith.constant 0 : index
    %433 = vector.load %arg11[%c211, %c0_311] : memref<232x128xf32, #tpu.memory_space<vmem>>, vector<16x128xf32>
    %434 = arith.mulf %433, %195 : vector<16x128xf32>
    %435 = arith.addf %432, %434 : vector<16x128xf32>
    %c212 = arith.constant 212 : index
    %c0_312 = arith.constant 0 : index
    %436 = vector.load %arg11[%c212, %c0_312] : memref<232x128xf32, #tpu.memory_space<vmem>>, vector<16x128xf32>
    %437 = arith.mulf %436, %202 : vector<16x128xf32>
    %438 = arith.addf %435, %437 : vector<16x128xf32>
    %439 = arith.truncf %438 : vector<16x128xf32> to vector<16x128xbf16>
    %c208_313 = arith.constant 208 : index
    %c0_314 = arith.constant 0 : index
    %440 = vector.load %arg12[%c208_313, %c0_314] : memref<224x128xbf16, #tpu.memory_space<vmem>>, vector<16x128xbf16>
    tpu.vector_store %arg12[%c208_313, %c0_314], %439 {strides = array<i32>} : memref<224x128xbf16, #tpu.memory_space<vmem>>, vector<16x128xbf16>,
    %cst_315 = arith.constant 0.000000e+00 : f32
    %441 = vector.broadcast %cst_315 : f32 to vector<80x128xf32>
    %c0_316 = arith.constant 0 : index
    %c0_317 = arith.constant 0 : index
    %442 = vector.load %arg12[%c0_316, %c0_317] : memref<224x128xbf16, #tpu.memory_space<vmem>>, vector<80x48xbf16>
    %c0_318 = arith.constant 0 : index
    %c0_319 = arith.constant 0 : index
    %c0_320 = arith.constant 0 : index
    %443 = vector.load %arg3[%c0_318, %c0_319, %c0_320] : memref<5x48x128xbf16, #tpu.memory_space<vmem>>, vector<1x48x128xbf16>
    %444 = vector.shape_cast %443 : vector<1x48x128xbf16> to vector<48x128xbf16>
    %cst_321 = arith.constant dense<0.000000e+00> : vector<80x128xf32>
    %445 = tpu.matmul %442, %444, %cst_321 {dimension_numbers = #tpu.dot_dimension_numbers<[1], [0], [0], [1], [0, 0, 1, 1], [], []>} : vector<80x48xbf16>, vector<48x128xbf16>, vector<80x128xf32> -> vector<80x128xf32>
    %446 = arith.addf %441, %445 : vector<80x128xf32>
    %c16_322 = arith.constant 16 : index
    %c0_323 = arith.constant 0 : index
    %447 = vector.load %arg12[%c16_322, %c0_323] : memref<224x128xbf16, #tpu.memory_space<vmem>>, vector<80x48xbf16>
    %c1_324 = arith.constant 1 : index
    %c0_325 = arith.constant 0 : index
    %c0_326 = arith.constant 0 : index
    %448 = vector.load %arg3[%c1_324, %c0_325, %c0_326] : memref<5x48x128xbf16, #tpu.memory_space<vmem>>, vector<1x48x128xbf16>
    %449 = vector.shape_cast %448 : vector<1x48x128xbf16> to vector<48x128xbf16>
    %cst_327 = arith.constant dense<0.000000e+00> : vector<80x128xf32>
    %450 = tpu.matmul %447, %449, %cst_327 {dimension_numbers = #tpu.dot_dimension_numbers<[1], [0], [0], [1], [0, 0, 1, 1], [], []>} : vector<80x48xbf16>, vector<48x128xbf16>, vector<80x128xf32> -> vector<80x128xf32>
    %451 = arith.addf %446, %450 : vector<80x128xf32>
    %c32_328 = arith.constant 32 : index
    %c0_329 = arith.constant 0 : index
    %452 = vector.load %arg12[%c32_328, %c0_329] : memref<224x128xbf16, #tpu.memory_space<vmem>>, vector<80x48xbf16>
    %c2_330 = arith.constant 2 : index
    %c0_331 = arith.constant 0 : index
    %c0_332 = arith.constant 0 : index
    %453 = vector.load %arg3[%c2_330, %c0_331, %c0_332] : memref<5x48x128xbf16, #tpu.memory_space<vmem>>, vector<1x48x128xbf16>
    %454 = vector.shape_cast %453 : vector<1x48x128xbf16> to vector<48x128xbf16>
    %cst_333 = arith.constant dense<0.000000e+00> : vector<80x128xf32>
    %455 = tpu.matmul %452, %454, %cst_333 {dimension_numbers = #tpu.dot_dimension_numbers<[1], [0], [0], [1], [0, 0, 1, 1], [], []>} : vector<80x48xbf16>, vector<48x128xbf16>, vector<80x128xf32> -> vector<80x128xf32>
    %456 = arith.addf %451, %455 : vector<80x128xf32>
    %c48_334 = arith.constant 48 : index
    %c0_335 = arith.constant 0 : index
    %457 = vector.load %arg12[%c48_334, %c0_335] : memref<224x128xbf16, #tpu.memory_space<vmem>>, vector<80x48xbf16>
    %c3_336 = arith.constant 3 : index
    %c0_337 = arith.constant 0 : index
    %c0_338 = arith.constant 0 : index
    %458 = vector.load %arg3[%c3_336, %c0_337, %c0_338] : memref<5x48x128xbf16, #tpu.memory_space<vmem>>, vector<1x48x128xbf16>
    %459 = vector.shape_cast %458 : vector<1x48x128xbf16> to vector<48x128xbf16>
    %cst_339 = arith.constant dense<0.000000e+00> : vector<80x128xf32>
    %460 = tpu.matmul %457, %459, %cst_339 {dimension_numbers = #tpu.dot_dimension_numbers<[1], [0], [0], [1], [0, 0, 1, 1], [], []>} : vector<80x48xbf16>, vector<48x128xbf16>, vector<80x128xf32> -> vector<80x128xf32>
    %461 = arith.addf %456, %460 : vector<80x128xf32>
    %c64_340 = arith.constant 64 : index
    %c0_341 = arith.constant 0 : index
    %462 = vector.load %arg12[%c64_340, %c0_341] : memref<224x128xbf16, #tpu.memory_space<vmem>>, vector<80x48xbf16>
    %c4_342 = arith.constant 4 : index
    %c0_343 = arith.constant 0 : index
    %c0_344 = arith.constant 0 : index
    %463 = vector.load %arg3[%c4_342, %c0_343, %c0_344] : memref<5x48x128xbf16, #tpu.memory_space<vmem>>, vector<1x48x128xbf16>
    %464 = vector.shape_cast %463 : vector<1x48x128xbf16> to vector<48x128xbf16>
    %cst_345 = arith.constant dense<0.000000e+00> : vector<80x128xf32>
    %465 = tpu.matmul %462, %464, %cst_345 {dimension_numbers = #tpu.dot_dimension_numbers<[1], [0], [0], [1], [0, 0, 1, 1], [], []>} : vector<80x48xbf16>, vector<48x128xbf16>, vector<80x128xf32> -> vector<80x128xf32>
    %466 = arith.addf %461, %465 : vector<80x128xf32>
    %cst_346 = arith.constant 0.000000e+00 : f32
    %467 = vector.broadcast %cst_346 : f32 to vector<80x128xf32>
    %468 = arith.maximumf %466, %467 : vector<80x128xf32>
    %c0_347 = arith.constant 0 : index
    %c0_348 = arith.constant 0 : index
    %469 = vector.load %arg13[%c0_347, %c0_348] : memref<160x128xf32, #tpu.memory_space<vmem>>, vector<80x128xf32>
    tpu.vector_store %arg13[%c0_347, %c0_348], %468 {strides = array<i32>} : memref<160x128xf32, #tpu.memory_space<vmem>>, vector<80x128xf32>,
    %cst_349 = arith.constant 0.000000e+00 : f32
    %470 = vector.broadcast %cst_349 : f32 to vector<80x128xf32>
    %c80_350 = arith.constant 80 : index
    %c0_351 = arith.constant 0 : index
    %471 = vector.load %arg12[%c80_350, %c0_351] : memref<224x128xbf16, #tpu.memory_space<vmem>>, vector<80x48xbf16>
    %c0_352 = arith.constant 0 : index
    %c0_353 = arith.constant 0 : index
    %c0_354 = arith.constant 0 : index
    %472 = vector.load %arg3[%c0_352, %c0_353, %c0_354] : memref<5x48x128xbf16, #tpu.memory_space<vmem>>, vector<1x48x128xbf16>
    %473 = vector.shape_cast %472 : vector<1x48x128xbf16> to vector<48x128xbf16>
    %cst_355 = arith.constant dense<0.000000e+00> : vector<80x128xf32>
    %474 = tpu.matmul %471, %473, %cst_355 {dimension_numbers = #tpu.dot_dimension_numbers<[1], [0], [0], [1], [0, 0, 1, 1], [], []>} : vector<80x48xbf16>, vector<48x128xbf16>, vector<80x128xf32> -> vector<80x128xf32>
    %475 = arith.addf %470, %474 : vector<80x128xf32>
    %c96_356 = arith.constant 96 : index
    %c0_357 = arith.constant 0 : index
    %476 = vector.load %arg12[%c96_356, %c0_357] : memref<224x128xbf16, #tpu.memory_space<vmem>>, vector<80x48xbf16>
    %c1_358 = arith.constant 1 : index
    %c0_359 = arith.constant 0 : index
    %c0_360 = arith.constant 0 : index
    %477 = vector.load %arg3[%c1_358, %c0_359, %c0_360] : memref<5x48x128xbf16, #tpu.memory_space<vmem>>, vector<1x48x128xbf16>
    %478 = vector.shape_cast %477 : vector<1x48x128xbf16> to vector<48x128xbf16>
    %cst_361 = arith.constant dense<0.000000e+00> : vector<80x128xf32>
    %479 = tpu.matmul %476, %478, %cst_361 {dimension_numbers = #tpu.dot_dimension_numbers<[1], [0], [0], [1], [0, 0, 1, 1], [], []>} : vector<80x48xbf16>, vector<48x128xbf16>, vector<80x128xf32> -> vector<80x128xf32>
    %480 = arith.addf %475, %479 : vector<80x128xf32>
    %c112_362 = arith.constant 112 : index
    %c0_363 = arith.constant 0 : index
    %481 = vector.load %arg12[%c112_362, %c0_363] : memref<224x128xbf16, #tpu.memory_space<vmem>>, vector<80x48xbf16>
    %c2_364 = arith.constant 2 : index
    %c0_365 = arith.constant 0 : index
    %c0_366 = arith.constant 0 : index
    %482 = vector.load %arg3[%c2_364, %c0_365, %c0_366] : memref<5x48x128xbf16, #tpu.memory_space<vmem>>, vector<1x48x128xbf16>
    %483 = vector.shape_cast %482 : vector<1x48x128xbf16> to vector<48x128xbf16>
    %cst_367 = arith.constant dense<0.000000e+00> : vector<80x128xf32>
    %484 = tpu.matmul %481, %483, %cst_367 {dimension_numbers = #tpu.dot_dimension_numbers<[1], [0], [0], [1], [0, 0, 1, 1], [], []>} : vector<80x48xbf16>, vector<48x128xbf16>, vector<80x128xf32> -> vector<80x128xf32>
    %485 = arith.addf %480, %484 : vector<80x128xf32>
    %c128_368 = arith.constant 128 : index
    %c0_369 = arith.constant 0 : index
    %486 = vector.load %arg12[%c128_368, %c0_369] : memref<224x128xbf16, #tpu.memory_space<vmem>>, vector<80x48xbf16>
    %c3_370 = arith.constant 3 : index
    %c0_371 = arith.constant 0 : index
    %c0_372 = arith.constant 0 : index
    %487 = vector.load %arg3[%c3_370, %c0_371, %c0_372] : memref<5x48x128xbf16, #tpu.memory_space<vmem>>, vector<1x48x128xbf16>
    %488 = vector.shape_cast %487 : vector<1x48x128xbf16> to vector<48x128xbf16>
    %cst_373 = arith.constant dense<0.000000e+00> : vector<80x128xf32>
    %489 = tpu.matmul %486, %488, %cst_373 {dimension_numbers = #tpu.dot_dimension_numbers<[1], [0], [0], [1], [0, 0, 1, 1], [], []>} : vector<80x48xbf16>, vector<48x128xbf16>, vector<80x128xf32> -> vector<80x128xf32>
    %490 = arith.addf %485, %489 : vector<80x128xf32>
    %c144_374 = arith.constant 144 : index
    %c0_375 = arith.constant 0 : index
    %491 = vector.load %arg12[%c144_374, %c0_375] : memref<224x128xbf16, #tpu.memory_space<vmem>>, vector<80x48xbf16>
    %c4_376 = arith.constant 4 : index
    %c0_377 = arith.constant 0 : index
    %c0_378 = arith.constant 0 : index
    %492 = vector.load %arg3[%c4_376, %c0_377, %c0_378] : memref<5x48x128xbf16, #tpu.memory_space<vmem>>, vector<1x48x128xbf16>
    %493 = vector.shape_cast %492 : vector<1x48x128xbf16> to vector<48x128xbf16>
    %cst_379 = arith.constant dense<0.000000e+00> : vector<80x128xf32>
    %494 = tpu.matmul %491, %493, %cst_379 {dimension_numbers = #tpu.dot_dimension_numbers<[1], [0], [0], [1], [0, 0, 1, 1], [], []>} : vector<80x48xbf16>, vector<48x128xbf16>, vector<80x128xf32> -> vector<80x128xf32>
    %495 = arith.addf %490, %494 : vector<80x128xf32>
    %cst_380 = arith.constant 0.000000e+00 : f32
    %496 = vector.broadcast %cst_380 : f32 to vector<80x128xf32>
    %497 = arith.maximumf %495, %496 : vector<80x128xf32>
    %c80_381 = arith.constant 80 : index
    %c0_382 = arith.constant 0 : index
    %498 = vector.load %arg13[%c80_381, %c0_382] : memref<160x128xf32, #tpu.memory_space<vmem>>, vector<80x128xf32>
    tpu.vector_store %arg13[%c80_381, %c0_382], %497 {strides = array<i32>} : memref<160x128xf32, #tpu.memory_space<vmem>>, vector<80x128xf32>,
    %c0_383 = arith.constant 0 : index
    %c0_384 = arith.constant 0 : index
    %499 = vector.load %arg13[%c0_383, %c0_384] : memref<160x128xf32, #tpu.memory_space<vmem>>, vector<16x128xf32>
    %c16_385 = arith.constant 16 : index
    %c0_386 = arith.constant 0 : index
    %500 = vector.load %arg13[%c16_385, %c0_386] : memref<160x128xf32, #tpu.memory_space<vmem>>, vector<16x128xf32>
    %501 = arith.maximumf %499, %500 : vector<16x128xf32>
    %c0_387 = arith.constant 0 : index
    %c0_388 = arith.constant 0 : index
    %502 = vector.load %arg15[%c0_387, %c0_388] : memref<32x128xf32, #tpu.memory_space<vmem>>, vector<16x128xf32>
    tpu.vector_store %arg15[%c0_387, %c0_388], %501 {strides = array<i32>} : memref<32x128xf32, #tpu.memory_space<vmem>>, vector<16x128xf32>,
    %c0_389 = arith.constant 0 : index
    %c0_390 = arith.constant 0 : index
    %503 = tpu.strided_load %arg15[%c0_389, %c0_390] {strides = array<i32: 2, 1>} : memref<32x128xf32, #tpu.memory_space<vmem>>, vector<8x128xf32>
    %c1_391 = arith.constant 1 : index
    %c0_392 = arith.constant 0 : index
    %504 = tpu.strided_load %arg15[%c1_391, %c0_392] {strides = array<i32: 2, 1>} : memref<32x128xf32, #tpu.memory_space<vmem>>, vector<8x128xf32>
    %505 = arith.maximumf %503, %504 : vector<8x128xf32>
    %c0_393 = arith.constant 0 : index
    %c0_394 = arith.constant 0 : index
    %506 = vector.load %arg14[%c0_393, %c0_394] : memref<40x128xf32, #tpu.memory_space<vmem>>, vector<8x128xf32>
    tpu.vector_store %arg14[%c0_393, %c0_394], %505 {strides = array<i32>} : memref<40x128xf32, #tpu.memory_space<vmem>>, vector<8x128xf32>,
    %c32_395 = arith.constant 32 : index
    %c0_396 = arith.constant 0 : index
    %507 = vector.load %arg13[%c32_395, %c0_396] : memref<160x128xf32, #tpu.memory_space<vmem>>, vector<16x128xf32>
    %c48_397 = arith.constant 48 : index
    %c0_398 = arith.constant 0 : index
    %508 = vector.load %arg13[%c48_397, %c0_398] : memref<160x128xf32, #tpu.memory_space<vmem>>, vector<16x128xf32>
    %509 = arith.maximumf %507, %508 : vector<16x128xf32>
    %c0_399 = arith.constant 0 : index
    %c0_400 = arith.constant 0 : index
    %510 = vector.load %arg15[%c0_399, %c0_400] : memref<32x128xf32, #tpu.memory_space<vmem>>, vector<16x128xf32>
    tpu.vector_store %arg15[%c0_399, %c0_400], %509 {strides = array<i32>} : memref<32x128xf32, #tpu.memory_space<vmem>>, vector<16x128xf32>,
    %c0_401 = arith.constant 0 : index
    %c0_402 = arith.constant 0 : index
    %511 = tpu.strided_load %arg15[%c0_401, %c0_402] {strides = array<i32: 2, 1>} : memref<32x128xf32, #tpu.memory_space<vmem>>, vector<8x128xf32>
    %c1_403 = arith.constant 1 : index
    %c0_404 = arith.constant 0 : index
    %512 = tpu.strided_load %arg15[%c1_403, %c0_404] {strides = array<i32: 2, 1>} : memref<32x128xf32, #tpu.memory_space<vmem>>, vector<8x128xf32>
    %513 = arith.maximumf %511, %512 : vector<8x128xf32>
    %c8 = arith.constant 8 : index
    %c0_405 = arith.constant 0 : index
    %514 = vector.load %arg14[%c8, %c0_405] : memref<40x128xf32, #tpu.memory_space<vmem>>, vector<8x128xf32>
    tpu.vector_store %arg14[%c8, %c0_405], %513 {strides = array<i32>} : memref<40x128xf32, #tpu.memory_space<vmem>>, vector<8x128xf32>,
    %c64_406 = arith.constant 64 : index
    %c0_407 = arith.constant 0 : index
    %515 = vector.load %arg13[%c64_406, %c0_407] : memref<160x128xf32, #tpu.memory_space<vmem>>, vector<16x128xf32>
    %c80_408 = arith.constant 80 : index
    %c0_409 = arith.constant 0 : index
    %516 = vector.load %arg13[%c80_408, %c0_409] : memref<160x128xf32, #tpu.memory_space<vmem>>, vector<16x128xf32>
    %517 = arith.maximumf %515, %516 : vector<16x128xf32>
    %c0_410 = arith.constant 0 : index
    %c0_411 = arith.constant 0 : index
    %518 = vector.load %arg15[%c0_410, %c0_411] : memref<32x128xf32, #tpu.memory_space<vmem>>, vector<16x128xf32>
    tpu.vector_store %arg15[%c0_410, %c0_411], %517 {strides = array<i32>} : memref<32x128xf32, #tpu.memory_space<vmem>>, vector<16x128xf32>,
    %c0_412 = arith.constant 0 : index
    %c0_413 = arith.constant 0 : index
    %519 = tpu.strided_load %arg15[%c0_412, %c0_413] {strides = array<i32: 2, 1>} : memref<32x128xf32, #tpu.memory_space<vmem>>, vector<8x128xf32>
    %c1_414 = arith.constant 1 : index
    %c0_415 = arith.constant 0 : index
    %520 = tpu.strided_load %arg15[%c1_414, %c0_415] {strides = array<i32: 2, 1>} : memref<32x128xf32, #tpu.memory_space<vmem>>, vector<8x128xf32>
    %521 = arith.maximumf %519, %520 : vector<8x128xf32>
    %c16_416 = arith.constant 16 : index
    %c0_417 = arith.constant 0 : index
    %522 = vector.load %arg14[%c16_416, %c0_417] : memref<40x128xf32, #tpu.memory_space<vmem>>, vector<8x128xf32>
    tpu.vector_store %arg14[%c16_416, %c0_417], %521 {strides = array<i32>} : memref<40x128xf32, #tpu.memory_space<vmem>>, vector<8x128xf32>,
    %c96_418 = arith.constant 96 : index
    %c0_419 = arith.constant 0 : index
    %523 = vector.load %arg13[%c96_418, %c0_419] : memref<160x128xf32, #tpu.memory_space<vmem>>, vector<16x128xf32>
    %c112_420 = arith.constant 112 : index
    %c0_421 = arith.constant 0 : index
    %524 = vector.load %arg13[%c112_420, %c0_421] : memref<160x128xf32, #tpu.memory_space<vmem>>, vector<16x128xf32>
    %525 = arith.maximumf %523, %524 : vector<16x128xf32>
    %c0_422 = arith.constant 0 : index
    %c0_423 = arith.constant 0 : index
    %526 = vector.load %arg15[%c0_422, %c0_423] : memref<32x128xf32, #tpu.memory_space<vmem>>, vector<16x128xf32>
    tpu.vector_store %arg15[%c0_422, %c0_423], %525 {strides = array<i32>} : memref<32x128xf32, #tpu.memory_space<vmem>>, vector<16x128xf32>,
    %c0_424 = arith.constant 0 : index
    %c0_425 = arith.constant 0 : index
    %527 = tpu.strided_load %arg15[%c0_424, %c0_425] {strides = array<i32: 2, 1>} : memref<32x128xf32, #tpu.memory_space<vmem>>, vector<8x128xf32>
    %c1_426 = arith.constant 1 : index
    %c0_427 = arith.constant 0 : index
    %528 = tpu.strided_load %arg15[%c1_426, %c0_427] {strides = array<i32: 2, 1>} : memref<32x128xf32, #tpu.memory_space<vmem>>, vector<8x128xf32>
    %529 = arith.maximumf %527, %528 : vector<8x128xf32>
    %c24 = arith.constant 24 : index
    %c0_428 = arith.constant 0 : index
    %530 = vector.load %arg14[%c24, %c0_428] : memref<40x128xf32, #tpu.memory_space<vmem>>, vector<8x128xf32>
    tpu.vector_store %arg14[%c24, %c0_428], %529 {strides = array<i32>} : memref<40x128xf32, #tpu.memory_space<vmem>>, vector<8x128xf32>,
    %c128_429 = arith.constant 128 : index
    %c0_430 = arith.constant 0 : index
    %531 = vector.load %arg13[%c128_429, %c0_430] : memref<160x128xf32, #tpu.memory_space<vmem>>, vector<16x128xf32>
    %c144_431 = arith.constant 144 : index
    %c0_432 = arith.constant 0 : index
    %532 = vector.load %arg13[%c144_431, %c0_432] : memref<160x128xf32, #tpu.memory_space<vmem>>, vector<16x128xf32>
    %533 = arith.maximumf %531, %532 : vector<16x128xf32>
    %c0_433 = arith.constant 0 : index
    %c0_434 = arith.constant 0 : index
    %534 = vector.load %arg15[%c0_433, %c0_434] : memref<32x128xf32, #tpu.memory_space<vmem>>, vector<16x128xf32>
    tpu.vector_store %arg15[%c0_433, %c0_434], %533 {strides = array<i32>} : memref<32x128xf32, #tpu.memory_space<vmem>>, vector<16x128xf32>,
    %c0_435 = arith.constant 0 : index
    %c0_436 = arith.constant 0 : index
    %535 = tpu.strided_load %arg15[%c0_435, %c0_436] {strides = array<i32: 2, 1>} : memref<32x128xf32, #tpu.memory_space<vmem>>, vector<8x128xf32>
    %c1_437 = arith.constant 1 : index
    %c0_438 = arith.constant 0 : index
    %536 = tpu.strided_load %arg15[%c1_437, %c0_438] {strides = array<i32: 2, 1>} : memref<32x128xf32, #tpu.memory_space<vmem>>, vector<8x128xf32>
    %537 = arith.maximumf %535, %536 : vector<8x128xf32>
    %c32_439 = arith.constant 32 : index
    %c0_440 = arith.constant 0 : index
    %538 = vector.load %arg14[%c32_439, %c0_440] : memref<40x128xf32, #tpu.memory_space<vmem>>, vector<8x128xf32>
    tpu.vector_store %arg14[%c32_439, %c0_440], %537 {strides = array<i32>} : memref<40x128xf32, #tpu.memory_space<vmem>>, vector<8x128xf32>,
    %cst_441 = arith.constant 0.000000e+00 : f32
    %539 = vector.broadcast %cst_441 : f32 to vector<1x128xf32>
    %c0_442 = arith.constant 0 : index
    %c0_443 = arith.constant 0 : index
    %540 = vector.load %arg14[%c0_442, %c0_443] : memref<40x128xf32, #tpu.memory_space<vmem>>, vector<1x32xf32>
    %541 = arith.truncf %540 : vector<1x32xf32> to vector<1x32xbf16>
    %c0_444 = arith.constant 0 : index
    %c0_445 = arith.constant 0 : index
    %c0_446 = arith.constant 0 : index
    %542 = vector.load %arg4[%c0_444, %c0_445, %c0_446] : memref<25x32x128xbf16, #tpu.memory_space<vmem>>, vector<1x32x128xbf16>
    %543 = vector.shape_cast %542 : vector<1x32x128xbf16> to vector<32x128xbf16>
    %cst_447 = arith.constant dense<0.000000e+00> : vector<1x128xf32>
    %544 = tpu.matmul %541, %543, %cst_447 {dimension_numbers = #tpu.dot_dimension_numbers<[1], [0], [0], [1], [0, 0, 1, 1], [], []>} : vector<1x32xbf16>, vector<32x128xbf16>, vector<1x128xf32> -> vector<1x128xf32>
    %545 = arith.addf %539, %544 : vector<1x128xf32>
    %c1_448 = arith.constant 1 : index
    %c0_449 = arith.constant 0 : index
    %546 = vector.load %arg14[%c1_448, %c0_449] : memref<40x128xf32, #tpu.memory_space<vmem>>, vector<1x32xf32>
    %547 = arith.truncf %546 : vector<1x32xf32> to vector<1x32xbf16>
    %c1_450 = arith.constant 1 : index
    %c0_451 = arith.constant 0 : index
    %c0_452 = arith.constant 0 : index
    %548 = vector.load %arg4[%c1_450, %c0_451, %c0_452] : memref<25x32x128xbf16, #tpu.memory_space<vmem>>, vector<1x32x128xbf16>
    %549 = vector.shape_cast %548 : vector<1x32x128xbf16> to vector<32x128xbf16>
    %cst_453 = arith.constant dense<0.000000e+00> : vector<1x128xf32>
    %550 = tpu.matmul %547, %549, %cst_453 {dimension_numbers = #tpu.dot_dimension_numbers<[1], [0], [0], [1], [0, 0, 1, 1], [], []>} : vector<1x32xbf16>, vector<32x128xbf16>, vector<1x128xf32> -> vector<1x128xf32>
    %551 = arith.addf %545, %550 : vector<1x128xf32>
    %c2_454 = arith.constant 2 : index
    %c0_455 = arith.constant 0 : index
    %552 = vector.load %arg14[%c2_454, %c0_455] : memref<40x128xf32, #tpu.memory_space<vmem>>, vector<1x32xf32>
    %553 = arith.truncf %552 : vector<1x32xf32> to vector<1x32xbf16>
    %c2_456 = arith.constant 2 : index
    %c0_457 = arith.constant 0 : index
    %c0_458 = arith.constant 0 : index
    %554 = vector.load %arg4[%c2_456, %c0_457, %c0_458] : memref<25x32x128xbf16, #tpu.memory_space<vmem>>, vector<1x32x128xbf16>
    %555 = vector.shape_cast %554 : vector<1x32x128xbf16> to vector<32x128xbf16>
    %cst_459 = arith.constant dense<0.000000e+00> : vector<1x128xf32>
    %556 = tpu.matmul %553, %555, %cst_459 {dimension_numbers = #tpu.dot_dimension_numbers<[1], [0], [0], [1], [0, 0, 1, 1], [], []>} : vector<1x32xbf16>, vector<32x128xbf16>, vector<1x128xf32> -> vector<1x128xf32>
    %557 = arith.addf %551, %556 : vector<1x128xf32>
    %c3_460 = arith.constant 3 : index
    %c0_461 = arith.constant 0 : index
    %558 = vector.load %arg14[%c3_460, %c0_461] : memref<40x128xf32, #tpu.memory_space<vmem>>, vector<1x32xf32>
    %559 = arith.truncf %558 : vector<1x32xf32> to vector<1x32xbf16>
    %c3_462 = arith.constant 3 : index
    %c0_463 = arith.constant 0 : index
    %c0_464 = arith.constant 0 : index
    %560 = vector.load %arg4[%c3_462, %c0_463, %c0_464] : memref<25x32x128xbf16, #tpu.memory_space<vmem>>, vector<1x32x128xbf16>
    %561 = vector.shape_cast %560 : vector<1x32x128xbf16> to vector<32x128xbf16>
    %cst_465 = arith.constant dense<0.000000e+00> : vector<1x128xf32>
    %562 = tpu.matmul %559, %561, %cst_465 {dimension_numbers = #tpu.dot_dimension_numbers<[1], [0], [0], [1], [0, 0, 1, 1], [], []>} : vector<1x32xbf16>, vector<32x128xbf16>, vector<1x128xf32> -> vector<1x128xf32>
    %563 = arith.addf %557, %562 : vector<1x128xf32>
    %c4_466 = arith.constant 4 : index
    %c0_467 = arith.constant 0 : index
    %564 = vector.load %arg14[%c4_466, %c0_467] : memref<40x128xf32, #tpu.memory_space<vmem>>, vector<1x32xf32>
    %565 = arith.truncf %564 : vector<1x32xf32> to vector<1x32xbf16>
    %c4_468 = arith.constant 4 : index
    %c0_469 = arith.constant 0 : index
    %c0_470 = arith.constant 0 : index
    %566 = vector.load %arg4[%c4_468, %c0_469, %c0_470] : memref<25x32x128xbf16, #tpu.memory_space<vmem>>, vector<1x32x128xbf16>
    %567 = vector.shape_cast %566 : vector<1x32x128xbf16> to vector<32x128xbf16>
    %cst_471 = arith.constant dense<0.000000e+00> : vector<1x128xf32>
    %568 = tpu.matmul %565, %567, %cst_471 {dimension_numbers = #tpu.dot_dimension_numbers<[1], [0], [0], [1], [0, 0, 1, 1], [], []>} : vector<1x32xbf16>, vector<32x128xbf16>, vector<1x128xf32> -> vector<1x128xf32>
    %569 = arith.addf %563, %568 : vector<1x128xf32>
    %c8_472 = arith.constant 8 : index
    %c0_473 = arith.constant 0 : index
    %570 = vector.load %arg14[%c8_472, %c0_473] : memref<40x128xf32, #tpu.memory_space<vmem>>, vector<1x32xf32>
    %571 = arith.truncf %570 : vector<1x32xf32> to vector<1x32xbf16>
    %c5 = arith.constant 5 : index
    %c0_474 = arith.constant 0 : index
    %c0_475 = arith.constant 0 : index
    %572 = vector.load %arg4[%c5, %c0_474, %c0_475] : memref<25x32x128xbf16, #tpu.memory_space<vmem>>, vector<1x32x128xbf16>
    %573 = vector.shape_cast %572 : vector<1x32x128xbf16> to vector<32x128xbf16>
    %cst_476 = arith.constant dense<0.000000e+00> : vector<1x128xf32>
    %574 = tpu.matmul %571, %573, %cst_476 {dimension_numbers = #tpu.dot_dimension_numbers<[1], [0], [0], [1], [0, 0, 1, 1], [], []>} : vector<1x32xbf16>, vector<32x128xbf16>, vector<1x128xf32> -> vector<1x128xf32>
    %575 = arith.addf %569, %574 : vector<1x128xf32>
    %c9 = arith.constant 9 : index
    %c0_477 = arith.constant 0 : index
    %576 = vector.load %arg14[%c9, %c0_477] : memref<40x128xf32, #tpu.memory_space<vmem>>, vector<1x32xf32>
    %577 = arith.truncf %576 : vector<1x32xf32> to vector<1x32xbf16>
    %c6 = arith.constant 6 : index
    %c0_478 = arith.constant 0 : index
    %c0_479 = arith.constant 0 : index
    %578 = vector.load %arg4[%c6, %c0_478, %c0_479] : memref<25x32x128xbf16, #tpu.memory_space<vmem>>, vector<1x32x128xbf16>
    %579 = vector.shape_cast %578 : vector<1x32x128xbf16> to vector<32x128xbf16>
    %cst_480 = arith.constant dense<0.000000e+00> : vector<1x128xf32>
    %580 = tpu.matmul %577, %579, %cst_480 {dimension_numbers = #tpu.dot_dimension_numbers<[1], [0], [0], [1], [0, 0, 1, 1], [], []>} : vector<1x32xbf16>, vector<32x128xbf16>, vector<1x128xf32> -> vector<1x128xf32>
    %581 = arith.addf %575, %580 : vector<1x128xf32>
    %c10 = arith.constant 10 : index
    %c0_481 = arith.constant 0 : index
    %582 = vector.load %arg14[%c10, %c0_481] : memref<40x128xf32, #tpu.memory_space<vmem>>, vector<1x32xf32>
    %583 = arith.truncf %582 : vector<1x32xf32> to vector<1x32xbf16>
    %c7 = arith.constant 7 : index
    %c0_482 = arith.constant 0 : index
    %c0_483 = arith.constant 0 : index
    %584 = vector.load %arg4[%c7, %c0_482, %c0_483] : memref<25x32x128xbf16, #tpu.memory_space<vmem>>, vector<1x32x128xbf16>
    %585 = vector.shape_cast %584 : vector<1x32x128xbf16> to vector<32x128xbf16>
    %cst_484 = arith.constant dense<0.000000e+00> : vector<1x128xf32>
    %586 = tpu.matmul %583, %585, %cst_484 {dimension_numbers = #tpu.dot_dimension_numbers<[1], [0], [0], [1], [0, 0, 1, 1], [], []>} : vector<1x32xbf16>, vector<32x128xbf16>, vector<1x128xf32> -> vector<1x128xf32>
    %587 = arith.addf %581, %586 : vector<1x128xf32>
    %c11 = arith.constant 11 : index
    %c0_485 = arith.constant 0 : index
    %588 = vector.load %arg14[%c11, %c0_485] : memref<40x128xf32, #tpu.memory_space<vmem>>, vector<1x32xf32>
    %589 = arith.truncf %588 : vector<1x32xf32> to vector<1x32xbf16>
    %c8_486 = arith.constant 8 : index
    %c0_487 = arith.constant 0 : index
    %c0_488 = arith.constant 0 : index
    %590 = vector.load %arg4[%c8_486, %c0_487, %c0_488] : memref<25x32x128xbf16, #tpu.memory_space<vmem>>, vector<1x32x128xbf16>
    %591 = vector.shape_cast %590 : vector<1x32x128xbf16> to vector<32x128xbf16>
    %cst_489 = arith.constant dense<0.000000e+00> : vector<1x128xf32>
    %592 = tpu.matmul %589, %591, %cst_489 {dimension_numbers = #tpu.dot_dimension_numbers<[1], [0], [0], [1], [0, 0, 1, 1], [], []>} : vector<1x32xbf16>, vector<32x128xbf16>, vector<1x128xf32> -> vector<1x128xf32>
    %593 = arith.addf %587, %592 : vector<1x128xf32>
    %c12 = arith.constant 12 : index
    %c0_490 = arith.constant 0 : index
    %594 = vector.load %arg14[%c12, %c0_490] : memref<40x128xf32, #tpu.memory_space<vmem>>, vector<1x32xf32>
    %595 = arith.truncf %594 : vector<1x32xf32> to vector<1x32xbf16>
    %c9_491 = arith.constant 9 : index
    %c0_492 = arith.constant 0 : index
    %c0_493 = arith.constant 0 : index
    %596 = vector.load %arg4[%c9_491, %c0_492, %c0_493] : memref<25x32x128xbf16, #tpu.memory_space<vmem>>, vector<1x32x128xbf16>
    %597 = vector.shape_cast %596 : vector<1x32x128xbf16> to vector<32x128xbf16>
    %cst_494 = arith.constant dense<0.000000e+00> : vector<1x128xf32>
    %598 = tpu.matmul %595, %597, %cst_494 {dimension_numbers = #tpu.dot_dimension_numbers<[1], [0], [0], [1], [0, 0, 1, 1], [], []>} : vector<1x32xbf16>, vector<32x128xbf16>, vector<1x128xf32> -> vector<1x128xf32>
    %599 = arith.addf %593, %598 : vector<1x128xf32>
    %c16_495 = arith.constant 16 : index
    %c0_496 = arith.constant 0 : index
    %600 = vector.load %arg14[%c16_495, %c0_496] : memref<40x128xf32, #tpu.memory_space<vmem>>, vector<1x32xf32>
    %601 = arith.truncf %600 : vector<1x32xf32> to vector<1x32xbf16>
    %c10_497 = arith.constant 10 : index
    %c0_498 = arith.constant 0 : index
    %c0_499 = arith.constant 0 : index
    %602 = vector.load %arg4[%c10_497, %c0_498, %c0_499] : memref<25x32x128xbf16, #tpu.memory_space<vmem>>, vector<1x32x128xbf16>
    %603 = vector.shape_cast %602 : vector<1x32x128xbf16> to vector<32x128xbf16>
    %cst_500 = arith.constant dense<0.000000e+00> : vector<1x128xf32>
    %604 = tpu.matmul %601, %603, %cst_500 {dimension_numbers = #tpu.dot_dimension_numbers<[1], [0], [0], [1], [0, 0, 1, 1], [], []>} : vector<1x32xbf16>, vector<32x128xbf16>, vector<1x128xf32> -> vector<1x128xf32>
    %605 = arith.addf %599, %604 : vector<1x128xf32>
    %c17_501 = arith.constant 17 : index
    %c0_502 = arith.constant 0 : index
    %606 = vector.load %arg14[%c17_501, %c0_502] : memref<40x128xf32, #tpu.memory_space<vmem>>, vector<1x32xf32>
    %607 = arith.truncf %606 : vector<1x32xf32> to vector<1x32xbf16>
    %c11_503 = arith.constant 11 : index
    %c0_504 = arith.constant 0 : index
    %c0_505 = arith.constant 0 : index
    %608 = vector.load %arg4[%c11_503, %c0_504, %c0_505] : memref<25x32x128xbf16, #tpu.memory_space<vmem>>, vector<1x32x128xbf16>
    %609 = vector.shape_cast %608 : vector<1x32x128xbf16> to vector<32x128xbf16>
    %cst_506 = arith.constant dense<0.000000e+00> : vector<1x128xf32>
    %610 = tpu.matmul %607, %609, %cst_506 {dimension_numbers = #tpu.dot_dimension_numbers<[1], [0], [0], [1], [0, 0, 1, 1], [], []>} : vector<1x32xbf16>, vector<32x128xbf16>, vector<1x128xf32> -> vector<1x128xf32>
    %611 = arith.addf %605, %610 : vector<1x128xf32>
    %c18_507 = arith.constant 18 : index
    %c0_508 = arith.constant 0 : index
    %612 = vector.load %arg14[%c18_507, %c0_508] : memref<40x128xf32, #tpu.memory_space<vmem>>, vector<1x32xf32>
    %613 = arith.truncf %612 : vector<1x32xf32> to vector<1x32xbf16>
    %c12_509 = arith.constant 12 : index
    %c0_510 = arith.constant 0 : index
    %c0_511 = arith.constant 0 : index
    %614 = vector.load %arg4[%c12_509, %c0_510, %c0_511] : memref<25x32x128xbf16, #tpu.memory_space<vmem>>, vector<1x32x128xbf16>
    %615 = vector.shape_cast %614 : vector<1x32x128xbf16> to vector<32x128xbf16>
    %cst_512 = arith.constant dense<0.000000e+00> : vector<1x128xf32>
    %616 = tpu.matmul %613, %615, %cst_512 {dimension_numbers = #tpu.dot_dimension_numbers<[1], [0], [0], [1], [0, 0, 1, 1], [], []>} : vector<1x32xbf16>, vector<32x128xbf16>, vector<1x128xf32> -> vector<1x128xf32>
    %617 = arith.addf %611, %616 : vector<1x128xf32>
    %c19_513 = arith.constant 19 : index
    %c0_514 = arith.constant 0 : index
    %618 = vector.load %arg14[%c19_513, %c0_514] : memref<40x128xf32, #tpu.memory_space<vmem>>, vector<1x32xf32>
    %619 = arith.truncf %618 : vector<1x32xf32> to vector<1x32xbf16>
    %c13 = arith.constant 13 : index
    %c0_515 = arith.constant 0 : index
    %c0_516 = arith.constant 0 : index
    %620 = vector.load %arg4[%c13, %c0_515, %c0_516] : memref<25x32x128xbf16, #tpu.memory_space<vmem>>, vector<1x32x128xbf16>
    %621 = vector.shape_cast %620 : vector<1x32x128xbf16> to vector<32x128xbf16>
    %cst_517 = arith.constant dense<0.000000e+00> : vector<1x128xf32>
    %622 = tpu.matmul %619, %621, %cst_517 {dimension_numbers = #tpu.dot_dimension_numbers<[1], [0], [0], [1], [0, 0, 1, 1], [], []>} : vector<1x32xbf16>, vector<32x128xbf16>, vector<1x128xf32> -> vector<1x128xf32>
    %623 = arith.addf %617, %622 : vector<1x128xf32>
    %c20_518 = arith.constant 20 : index
    %c0_519 = arith.constant 0 : index
    %624 = vector.load %arg14[%c20_518, %c0_519] : memref<40x128xf32, #tpu.memory_space<vmem>>, vector<1x32xf32>
    %625 = arith.truncf %624 : vector<1x32xf32> to vector<1x32xbf16>
    %c14 = arith.constant 14 : index
    %c0_520 = arith.constant 0 : index
    %c0_521 = arith.constant 0 : index
    %626 = vector.load %arg4[%c14, %c0_520, %c0_521] : memref<25x32x128xbf16, #tpu.memory_space<vmem>>, vector<1x32x128xbf16>
    %627 = vector.shape_cast %626 : vector<1x32x128xbf16> to vector<32x128xbf16>
    %cst_522 = arith.constant dense<0.000000e+00> : vector<1x128xf32>
    %628 = tpu.matmul %625, %627, %cst_522 {dimension_numbers = #tpu.dot_dimension_numbers<[1], [0], [0], [1], [0, 0, 1, 1], [], []>} : vector<1x32xbf16>, vector<32x128xbf16>, vector<1x128xf32> -> vector<1x128xf32>
    %629 = arith.addf %623, %628 : vector<1x128xf32>
    %c24_523 = arith.constant 24 : index
    %c0_524 = arith.constant 0 : index
    %630 = vector.load %arg14[%c24_523, %c0_524] : memref<40x128xf32, #tpu.memory_space<vmem>>, vector<1x32xf32>
    %631 = arith.truncf %630 : vector<1x32xf32> to vector<1x32xbf16>
    %c15 = arith.constant 15 : index
    %c0_525 = arith.constant 0 : index
    %c0_526 = arith.constant 0 : index
    %632 = vector.load %arg4[%c15, %c0_525, %c0_526] : memref<25x32x128xbf16, #tpu.memory_space<vmem>>, vector<1x32x128xbf16>
    %633 = vector.shape_cast %632 : vector<1x32x128xbf16> to vector<32x128xbf16>
    %cst_527 = arith.constant dense<0.000000e+00> : vector<1x128xf32>
    %634 = tpu.matmul %631, %633, %cst_527 {dimension_numbers = #tpu.dot_dimension_numbers<[1], [0], [0], [1], [0, 0, 1, 1], [], []>} : vector<1x32xbf16>, vector<32x128xbf16>, vector<1x128xf32> -> vector<1x128xf32>
    %635 = arith.addf %629, %634 : vector<1x128xf32>
    %c25 = arith.constant 25 : index
    %c0_528 = arith.constant 0 : index
    %636 = vector.load %arg14[%c25, %c0_528] : memref<40x128xf32, #tpu.memory_space<vmem>>, vector<1x32xf32>
    %637 = arith.truncf %636 : vector<1x32xf32> to vector<1x32xbf16>
    %c16_529 = arith.constant 16 : index
    %c0_530 = arith.constant 0 : index
    %c0_531 = arith.constant 0 : index
    %638 = vector.load %arg4[%c16_529, %c0_530, %c0_531] : memref<25x32x128xbf16, #tpu.memory_space<vmem>>, vector<1x32x128xbf16>
    %639 = vector.shape_cast %638 : vector<1x32x128xbf16> to vector<32x128xbf16>
    %cst_532 = arith.constant dense<0.000000e+00> : vector<1x128xf32>
    %640 = tpu.matmul %637, %639, %cst_532 {dimension_numbers = #tpu.dot_dimension_numbers<[1], [0], [0], [1], [0, 0, 1, 1], [], []>} : vector<1x32xbf16>, vector<32x128xbf16>, vector<1x128xf32> -> vector<1x128xf32>
    %641 = arith.addf %635, %640 : vector<1x128xf32>
    %c26 = arith.constant 26 : index
    %c0_533 = arith.constant 0 : index
    %642 = vector.load %arg14[%c26, %c0_533] : memref<40x128xf32, #tpu.memory_space<vmem>>, vector<1x32xf32>
    %643 = arith.truncf %642 : vector<1x32xf32> to vector<1x32xbf16>
    %c17_534 = arith.constant 17 : index
    %c0_535 = arith.constant 0 : index
    %c0_536 = arith.constant 0 : index
    %644 = vector.load %arg4[%c17_534, %c0_535, %c0_536] : memref<25x32x128xbf16, #tpu.memory_space<vmem>>, vector<1x32x128xbf16>
    %645 = vector.shape_cast %644 : vector<1x32x128xbf16> to vector<32x128xbf16>
    %cst_537 = arith.constant dense<0.000000e+00> : vector<1x128xf32>
    %646 = tpu.matmul %643, %645, %cst_537 {dimension_numbers = #tpu.dot_dimension_numbers<[1], [0], [0], [1], [0, 0, 1, 1], [], []>} : vector<1x32xbf16>, vector<32x128xbf16>, vector<1x128xf32> -> vector<1x128xf32>
    %647 = arith.addf %641, %646 : vector<1x128xf32>
    %c27 = arith.constant 27 : index
    %c0_538 = arith.constant 0 : index
    %648 = vector.load %arg14[%c27, %c0_538] : memref<40x128xf32, #tpu.memory_space<vmem>>, vector<1x32xf32>
    %649 = arith.truncf %648 : vector<1x32xf32> to vector<1x32xbf16>
    %c18_539 = arith.constant 18 : index
    %c0_540 = arith.constant 0 : index
    %c0_541 = arith.constant 0 : index
    %650 = vector.load %arg4[%c18_539, %c0_540, %c0_541] : memref<25x32x128xbf16, #tpu.memory_space<vmem>>, vector<1x32x128xbf16>
    %651 = vector.shape_cast %650 : vector<1x32x128xbf16> to vector<32x128xbf16>
    %cst_542 = arith.constant dense<0.000000e+00> : vector<1x128xf32>
    %652 = tpu.matmul %649, %651, %cst_542 {dimension_numbers = #tpu.dot_dimension_numbers<[1], [0], [0], [1], [0, 0, 1, 1], [], []>} : vector<1x32xbf16>, vector<32x128xbf16>, vector<1x128xf32> -> vector<1x128xf32>
    %653 = arith.addf %647, %652 : vector<1x128xf32>
    %c28 = arith.constant 28 : index
    %c0_543 = arith.constant 0 : index
    %654 = vector.load %arg14[%c28, %c0_543] : memref<40x128xf32, #tpu.memory_space<vmem>>, vector<1x32xf32>
    %655 = arith.truncf %654 : vector<1x32xf32> to vector<1x32xbf16>
    %c19_544 = arith.constant 19 : index
    %c0_545 = arith.constant 0 : index
    %c0_546 = arith.constant 0 : index
    %656 = vector.load %arg4[%c19_544, %c0_545, %c0_546] : memref<25x32x128xbf16, #tpu.memory_space<vmem>>, vector<1x32x128xbf16>
    %657 = vector.shape_cast %656 : vector<1x32x128xbf16> to vector<32x128xbf16>
    %cst_547 = arith.constant dense<0.000000e+00> : vector<1x128xf32>
    %658 = tpu.matmul %655, %657, %cst_547 {dimension_numbers = #tpu.dot_dimension_numbers<[1], [0], [0], [1], [0, 0, 1, 1], [], []>} : vector<1x32xbf16>, vector<32x128xbf16>, vector<1x128xf32> -> vector<1x128xf32>
    %659 = arith.addf %653, %658 : vector<1x128xf32>
    %c32_548 = arith.constant 32 : index
    %c0_549 = arith.constant 0 : index
    %660 = vector.load %arg14[%c32_548, %c0_549] : memref<40x128xf32, #tpu.memory_space<vmem>>, vector<1x32xf32>
    %661 = arith.truncf %660 : vector<1x32xf32> to vector<1x32xbf16>
    %c20_550 = arith.constant 20 : index
    %c0_551 = arith.constant 0 : index
    %c0_552 = arith.constant 0 : index
    %662 = vector.load %arg4[%c20_550, %c0_551, %c0_552] : memref<25x32x128xbf16, #tpu.memory_space<vmem>>, vector<1x32x128xbf16>
    %663 = vector.shape_cast %662 : vector<1x32x128xbf16> to vector<32x128xbf16>
    %cst_553 = arith.constant dense<0.000000e+00> : vector<1x128xf32>
    %664 = tpu.matmul %661, %663, %cst_553 {dimension_numbers = #tpu.dot_dimension_numbers<[1], [0], [0], [1], [0, 0, 1, 1], [], []>} : vector<1x32xbf16>, vector<32x128xbf16>, vector<1x128xf32> -> vector<1x128xf32>
    %665 = arith.addf %659, %664 : vector<1x128xf32>
    %c33_554 = arith.constant 33 : index
    %c0_555 = arith.constant 0 : index
    %666 = vector.load %arg14[%c33_554, %c0_555] : memref<40x128xf32, #tpu.memory_space<vmem>>, vector<1x32xf32>
    %667 = arith.truncf %666 : vector<1x32xf32> to vector<1x32xbf16>
    %c21 = arith.constant 21 : index
    %c0_556 = arith.constant 0 : index
    %c0_557 = arith.constant 0 : index
    %668 = vector.load %arg4[%c21, %c0_556, %c0_557] : memref<25x32x128xbf16, #tpu.memory_space<vmem>>, vector<1x32x128xbf16>
    %669 = vector.shape_cast %668 : vector<1x32x128xbf16> to vector<32x128xbf16>
    %cst_558 = arith.constant dense<0.000000e+00> : vector<1x128xf32>
    %670 = tpu.matmul %667, %669, %cst_558 {dimension_numbers = #tpu.dot_dimension_numbers<[1], [0], [0], [1], [0, 0, 1, 1], [], []>} : vector<1x32xbf16>, vector<32x128xbf16>, vector<1x128xf32> -> vector<1x128xf32>
    %671 = arith.addf %665, %670 : vector<1x128xf32>
    %c34_559 = arith.constant 34 : index
    %c0_560 = arith.constant 0 : index
    %672 = vector.load %arg14[%c34_559, %c0_560] : memref<40x128xf32, #tpu.memory_space<vmem>>, vector<1x32xf32>
    %673 = arith.truncf %672 : vector<1x32xf32> to vector<1x32xbf16>
    %c22 = arith.constant 22 : index
    %c0_561 = arith.constant 0 : index
    %c0_562 = arith.constant 0 : index
    %674 = vector.load %arg4[%c22, %c0_561, %c0_562] : memref<25x32x128xbf16, #tpu.memory_space<vmem>>, vector<1x32x128xbf16>
    %675 = vector.shape_cast %674 : vector<1x32x128xbf16> to vector<32x128xbf16>
    %cst_563 = arith.constant dense<0.000000e+00> : vector<1x128xf32>
    %676 = tpu.matmul %673, %675, %cst_563 {dimension_numbers = #tpu.dot_dimension_numbers<[1], [0], [0], [1], [0, 0, 1, 1], [], []>} : vector<1x32xbf16>, vector<32x128xbf16>, vector<1x128xf32> -> vector<1x128xf32>
    %677 = arith.addf %671, %676 : vector<1x128xf32>
    %c35_564 = arith.constant 35 : index
    %c0_565 = arith.constant 0 : index
    %678 = vector.load %arg14[%c35_564, %c0_565] : memref<40x128xf32, #tpu.memory_space<vmem>>, vector<1x32xf32>
    %679 = arith.truncf %678 : vector<1x32xf32> to vector<1x32xbf16>
    %c23 = arith.constant 23 : index
    %c0_566 = arith.constant 0 : index
    %c0_567 = arith.constant 0 : index
    %680 = vector.load %arg4[%c23, %c0_566, %c0_567] : memref<25x32x128xbf16, #tpu.memory_space<vmem>>, vector<1x32x128xbf16>
    %681 = vector.shape_cast %680 : vector<1x32x128xbf16> to vector<32x128xbf16>
    %cst_568 = arith.constant dense<0.000000e+00> : vector<1x128xf32>
    %682 = tpu.matmul %679, %681, %cst_568 {dimension_numbers = #tpu.dot_dimension_numbers<[1], [0], [0], [1], [0, 0, 1, 1], [], []>} : vector<1x32xbf16>, vector<32x128xbf16>, vector<1x128xf32> -> vector<1x128xf32>
    %683 = arith.addf %677, %682 : vector<1x128xf32>
    %c36_569 = arith.constant 36 : index
    %c0_570 = arith.constant 0 : index
    %684 = vector.load %arg14[%c36_569, %c0_570] : memref<40x128xf32, #tpu.memory_space<vmem>>, vector<1x32xf32>
    %685 = arith.truncf %684 : vector<1x32xf32> to vector<1x32xbf16>
    %c24_571 = arith.constant 24 : index
    %c0_572 = arith.constant 0 : index
    %c0_573 = arith.constant 0 : index
    %686 = vector.load %arg4[%c24_571, %c0_572, %c0_573] : memref<25x32x128xbf16, #tpu.memory_space<vmem>>, vector<1x32x128xbf16>
    %687 = vector.shape_cast %686 : vector<1x32x128xbf16> to vector<32x128xbf16>
    %cst_574 = arith.constant dense<0.000000e+00> : vector<1x128xf32>
    %688 = tpu.matmul %685, %687, %cst_574 {dimension_numbers = #tpu.dot_dimension_numbers<[1], [0], [0], [1], [0, 0, 1, 1], [], []>} : vector<1x32xbf16>, vector<32x128xbf16>, vector<1x128xf32> -> vector<1x128xf32>
    %689 = arith.addf %683, %688 : vector<1x128xf32>
    %c0_575 = arith.constant 0 : index
    %c0_576 = arith.constant 0 : index
    %690 = vector.load %arg5[%c0_575, %c0_576] : memref<1x128xf32, #tpu.memory_space<vmem>>, vector<1x128xf32>
    %691 = arith.addf %689, %690 : vector<1x128xf32>
    %cst_577 = arith.constant 0.000000e+00 : f32
    %692 = vector.broadcast %cst_577 : f32 to vector<1x128xf32>
    %693 = arith.maximumf %691, %692 : vector<1x128xf32>
    %694 = arith.truncf %693 : vector<1x128xf32> to vector<1x128xbf16>
    %c0_578 = arith.constant 0 : index
    %c0_579 = arith.constant 0 : index
    %695 = vector.load %arg6[%c0_578, %c0_579] : memref<128x128xbf16, #tpu.memory_space<vmem>>, vector<128x128xbf16>
    %cst_580 = arith.constant dense<0.000000e+00> : vector<1x128xf32>
    %696 = tpu.matmul %694, %695, %cst_580 {dimension_numbers = #tpu.dot_dimension_numbers<[1], [0], [0], [1], [0, 0, 1, 1], [], []>} : vector<1x128xbf16>, vector<128x128xbf16>, vector<1x128xf32> -> vector<1x128xf32>
    %c0_581 = arith.constant 0 : index
    %c0_582 = arith.constant 0 : index
    %697 = vector.load %arg7[%c0_581, %c0_582] : memref<1x128xf32, #tpu.memory_space<vmem>>, vector<1x128xf32>
    %698 = arith.addf %696, %697 : vector<1x128xf32>
    %cst_583 = arith.constant 0.000000e+00 : f32
    %699 = vector.broadcast %cst_583 : f32 to vector<1x128xf32>
    %700 = arith.maximumf %698, %699 : vector<1x128xf32>
    %701 = arith.truncf %700 : vector<1x128xf32> to vector<1x128xbf16>
    %c0_584 = arith.constant 0 : index
    %c0_585 = arith.constant 0 : index
    %702 = vector.load %arg8[%c0_584, %c0_585] : memref<128x128xbf16, #tpu.memory_space<vmem>>, vector<128x128xbf16>
    %cst_586 = arith.constant dense<0.000000e+00> : vector<1x128xf32>
    %703 = tpu.matmul %701, %702, %cst_586 {dimension_numbers = #tpu.dot_dimension_numbers<[1], [0], [0], [1], [0, 0, 1, 1], [], []>} : vector<1x128xbf16>, vector<128x128xbf16>, vector<1x128xf32> -> vector<1x128xf32>
    %cst_587 = arith.constant dense<0xFF800000> : vector<1xf32>
    %704 = vector.multi_reduction <maximumf>, %703, %cst_587 [1] : vector<1x128xf32> to vector<1xf32>
    %705 = vector.shape_cast %704 : vector<1xf32> to vector<1x1xf32>
    %706 = vector.broadcast %705 : vector<1x1xf32> to vector<1x128xf32>
    %707 = arith.subf %703, %706 : vector<1x128xf32>
    %708 = math.exp %707 : vector<1x128xf32>
    %cst_588 = arith.constant dense<0.000000e+00> : vector<1xf32>
    %709 = vector.multi_reduction <add>, %708, %cst_588 [1] : vector<1x128xf32> to vector<1xf32>
    %710 = vector.shape_cast %709 : vector<1xf32> to vector<1x1xf32>
    %711 = math.log %710 : vector<1x1xf32>
    %712 = vector.broadcast %711 : vector<1x1xf32> to vector<1x128xf32>
    %713 = arith.subf %707, %712 : vector<1x128xf32>
    %c0_589 = arith.constant 0 : index
    %c0_590 = arith.constant 0 : index
    %c0_591 = arith.constant 0 : index
    %714 = vector.load %arg9[%c0_589, %c0_590, %c0_591] : memref<1x1x128xf32, #tpu.memory_space<vmem>>, vector<1x1x128xf32>
    %715 = vector.shape_cast %714 : vector<1x1x128xf32> to vector<1x128xf32>
    %716 = vector.shape_cast %713 : vector<1x128xf32> to vector<1x1x128xf32>
    tpu.vector_store %arg9[%c0_589, %c0_590, %c0_591], %716 {strides = array<i32>} : memref<1x1x128xf32, #tpu.memory_space<vmem>>, vector<1x1x128xf32>,
    return
  }
  func.func @transform_0(%arg0: i32) -> (i32, i32, i32) {
    %c0_i32 = arith.constant 0 : i32
    %c0_i32_0 = arith.constant 0 : i32
    %c0_i32_1 = arith.constant 0 : i32
    return %arg0, %c0_i32, %c0_i32_0 : i32, i32, i32
  }
  func.func @transform_1(%arg0: i32) -> (i32, i32) {
    %c0_i32 = arith.constant 0 : i32
    %c0_i32_0 = arith.constant 0 : i32
    %c0_i32_1 = arith.constant 0 : i32
    return %c0_i32, %c0_i32_0 : i32, i32
  }
  func.func @transform_2(%arg0: i32) -> (i32, i32, i32) {
    %c0_i32 = arith.constant 0 : i32
    %c0_i32_0 = arith.constant 0 : i32
    %c0_i32_1 = arith.constant 0 : i32
    %c0_i32_2 = arith.constant 0 : i32
    return %c0_i32, %c0_i32_0, %c0_i32_1 : i32, i32, i32
  }
  func.func @transform_3(%arg0: i32) -> (i32, i32, i32) {
    %c0_i32 = arith.constant 0 : i32
    %c0_i32_0 = arith.constant 0 : i32
    %c0_i32_1 = arith.constant 0 : i32
    %c0_i32_2 = arith.constant 0 : i32
    return %c0_i32, %c0_i32_0, %c0_i32_1 : i32, i32, i32
  }
  func.func @transform_4(%arg0: i32) -> (i32, i32) {
    %c0_i32 = arith.constant 0 : i32
    %c0_i32_0 = arith.constant 0 : i32
    %c0_i32_1 = arith.constant 0 : i32
    return %c0_i32, %c0_i32_0 : i32, i32
  }
  func.func @transform_5(%arg0: i32) -> (i32, i32) {
    %c0_i32 = arith.constant 0 : i32
    %c0_i32_0 = arith.constant 0 : i32
    %c0_i32_1 = arith.constant 0 : i32
    return %c0_i32, %c0_i32_0 : i32, i32
  }
  func.func @transform_6(%arg0: i32) -> (i32, i32) {
    %c0_i32 = arith.constant 0 : i32
    %c0_i32_0 = arith.constant 0 : i32
    %c0_i32_1 = arith.constant 0 : i32
    return %c0_i32, %c0_i32_0 : i32, i32
  }
  func.func @transform_7(%arg0: i32) -> (i32, i32) {
    %c0_i32 = arith.constant 0 : i32
    %c0_i32_0 = arith.constant 0 : i32
    %c0_i32_1 = arith.constant 0 : i32
    return %c0_i32, %c0_i32_0 : i32, i32
  }
  func.func @transform_8(%arg0: i32) -> (i32, i32, i32) {
    %c0_i32 = arith.constant 0 : i32
    %c0_i32_0 = arith.constant 0 : i32
    %c0_i32_1 = arith.constant 0 : i32
    return %arg0, %c0_i32, %c0_i32_0 : i32, i32, i32
  }
}

</mosaic_0001>

<bundles_post_ra>
// kernel: lenet5_forward.1
= control target key start
LH: loop header
LB: loop body
LE: loop exit
PB: predicated region body
PF: predicated region fallthrough
CT: control target
= control target key end

     0   :  { %13 = vsyncpa [#allocation9], 0  ;;  %s9764_s0 = inlined_call_operand.vmem [shape: bf16[2,896,32], index: 0, kind: input, shape index: {}]   ;;  %s9765_s1 = inlined_call_operand.vmem [shape: bf16[32,128], index: 1, kind: input, shape index: {}]   ;;  %s9766_s2 = inlined_call_operand.vmem [shape: bf16[5,48,128], index: 2, kind: input, shape index: {}]   ;;  %s9767_s3 = inlined_call_operand.vmem [shape: bf16[25,32,128], index: 3, kind: input, shape index: {}]   ;;  %s9768_s4 = inlined_call_operand.vmem [shape: f32[1,128], index: 4, kind: input, shape index: {}]   ;;  %s9769_s5 = inlined_call_operand.vmem [shape: bf16[128,128], index: 5, kind: input, shape index: {}]   ;;  %s9770_s6 = inlined_call_operand.vmem [shape: f32[1,128], index: 6, kind: input, shape index: {}]   ;;  %s9771_s7 = inlined_call_operand.vmem [shape: bf16[128,128], index: 7, kind: input, shape index: {}]   ;;  %s9772_s8 = inlined_call_operand.hbm [shape: f32[2,1,128], index: 8, kind: output, shape index: {}]  }
   0x1   :  { %15 = vsyncpa [#allocation9 + $0x1], 0  ;;  %s8121_s27 = smov 0   ;;  %s8123_s28 = smov 0  }
   0x2   :  { %s8125_s29 = smov 0   ;;  %s8127_s30 = smov 0  }
   0x3 LB: > { %s8142_s9 = sadd.s32 4294967295, %s8071_s30   ;;  %s6234_s10 = sadd.s32 4294967294, %s8071_s30   ;;  %s8071_s30 = sphi %s8127_s30, %s9782_s30   ;;  %s8067_s29 = sphi %s8125_s29, %s9781_s29   ;;  %s8063_s28 = sphi %s8123_s28, %s9780_s28   ;;  %s8059_s27 = sphi %s8121_s27, %s9779_s27  }
   0x4   : > { %s8146_s11 = sadd.s32 1, %s8071_s30   ;;  %s201_s12 = sadd.s32 1, %s8067_s29 }
   0x5   : > { %s198_s13 = ssub.s32 %s8071_s30, %s8146_s11  ;;  %p211_p0 = scmp.ne.s32.totalorder %s8067_s29, %s8063_s28 }
   0x6   : > { %p199_p1 = scmp.eq.s32.totalorder %s198_s13, 0  ;;  %p212_p2 = scmp.eq.s32.totalorder %s8142_s9, 1 }
   0x7   : > { %p217_p3 = scmp.ne.s32.totalorder %s8063_s28, %s8059_s27  ;;  %p218_p4 = scmp.eq.s32.totalorder %s6234_s10, 1 }
   0x8   : > { %s8157_s14 = scalar_select %p199_p1, %s8067_s29, %s201_s12  }
   0x9   : > { %p8159_p5 = por %p212_p2, %p211_p0  ;;  %p8163_p6 = por %p218_p4, %p217_p3 }
   0xa   : > { %p6237_p7 = scmp.ge.s32.totalorder %s8071_s30, 1  ;;  %p265_p8 = scmp.lt.s32.totalorder %s8071_s30, 3 }
   0xc   : > { %p266_p9 = pnand %p6237_p7, %p265_p8 }
   0xd   : > { %p298_p10 = scmp.lt.s32.totalorder (!%p266_p9), %s8142_s9, 1  ;;  %s6756_s10 = sshll.u32 (!%p266_p9), %s8142_s9, 4 }
   0xe   : > { %269 = sbr.rel (%p266_p9) target bundleno = 1666 (0x682), region = 52  ;;  %s6177_s19 = scalar_lea.hbm (!%p266_p9), %s9772_s8, %s6756_s10 }
   0xf   : > { %s8075_s22 = smov (!%p266_p9), [#allocation8]  }
  0x13   : > { %v7795_v0 = vld [vmem:[%s9765_s1 + $0x8] sm:$0xff]   ;;  %v7797_v2 = vld [vmem:[%s9765_s1] sm:$0xff]   ;;  %s299_s23 = scalar_select %p298_p10, %s8142_s9, 1  ;;  %vm376_vm0 = vcmask 261120   ;;  %v8073_v63 = vmov 0.0   ;;  %vm8074_vm1 = vmmov 0  }
  0x14   : > { %v7796_v1 = vld [vmem:[%s9765_s1 + $0x8] sm:$0xff]   ;;  %7113 = vmatprep.subr.bf16.mxu0 %v7795_v0  ;;  %v7799_v3 = vld [vmem:[%s9765_s1] sm:$0xff]   ;;  %2219 = vst [vmem:[#allocation3 + $0xe0] sm:$0xff] %v8073_v63 }
  0x15   : > { %7114 = vmatpush3.bf16.msra.mxu0 %v7795_v0  ;;  %7133 = vmatprep.subr.bf16.mxu1 %v7796_v1  ;;  %s7753_s26 = smul.u32 448, %s299_s23  ;;  %v7801_v4 = vld [vmem:[%s9765_s1 + $0x8] sm:$0xff]   ;;  %v7810_v5 = vld [vmem:[%s9765_s1] sm:$0xff]   ;;  %s8015_s23 = sshll.u32 %s8075_s22, 4  ;;  %s8016_s23 = int_to_ptr.vmem [resolvable:$false] %s8015_s23 }
  0x16   : > { %7115 = vmatprep.subr.bf16.mxu0 %v7797_v2  ;;  %7134 = vmatpush3.bf16.msra.mxu1 %v7796_v1  ;;  %v7815_v6 = vld [vmem:[%s9765_s1 + $0x8] sm:$0xff]   ;;  %v7821_v21 = vld [vmem:[%s9765_s1] sm:$0xff]   ;;  %s8017_s9 = scalar_lea.vmem %s8016_s23, 32 }
  0x17   : > { %7135 = vmatprep.subr.bf16.mxu1 %v7799_v3  ;;  %s8189_s18 = scalar_lea.vmem %s9764_s0, %s7753_s26  ;;  %v7831_v26 = vld [vmem:[%s9765_s1 + $0x8] sm:$0xff]   ;;  %v7832_v30 = vld [vmem:[%s9765_s1] sm:$0xff]   ;;  %s296_s26 = sand.u32 1, %s8063_s28  }
  0x18   : > { %v7798_v7 = vld [vmem:[%s8189_s18] sm:$0xff]   ;;  %v7800_v8 = vld [vmem:[%s8189_s18 + $0x8] sm:$0xff]   ;;  %v7804_v11 = vld [vmem:[%s8189_s18 + $0x10] sm:$0xff]   ;;  %s297_s12 = scalar_lea.vmem [#allocation8], %s296_s26  ;;  %s6167_s20 = scalar_lea.sflag [#allocation9], %s296_s26 }
  0x19   : > { %7116 = vmatpush3.bf16.msra.mxu0 %v7797_v2  ;;  %7117 = vmatprep.mubr.msk.bf16.mxu0 %vm376_vm0, %v7798_v7  ;;  %v7802_v9 = vld [vmem:[%s8189_s18 + $0x40] sm:$0xff]   ;;  %v7803_v10 = vld [vmem:[%s8189_s18 + $0x48] sm:$0xff]   ;;  %v7806_v12 = vld [vmem:[%s8189_s18 + $0x50] sm:$0xff]   ;;  %s6179_s13 = sshll.u32 %s297_s12, 4  ;;  %s6180_s13 = int_to_ptr.vmem [resolvable:$true] %s6179_s13 }
  0x1a   : > { %7136 = vmatpush3.bf16.msra.mxu1 %v7799_v3  ;;  %7153 = vmatprep.subr.bf16.mxu0 %v7801_v4  ;;  %v7805_v13 = vld [vmem:[%s8189_s18 + $0x18] sm:$0xff]   ;;  %v7808_v14 = vld [vmem:[%s8189_s18 + $0x20] sm:$0xff]   ;;  %v7809_v17 = vld [vmem:[%s8189_s18 + $0x28] sm:$0xff]   ;;  %s8011_s21 = scalar_lea.vmem %s6180_s13, 16  ;;  %p8018_p0 = scmp.lt.s32.totalorder %s6180_s13, %s8016_s23 }
  0x1b   : > { %7173 = vmatprep.subr.bf16.mxu1 %v7815_v6  ;;  %7137 = vmatprep.mubr.msk.bf16.mxu1 %vm376_vm0, %v7802_v9  ;;  %v7807_v15 = vld [vmem:[%s8189_s18 + $0x58] sm:$0xff]   ;;  %v7811_v16 = vld [vmem:[%s8189_s18 + $0x60] sm:$0xff]   ;;  %v7813_v18 = vld [vmem:[%s8189_s18 + $0x30] sm:$0xff]   ;;  %p8012_p11 = scmp.ne.s32.totalorder %s6180_s13, %s8011_s21  ;;  %p8019_p1 = scmp.lt.s32.totalorder %s8017_s9, %s8011_s21 }
  0x1c   : > { %7118 = vmatmul.mubr.msk.bf16.vlgmr.msra.gmra.mxu0 %vm376_vm0, %v7800_v8  ;;  %v7812_v19 = vld [vmem:[%s8189_s18 + $0x68] sm:$0xff]   ;;  %v7816_v20 = vld [vmem:[%s8189_s18 + $0x70] sm:$0xff]   ;;  %v7814_v22 = vld [vmem:[%s8189_s18 + $0x38] sm:$0xff]  }
  0x1d   : > { %7154 = vmatpush3.bf16.msra.mxu0 %v7801_v4  ;;  %7138 = vmatmul.mubr.msk.bf16.vlgmr.msra.gmra.mxu1 %vm376_vm0, %v7803_v10  ;;  %v7818_v23 = vld [vmem:[%s8189_s18 + $0x80] sm:$0xff]   ;;  %v7817_v24 = vld [vmem:[%s8189_s18 + $0x78] sm:$0xff]   ;;  %v7819_v27 = vld [vmem:[%s8189_s18 + $0x88] sm:$0xff]   ;;  %p8013_p12 = pnand %p8012_p11, %p8159_p5  ;;  %p8020_p2 = por %p8019_p1, %p8018_p0 }
  0x1e   : > { %7155 = vmatprep.subr.bf16.mxu0 %v7810_v5  ;;  %7121 = vmatprep.mubr.msk.bf16.mxu0 %vm376_vm0, %v7804_v11  ;;  %v7823_v25 = vld [vmem:[%s8189_s18 + $0xc0] sm:$0xff]   ;;  %v7820_v28 = vld [vmem:[%s8189_s18 + $0x90] sm:$0xff]   ;;  %v7824_v29 = vld [vmem:[%s8189_s18 + $0xc8] sm:$0xff]  }
  0x1f   : > { %7174 = vmatpush3.bf16.msra.mxu1 %v7815_v6  ;;  %7141 = vmatprep.mubr.msk.bf16.mxu1 %vm376_vm0, %v7806_v12  ;;  %v7827_v31 = vld [vmem:[%s8189_s18 + $0xd0] sm:$0xff]   ;;  %v7822_v32 = vld [vmem:[%s8189_s18 + $0x98] sm:$0xff]   ;;  %v7825_v33 = vld [vmem:[%s8189_s18 + $0xa0] sm:$0xff]   ;;  %p8014_p13 = pneg %p8013_p12 }
  0x20   : > { %7175 = vmatprep.subr.bf16.mxu1 %v7821_v21  ;;  %v7828_v34 = vld [vmem:[%s8189_s18 + $0xd8] sm:$0xff]   ;;  %v7842_v35 = vld [vmem:[%s9765_s1 + $0x8] sm:$0xff]   ;;  %v7833_v36 = vld [vmem:[%s8189_s18 + $0xe0] sm:$0xff]  }
  0x21   : > { %7156 = vmatpush3.bf16.msra.mxu0 %v7810_v5  ;;  %v7844_v37 = vld [vmem:[%s9765_s1] sm:$0xff]   ;;  %v7826_v38 = vld [vmem:[%s8189_s18 + $0xa8] sm:$0xff]   ;;  %v7829_v39 = vld [vmem:[%s8189_s18 + $0xb0] sm:$0xff]   ;;  %p8021_p3 = pnand %p8020_p2, %p8014_p13 }
  0x22   : > { %7193 = vmatprep.subr.bf16.mxu0 %v7831_v26  ;;  %v7835_v40 = vld [vmem:[%s8189_s18 + $0xe8] sm:$0xff]   ;;  %v7837_v41 = vld [vmem:[%s8189_s18 + $0xf0] sm:$0xff]   ;;  %v7830_v43 = vld [vmem:[%s8189_s18 + $0xb8] sm:$0xff]  }
  0x23   : > { %7176 = vmatpush3.bf16.msra.mxu1 %v7821_v21  ;;  %v7855_v42 = vld [vmem:[%s9765_s1 + $0x8] sm:$0xff]   ;;  %v7834_v44 = vld [vmem:[%s8189_s18 + $0x100] sm:$0xff]   ;;  %v7839_v45 = vld [vmem:[%s8189_s18 + $0xf8] sm:$0xff]  }
  0x24   : > { %7122 = vmatmul.mubr.msk.bf16.gmra.mxu0 %vm376_vm0, %v7805_v13  ;;  %7213 = vmatprep.subr.bf16.mxu1 %v7842_v35  ;;  %v7845_v46 = vld [vmem:[%s8189_s18 + $0x140] sm:$0xff]   ;;  %v7836_v47 = vld [vmem:[%s8189_s18 + $0x108] sm:$0xff]   ;;  %v7838_v48 = vld [vmem:[%s8189_s18 + $0x110] sm:$0xff]  }
  0x25   : > { %7125 = vmatprep.mubr.msk.bf16.mxu0 %vm376_vm0, %v7808_v14  ;;  %7142 = vmatmul.mubr.msk.bf16.gmra.mxu1 %vm376_vm0, %v7807_v15  ;;  %v7847_v49 = vld [vmem:[%s8189_s18 + $0x148] sm:$0xff]   ;;  %v7856_v50 = vld [vmem:[%s9765_s1] sm:$0xff]   ;;  %v7849_v51 = vld [vmem:[%s8189_s18 + $0x150] sm:$0xff]  }
  0x26   : > { %7145 = vmatprep.mubr.msk.bf16.mxu1 %vm376_vm0, %v7811_v16  ;;  %v7840_v52 = vld [vmem:[%s8189_s18 + $0x118] sm:$0xff]   ;;  %v7841_v53 = vld [vmem:[%s8189_s18 + $0x120] sm:$0xff]   ;;  %v7843_v56 = vld [vmem:[%s8189_s18 + $0x128] sm:$0xff]  }
  0x27   : > { %v7850_v54 = vld [vmem:[%s8189_s18 + $0x158] sm:$0xff]   ;;  %v7851_v55 = vld [vmem:[%s8189_s18 + $0x160] sm:$0xff]   ;;  %v7846_v57 = vld [vmem:[%s8189_s18 + $0x130] sm:$0xff]  }
  0x28   : > { %v7852_v58 = vld [vmem:[%s8189_s18 + $0x168] sm:$0xff]   ;;  %v7853_v59 = vld [vmem:[%s8189_s18 + $0x170] sm:$0xff]   ;;  %v7848_v60 = vld [vmem:[%s8189_s18 + $0x138] sm:$0xff]  }
  0x29   : > { %v7857_v61 = vld [vmem:[%s8189_s18 + $0x180] sm:$0xff]   ;;  %v7854_v62 = vld [vmem:[%s8189_s18 + $0x178] sm:$0xff]   ;;  %v7858_v0 = vld [vmem:[%s8189_s18 + $0x188] sm:$0xff]  }
  0x2a   : > { %v7859_v1 = vld [vmem:[%s8189_s18 + $0x190] sm:$0xff]   ;;  %v7860_v2 = vld [vmem:[%s8189_s18 + $0x198] sm:$0xff]   ;;  %v7861_v3 = vld [vmem:[%s8189_s18 + $0x1a0] sm:$0xff]  }
  0x2b   : > { %v7862_v4 = vld [vmem:[%s8189_s18 + $0x1a8] sm:$0xff]   ;;  %v7863_v5 = vld [vmem:[%s8189_s18 + $0x1b0] sm:$0xff]   ;;  %v7864_v6 = vld [vmem:[%s8189_s18 + $0x1b8] sm:$0xff]  }
  0x2c   : > { %7126 = vmatmul.mubr.msk.bf16.gmra.mxu0 %vm376_vm0, %v7809_v17  ;;  %v7866_v7 = vld [vmem:[%s9766_s2 + $0x10] sm:$0xff]   ;;  %v7868_v8 = vld [vmem:[%s9766_s2 + $0x8] sm:$0xff]   ;;  %v7869_v10 = vld [vmem:[%s9766_s2] sm:$0xff]  }
  0x2d   : > { %7129 = vmatprep.mubr.msk.bf16.mxu0 %vm376_vm0, %v7813_v18  ;;  %7146 = vmatmul.mubr.msk.bf16.gmra.mxu1 %vm376_vm0, %v7812_v19  ;;  %v7865_v9 = vld [vmem:[%s9766_s2 + $0x28] sm:$0xff]   ;;  %v7867_v11 = vld [vmem:[%s9766_s2 + $0x20] sm:$0xff]   ;;  %v7870_v12 = vld [vmem:[%s9766_s2 + $0x18] sm:$0xff]  }
  0x2e   : > { %7149 = vmatprep.mubr.msk.bf16.mxu1 %vm376_vm0, %v7816_v20 }
  0x34   : > { %7130 = vmatmul.mubr.msk.bf16.gmra.mxu0 %vm376_vm0, %v7814_v22 }
  0x35   : > { %7157 = vmatprep.mubr.msk.bf16.mxu0 %vm376_vm0, %v7818_v23  ;;  %7150 = vmatmul.mubr.msk.bf16.gmra.mxu1 %vm376_vm0, %v7817_v24 }
  0x36   : > { %7177 = vmatprep.mubr.msk.bf16.mxu1 %vm376_vm0, %v7823_v25 }
  0x3c   : > { %7158 = vmatmul.mubr.msk.bf16.vlgmr.msra.gmra.mxu0 %vm376_vm0, %v7819_v27 }
  0x3d   : > { %7161 = vmatprep.mubr.msk.bf16.mxu0 %vm376_vm0, %v7820_v28  ;;  %7194 = vmatpush3.bf16.msra.mxu0 %v7831_v26 }
  0x3e   : > { %7178 = vmatmul.mubr.msk.bf16.vlgmr.msra.gmra.mxu1 %vm376_vm0, %v7824_v29  ;;  %7195 = vmatprep.subr.bf16.mxu0 %v7832_v30 }
  0x3f   : > { %7181 = vmatprep.mubr.msk.bf16.mxu1 %vm376_vm0, %v7827_v31  ;;  %7214 = vmatpush3.bf16.msra.mxu1 %v7842_v35 }
  0x40   : > { %7215 = vmatprep.subr.bf16.mxu1 %v7844_v37 }
  0x41   : > { %7196 = vmatpush3.bf16.msra.mxu0 %v7832_v30 }
  0x42   : > { %7233 = vmatprep.subr.bf16.mxu0 %v7855_v42 }
  0x43   : > { %7216 = vmatpush3.bf16.msra.mxu1 %v7844_v37 }
  0x44   : > { %7162 = vmatmul.mubr.msk.bf16.gmra.mxu0 %vm376_vm0, %v7822_v32  ;;  %7253 = vmatprep.subr.bf16.mxu1 %v8073_v63 }
  0x45   : > { %7165 = vmatprep.mubr.msk.bf16.mxu0 %vm376_vm0, %v7825_v33 }
  0x46   : > { %7182 = vmatmul.mubr.msk.bf16.gmra.mxu1 %vm376_vm0, %v7828_v34 }
  0x47   : > { %7185 = vmatprep.mubr.msk.bf16.mxu1 %vm376_vm0, %v7833_v36 }
  0x4c   : > { %7166 = vmatmul.mubr.msk.bf16.gmra.mxu0 %vm376_vm0, %v7826_v38 }
  0x4d   : > { %7169 = vmatprep.mubr.msk.bf16.mxu0 %vm376_vm0, %v7829_v39 }
  0x4e   : > { %7186 = vmatmul.mubr.msk.bf16.gmra.mxu1 %vm376_vm0, %v7835_v40 }
  0x4f   : > { %7189 = vmatprep.mubr.msk.bf16.mxu1 %vm376_vm0, %v7837_v41 }
  0x54   : > { %7170 = vmatmul.mubr.msk.bf16.gmra.mxu0 %vm376_vm0, %v7830_v43 }
  0x55   : > { %7197 = vmatprep.mubr.msk.bf16.mxu0 %vm376_vm0, %v7834_v44 }
  0x56   : > { %7190 = vmatmul.mubr.msk.bf16.gmra.mxu1 %vm376_vm0, %v7839_v45 }
  0x57   : > { %7217 = vmatprep.mubr.msk.bf16.mxu1 %vm376_vm0, %v7845_v46 }
  0x5c   : > { %7198 = vmatmul.mubr.msk.bf16.vlgmr.msra.gmra.mxu0 %vm376_vm0, %v7836_v47 }
  0x5d   : > { %7201 = vmatprep.mubr.msk.bf16.mxu0 %vm376_vm0, %v7838_v48  ;;  %7234 = vmatpush3.bf16.msra.mxu0 %v7855_v42  ;;  %v2220_v48 = vlaneseq }
  0x5e   : > { %7218 = vmatmul.mubr.msk.bf16.vlgmr.msra.gmra.mxu1 %vm376_vm0, %v7847_v49  ;;  %7235 = vmatprep.subr.bf16.mxu0 %v7856_v50 }
  0x5f   : > { %7221 = vmatprep.mubr.msk.bf16.mxu1 %vm376_vm0, %v7849_v51  ;;  %7254 = vmatpush3.bf16.msra.mxu1 %v7865_v9 }
  0x60   : > { %7255 = vmatprep.subr.bf16.mxu1 %v8073_v63 }
  0x61   : > { %7236 = vmatpush3.bf16.msra.mxu0 %v7856_v50 }
  0x62   : > { %7279 = vmatprep.subr.bf16.mxu0 %v8073_v63 }
  0x63   : > { %7256 = vmatpush3.bf16.msra.mxu1 %v7867_v11 }
  0x64   : > { %7202 = vmatmul.mubr.msk.bf16.gmra.mxu0 %vm376_vm0, %v7840_v52  ;;  %7257 = vmatprep.subr.bf16.mxu1 %v8073_v63 }
  0x65   : > { %7205 = vmatprep.mubr.msk.bf16.mxu0 %vm376_vm0, %v7841_v53 }
  0x66   : > { %7222 = vmatmul.mubr.msk.bf16.gmra.mxu1 %vm376_vm0, %v7850_v54 }
  0x67   : > { %7225 = vmatprep.mubr.msk.bf16.mxu1 %vm376_vm0, %v7851_v55  ;;  %7258 = vmatpush3.bf16.msra.mxu1 %v7870_v12 }
  0x68   : > { %7305 = vmatprep.subr.bf16.mxu1 %v8073_v63 }
  0x6c   : > { %7206 = vmatmul.mubr.msk.bf16.gmra.mxu0 %vm376_vm0, %v7843_v56 }
  0x6d   : > { %7209 = vmatprep.mubr.msk.bf16.mxu0 %vm376_vm0, %v7846_v57 }
  0x6e   : > { %7226 = vmatmul.mubr.msk.bf16.gmra.mxu1 %vm376_vm0, %v7852_v58 }
  0x6f   : > { %7229 = vmatprep.mubr.msk.bf16.mxu1 %vm376_vm0, %v7853_v59 }
  0x74   : > { %7210 = vmatmul.mubr.msk.bf16.gmra.mxu0 %vm376_vm0, %v7848_v60  ;;  %v8389_v60 = vand.u32 127, %v2220_v48 }
  0x75   : > { %7237 = vmatprep.mubr.msk.bf16.mxu0 %vm376_vm0, %v7857_v61 }
  0x76   : > { %7230 = vmatmul.mubr.msk.bf16.gmra.mxu1 %vm376_vm0, %v7854_v62  ;;  %vm2230_vm2 = vcmp.ge.s32.totalorder %v8389_v60, 8  ;;  %vm2231_vm3 = vcmp.lt.s32.totalorder %v8389_v60, 16  ;;  %vm2226_vm4 = vcmp.lt.s32.totalorder %v8389_v60, 8  ;;  %vm2222_vm6 = vcmp.eq.s32.totalorder %v8389_v60, 40 }
  0x77   : > { %7259 = vmatprep.mubr.msk.bf16.mxu1 %vm8074_vm1, %v8073_v63  ;;  %vm2232_vm5 = vmand %vm2230_vm2, %vm2231_vm3  ;;  %vm2235_vm7 = vcmp.ge.s32.totalorder %v8389_v60, 16  ;;  %vm2236_vm8 = vcmp.lt.s32.totalorder %v8389_v60, 24  ;;  %vm2240_vm10 = vcmp.ge.s32.totalorder %v8389_v60, 24  ;;  %vm2241_vm11 = vcmp.lt.s32.totalorder %v8389_v60, 32 }
  0x78   : > { %vm8436_vm9 = vmand %vm2235_vm7, %vm2236_vm8  ;;  %vm2245_vm12 = vcmp.ge.s32.totalorder %v8389_v60, 32  ;;  %vm2246_vm13 = vcmp.lt.s32.totalorder %v8389_v60, 40  ;;  %vm2878_vm2 = vcmask 392192  }
  0x79   : > { %vm8469_vm14 = vmand %vm2240_vm10, %vm2241_vm11 }
  0x7a   : > { %vm2247_vm15 = vmand %vm2245_vm12, %vm2246_vm13  ;;  %v8496_v60 = vsel %vm8469_vm14, 1.0, %v8073_v63 }
  0x7c   : > { %7238 = vmatmul.mubr.msk.bf16.vlgmr.msra.gmra.mxu0 %vm376_vm0, %v7858_v0 }
  0x7d   : > { %7241 = vmatprep.mubr.msk.bf16.mxu0 %vm376_vm0, %v7859_v1  ;;  %7280 = vmatpush3.bf16.msra.mxu0 %v7866_v7 }
  0x7e   : > { %7281 = vmatprep.subr.bf16.mxu0 %v8073_v63 }
  0x81   : > { %7282 = vmatpush3.bf16.msra.mxu0 %v7868_v8 }
  0x82   : > { %7283 = vmatprep.subr.bf16.mxu0 %v8073_v63 }
  0x84   : > { %7242 = vmatmul.mubr.msk.bf16.gmra.mxu0 %vm376_vm0, %v7860_v2 }
  0x85   : > { %7245 = vmatprep.mubr.msk.bf16.mxu0 %vm376_vm0, %v7861_v3  ;;  %7284 = vmatpush3.bf16.msra.mxu0 %v7869_v10 }
  0x86   : > { %7331 = vmatprep.subr.bf16.mxu0 %v8073_v63 }
  0x8c   : > { %7246 = vmatmul.mubr.msk.bf16.gmra.mxu0 %vm376_vm0, %v7862_v4 }
  0x8d   : > { %7249 = vmatprep.mubr.msk.bf16.mxu0 %vm376_vm0, %v7863_v5 }
  0x94   : > { %7250 = vmatmul.mubr.msk.bf16.gmra.mxu0 %vm376_vm0, %v7864_v6 }
  0x95   : > { %7285 = vmatprep.mubr.msk.bf16.mxu0 %vm8074_vm1, %v8073_v63 }
  0xdc   : > { %v7119_v13 = vpop.f32.mrf.mxu0 }
  0xdd   : > { %v8361_v15 = vpop.f32.mrf.mxu1  ;;  %v500_v22 = vmax.f32 %v7119_v13, 0.0 }
  0xde   : > { %v435_v14 = vpop.f32.mrf.mxu0 }
  0xdf   : > { %v8363_v17 = vpop.f32.mrf.mxu1  ;;  %v498_v26 = vmax.f32 %v435_v14, 0.0 }
  0xe0   : > { %v7120_v16 = vpop.f32.mrf.mxu0 }
  0xe1   : > { %v8365_v19 = vpop.f32.mrf.mxu1  ;;  %v501_v31 = vmax.f32 %v7120_v16, 0.0 }
  0xe2   : > { %v438_v18 = vpop.f32.mrf.mxu0 }
  0xe3   : > { %v8367_v21 = vpop.f32.mrf.mxu1  ;;  %v499_v36 = vmax.f32 %v438_v18, 0.0 }
  0xe4   : > { %v7123_v20 = vpop.f32.mrf.mxu0 }
  0xe5   : > { %v504_v23 = vmax.f32 %v7123_v20, 0.0  ;;  %v8369_v25 = vpop.f32.mrf.mxu1  ;;  %v8408_v20 = vsel %vm2226_vm4, 1.0, %v8073_v63 }
  0xe6   : > { %v451_v24 = vpop.f32.mrf.mxu0 }
  0xe7   : > { %v1890_v27 = vmax.f32 %v500_v22, %v504_v23  ;;  %v502_v28 = vmax.f32 %v451_v24, 0.0  ;;  %v8371_v30 = vpop.f32.mrf.mxu1  ;;  %v725_v22 = vmax.f32 %v8361_v15, 0.0  ;;  %v726_v23 = vmax.f32 %v8365_v19, 0.0 }
  0xe8   : > { %v7124_v29 = vpop.f32.mrf.mxu0  ;;  %v729_v24 = vmax.f32 %v8369_v25, 0.0  ;;  %v723_v15 = vmax.f32 %v8363_v17, 0.0  ;;  %v724_v19 = vmax.f32 %v8367_v21, 0.0  ;;  %v727_v25 = vmax.f32 %v8371_v30, 0.0 }
  0xe9   : > { %1894 = vst [vmem:[#allocation7 + $0x10] sm:$0xff] %v1890_v27  ;;  %v1888_v32 = vmax.f32 %v498_v26, %v502_v28  ;;  %v505_v33 = vmax.f32 %v7124_v29, 0.0  ;;  %v8373_v35 = vpop.f32.mrf.mxu1  ;;  %v8420_v29 = vsel %vm2232_vm5, 1.0, %v8073_v63 }
  0xea   : > { %v454_v34 = vpop.f32.mrf.mxu0  ;;  %v730_v26 = vmax.f32 %v8373_v35, 0.0 }
  0xeb   : > { %1892 = vst [vmem:[#allocation7] sm:$0xff] %v1888_v32  ;;  %v1891_v37 = vmax.f32 %v501_v31, %v505_v33  ;;  %v503_v38 = vmax.f32 %v454_v34, 0.0  ;;  %v8375_v40 = vpop.f32.mrf.mxu1 }
  0xec   : > { %v7127_v39 = vpop.f32.mrf.mxu0  ;;  %v728_v31 = vmax.f32 %v8375_v40, 0.0 }
  0xed   : > { %1895 = vst [vmem:[#allocation7 + $0x18] sm:$0xff] %v1891_v37  ;;  %v1889_v41 = vmax.f32 %v499_v36, %v503_v38  ;;  %v8377_v43 = vpop.f32.mrf.mxu1  ;;  %v508_v53 = vmax.f32 %v7127_v39, 0.0  ;;  %v1941_v36 = vmax.f32 %v725_v22, %v729_v24  ;;  %v1942_v37 = vmax.f32 %v726_v23, %v730_v26 }
  0xee   : > { %v467_v42 = vpop.f32.mrf.mxu0  ;;  %v8434_v38 = vsel %vm2222_vm6, 1.0, %v8073_v63  ;;  %v733_v48 = vmax.f32 %v8377_v43, 0.0 }
  0xef   : > { %1893 = vst [vmem:[#allocation7 + $0x8] sm:$0xff] %v1889_v41  ;;  %v8379_v45 = vpop.f32.mrf.mxu1  ;;  %v506_v61 = vmax.f32 %v467_v42, 0.0  ;;  %v1939_v42 = vmax.f32 %v723_v15, %v727_v25 }
  0xf0   : > { %v7128_v44 = vpop.f32.mrf.mxu0 }
  0xf1   : > { %v8381_v47 = vpop.f32.mrf.mxu1  ;;  %v509_v4 = vmax.f32 %v7128_v44, 0.0  ;;  %v1940_v44 = vmax.f32 %v724_v19, %v728_v31 }
  0xf2   : > { %v470_v46 = vpop.f32.mrf.mxu0 }
  0xf3   : > { %v8383_v52 = vpop.f32.mrf.mxu1  ;;  %v507_v9 = vmax.f32 %v470_v46, 0.0 }
  0xf4   : > { %v1898_v49 = vld [vmem:[#allocation7 + $0x10] ss:$2 sm:$0xff]  ;;  %v1902_v50 = vld [vmem:[#allocation7 + $0x11] ss:$2 sm:$0xff]  ;;  %v7131_v51 = vpop.f32.mrf.mxu0 }
  0xf5   : > { %v512_v54 = vmax.f32 %v7131_v51, 0.0  ;;  %v8385_v55 = vmax.f32 %v1898_v49, %v1902_v50  ;;  %v8387_v59 = vpop.f32.mrf.mxu1 }
  0xf6   : > { %v1896_v56 = vld [vmem:[#allocation7] ss:$2 sm:$0xff]  ;;  %v1900_v57 = vld [vmem:[#allocation7 + $0x1] ss:$2 sm:$0xff]  ;;  %v483_v58 = vpop.f32.mrf.mxu0 }
  0xf7   : > { %v1917_v62 = vmax.f32 %v508_v53, %v512_v54  ;;  %v510_v0 = vmax.f32 %v483_v58, 0.0  ;;  %v1903_v1 = vmax.f32 %v1896_v56, %v1900_v57  ;;  %1906 = vst [vmem:[#allocation3 + $0x8] sm:$0xff] %v8385_v55  ;;  %v8392_v3 = vpop.f32.mrf.mxu1  ;;  %v8459_v54 = vsel %vm8436_vm9, 1.0, %v8073_v63 }
  0xf8   : > { %v7132_v2 = vpop.f32.mrf.mxu0  ;;  %v734_v57 = vmax.f32 %v8381_v47, 0.0  ;;  %v737_v58 = vmax.f32 %v8387_v59, 0.0  ;;  %v731_v47 = vmax.f32 %v8379_v45, 0.0  ;;  %v735_v59 = vmax.f32 %v8392_v3, 0.0 }
  0xf9   : > { %1921 = vst [vmem:[#allocation7 + $0x10] sm:$0xff] %v1917_v62  ;;  %v1915_v5 = vmax.f32 %v506_v61, %v510_v0  ;;  %v513_v6 = vmax.f32 %v7132_v2, 0.0  ;;  %1905 = vst [vmem:[#allocation3] sm:$0xff] %v1903_v1  ;;  %v8394_v8 = vpop.f32.mrf.mxu1  ;;  %v2252_v35 = vmul.f32 %v8408_v20, %v1903_v1 }
  0xfa   : > { %v486_v7 = vpop.f32.mrf.mxu0  ;;  %v738_v43 = vmax.f32 %v8394_v8, 0.0 }
  0xfb   : > { %1919 = vst [vmem:[#allocation7] sm:$0xff] %v1915_v5  ;;  %v1918_v10 = vmax.f32 %v509_v4, %v513_v6  ;;  %v511_v11 = vmax.f32 %v486_v7, 0.0  ;;  %v8401_v13 = vpop.f32.mrf.mxu1  ;;  %v2254_v56 = vadd.f32 %v8434_v38, %v2252_v35  ;;  %v2253_v4 = vmul.f32 %v8408_v20, %v8385_v55 }
  0xfc   : > { %v8399_v12 = vpop.f32.mrf.mxu0  ;;  %v732_v6 = vmax.f32 %v8383_v52, 0.0  ;;  %v736_v7 = vmax.f32 %v8401_v13, 0.0  ;;  %v8499_v55 = vsel %vm2247_vm15, 1.0, %v8073_v63 }
  0xfd   : > { %1922 = vst [vmem:[#allocation7 + $0x18] sm:$0xff] %v1918_v10  ;;  %v1916_v14 = vmax.f32 %v507_v9, %v511_v11  ;;  %v1965_v9 = vmax.f32 %v733_v48, %v737_v58  ;;  %v1966_v10 = vmax.f32 %v734_v57, %v738_v43  ;;  %v950_v22 = vmax.f32 %v8399_v12, 0.0 }
  0xfe   : > { %v8403_v16 = vpop.f32.mrf.mxu0  ;;  %v8405_v18 = vpop.f32.mrf.mxu1  ;;  %v2255_v26 = vadd.f32 %v8434_v38, %v2253_v4  ;;  %v1964_v25 = vmax.f32 %v732_v6, %v736_v7 }
  0xff   : > { %1920 = vst [vmem:[#allocation7 + $0x8] sm:$0xff] %v1916_v14  ;;  %v1963_v14 = vmax.f32 %v731_v47, %v735_v59  ;;  %v948_v31 = vmax.f32 %v8403_v16, 0.0  ;;  %v1175_v35 = vmax.f32 %v8405_v18, 0.0 }
 0x100   : > { %v8414_v27 = vpop.f32.mrf.mxu0  ;;  %v8416_v28 = vpop.f32.mrf.mxu1  ;;  %v2256_v32 = vld [vmem:[#allocation3 + $0x1] sm:$0xff] }
 0x101   : > { %v2258_v41 = vmul.f32 %v8420_v29, %v2256_v32  ;;  %v2262_v0 = vld [vmem:[#allocation3 + $0x2] sm:$0xff]  ;;  %v951_v32 = vmax.f32 %v8414_v27, 0.0  ;;  %v1173_v17 = vmax.f32 %v8416_v28, 0.0 }
 0x102   : > { %v8428_v33 = vpop.f32.mrf.mxu0  ;;  %v8430_v34 = vpop.f32.mrf.mxu1  ;;  %v2264_v8 = vmul.f32 %v8459_v54, %v2262_v0  ;;  %v2268_v52 = vld [vmem:[#allocation3 + $0x3] sm:$0xff] }
 0x103   : > { %v2260_v5 = vadd.f32 %v2258_v41, %v2254_v56  ;;  %v2274_v19 = vld [vmem:[#allocation3 + $0x4] sm:$0xff]  ;;  %v2270_v41 = vmul.f32 %v8496_v60, %v2268_v52  ;;  %v949_v16 = vmax.f32 %v8428_v33, 0.0  ;;  %v1176_v43 = vmax.f32 %v8430_v34, 0.0 }
 0x104   : > { %v1924_v21 = vld [vmem:[#allocation7 + $0x10] ss:$2 sm:$0xff]  ;;  %v1926_v30 = vld [vmem:[#allocation7 + $0x11] ss:$2 sm:$0xff]  ;;  %v8441_v39 = vpop.f32.mrf.mxu0  ;;  %v8443_v40 = vpop.f32.mrf.mxu1  ;;  %v2276_v27 = vmul.f32 %v8499_v55, %v2274_v19 }
 0x105   : > { %1945 = vst [vmem:[#allocation7 + $0x10] sm:$0xff] %v1941_v36  ;;  %1946 = vst [vmem:[#allocation7 + $0x18] sm:$0xff] %v1942_v37  ;;  %v8449_v46 = vmax.f32 %v1924_v21, %v1926_v30  ;;  %v2266_v15 = vadd.f32 %v2264_v8, %v2260_v5  ;;  %v954_v12 = vmax.f32 %v8441_v39, 0.0  ;;  %v1174_v62 = vmax.f32 %v8443_v40, 0.0 }
 0x106   : > { %v1923_v49 = vld [vmem:[#allocation7] ss:$2 sm:$0xff]  ;;  %v1925_v50 = vld [vmem:[#allocation7 + $0x1] ss:$2 sm:$0xff]  ;;  %v8452_v51 = vpop.f32.mrf.mxu0  ;;  %v8454_v53 = vpop.f32.mrf.mxu1 }
 0x107   : > { %1943 = vst [vmem:[#allocation7] sm:$0xff] %v1939_v42  ;;  %1944 = vst [vmem:[#allocation7 + $0x8] sm:$0xff] %v1940_v44  ;;  %v1927_v61 = vmax.f32 %v1923_v49, %v1925_v50  ;;  %v952_v28 = vmax.f32 %v8452_v51, 0.0  ;;  %v1179_v39 = vmax.f32 %v8454_v53, 0.0  ;;  %v2272_v57 = vadd.f32 %v2270_v41, %v2266_v15 }
 0x108   : > { %1930 = vst [vmem:[#allocation3 + $0x18] sm:$0xff] %v8449_v46  ;;  %v8476_v1 = vpop.f32.mrf.mxu0  ;;  %v8478_v2 = vpop.f32.mrf.mxu1  ;;  %v1989_v0 = vmax.f32 %v950_v22, %v954_v12  ;;  %v2293_v4 = vmul.f32 %v8408_v20, %v8449_v46 }
 0x109   : > { %1929 = vst [vmem:[#allocation3 + $0x10] sm:$0xff] %v1927_v61  ;;  %v955_v18 = vmax.f32 %v8476_v1, 0.0  ;;  %v2292_v58 = vmul.f32 %v8408_v20, %v1927_v61  ;;  %v1177_v47 = vmax.f32 %v8478_v2, 0.0  ;;  %v8547_v2 = vmax.f32 %v1175_v35, %v1179_v39 }
 0x10a   : > { %v8488_v45 = vpop.f32.mrf.mxu0  ;;  %v8490_v3 = vpop.f32.mrf.mxu1  ;;  %v2295_v12 = vadd.f32 %v8434_v38, %v2293_v4 }
 0x10b   : > { %v953_v33 = vmax.f32 %v8488_v45, 0.0  ;;  %v1990_v5 = vmax.f32 %v951_v32, %v955_v18  ;;  %v1180_v6 = vmax.f32 %v8490_v3, 0.0  ;;  %v2294_v46 = vadd.f32 %v8434_v38, %v2292_v58 }
 0x10c   : > { %v1948_v11 = vld [vmem:[#allocation7 + $0x10] ss:$2 sm:$0xff]  ;;  %v1950_v13 = vld [vmem:[#allocation7 + $0x11] ss:$2 sm:$0xff]  ;;  %v8502_v23 = vpop.f32.mrf.mxu0  ;;  %v8504_v24 = vpop.f32.mrf.mxu1  ;;  %v8558_v35 = vmax.f32 %v1173_v17, %v1177_v47 }
 0x10d   : > { %1969 = vst [vmem:[#allocation7 + $0x10] sm:$0xff] %v1965_v9  ;;  %1970 = vst [vmem:[#allocation7 + $0x18] sm:$0xff] %v1966_v10  ;;  %v8517_v42 = vmax.f32 %v1948_v11, %v1950_v13  ;;  %v1987_v10 = vmax.f32 %v948_v31, %v952_v28  ;;  %v8551_v13 = vadd.f32 %v2276_v27, %v2272_v57  ;;  %v958_v32 = vmax.f32 %v8502_v23, 0.0 }
 0x10e   : > { %v1947_v36 = vld [vmem:[#allocation7] ss:$2 sm:$0xff]  ;;  %v1949_v37 = vld [vmem:[#allocation7 + $0x1] ss:$2 sm:$0xff]  ;;  %v8512_v21 = vpop.f32.mrf.mxu0  ;;  %v8514_v30 = vpop.f32.mrf.mxu1  ;;  %v1178_v27 = vmax.f32 %v8504_v24, 0.0 }
 0x10f   : > { %1967 = vst [vmem:[#allocation7] sm:$0xff] %v1963_v14  ;;  %1968 = vst [vmem:[#allocation7 + $0x8] sm:$0xff] %v1964_v25  ;;  %v8522_v44 = vmax.f32 %v1947_v36, %v1949_v37  ;;  %v1988_v14 = vmax.f32 %v949_v16, %v953_v33  ;;  %v8563_v16 = vmax.f32 %v1176_v43, %v1180_v6  ;;  %v956_v23 = vmax.f32 %v8512_v21, 0.0 }
 0x110   : > { %v8526_v48 = vpop.f32.mrf.mxu0  ;;  %v8528_v49 = vpop.f32.mrf.mxu1  ;;  %v2257_v50 = vld [vmem:[#allocation3 + $0x9] sm:$0xff]  ;;  %1954 = vst [vmem:[#allocation3 + $0x28] sm:$0xff] %v8517_v42  ;;  %v2296_v53 = vld [vmem:[#allocation3 + $0x11] sm:$0xff] }
 0x111   : > { %v2263_v56 = vld [vmem:[#allocation3 + $0xa] sm:$0xff]  ;;  %v2259_v51 = vmul.f32 %v8420_v29, %v2257_v50  ;;  %1953 = vst [vmem:[#allocation3 + $0x20] sm:$0xff] %v8522_v44  ;;  %v2298_v34 = vmul.f32 %v8420_v29, %v2296_v53  ;;  %v2302_v15 = vld [vmem:[#allocation3 + $0x12] sm:$0xff]  ;;  %v959_v33 = vmax.f32 %v8526_v48, 0.0  ;;  %v2332_v47 = vmul.f32 %v8408_v20, %v8522_v44 }
 0x112   : > { %v8538_v59 = vpop.f32.mrf.mxu0  ;;  %v8540_v1 = vpop.f32.mrf.mxu1  ;;  %v2269_v61 = vld [vmem:[#allocation3 + $0xb] sm:$0xff]  ;;  %v2265_v45 = vmul.f32 %v8459_v54, %v2263_v56  ;;  %v2304_v57 = vmul.f32 %v8459_v54, %v2302_v15 }
 0x113   : > { %v2261_v7 = vadd.f32 %v2259_v51, %v2255_v26  ;;  %v2271_v3 = vmul.f32 %v8496_v60, %v2269_v61  ;;  %v2275_v26 = vld [vmem:[#allocation3 + $0xc] sm:$0xff]  ;;  %v2300_v41 = vadd.f32 %v2298_v34, %v2294_v46  ;;  %v1183_v61 = vmax.f32 %v8514_v30, 0.0 }
 0x114   : > { %v1972_v8 = vld [vmem:[#allocation7 + $0x10] ss:$2 sm:$0xff]  ;;  %v1974_v9 = vld [vmem:[#allocation7 + $0x11] ss:$2 sm:$0xff]  ;;  %v7171_v52 = vpop.f32.mrf.mxu0  ;;  %v8549_v11 = vpop.f32.mrf.mxu1  ;;  %v2277_v50 = vmul.f32 %v8499_v55, %v2275_v26  ;;  %v957_v48 = vmax.f32 %v8538_v59, 0.0 }
 0x115   : > { %1993 = vst [vmem:[#allocation7 + $0x10] sm:$0xff] %v1989_v0  ;;  %1994 = vst [vmem:[#allocation7 + $0x18] sm:$0xff] %v1990_v5  ;;  %v2267_v22 = vadd.f32 %v2265_v45, %v2261_v7  ;;  %v8555_v19 = vmax.f32 %v1972_v8, %v1974_v9  ;;  %v962_v18 = vmax.f32 %v7171_v52, 0.0  ;;  %v2308_v0 = vld [vmem:[#allocation3 + $0x13] sm:$0xff]  ;;  %v2306_v6 = vadd.f32 %v2304_v57, %v2300_v41 }
 0x116   : > { %v1971_v25 = vld [vmem:[#allocation7] ss:$2 sm:$0xff]  ;;  %v1973_v31 = vld [vmem:[#allocation7 + $0x1] ss:$2 sm:$0xff]  ;;  %v933_v36 = vpop.f32.mrf.mxu0  ;;  %v8560_v37 = vpop.f32.mrf.mxu1  ;;  %v2310_v59 = vmul.f32 %v8496_v60, %v2308_v0  ;;  %v2334_v41 = vadd.f32 %v8434_v38, %v2332_v47 }
 0x117   : > { %1991 = vst [vmem:[#allocation7] sm:$0xff] %v1987_v10  ;;  %1992 = vst [vmem:[#allocation7 + $0x8] sm:$0xff] %v1988_v14  ;;  %v2273_v28 = vadd.f32 %v2271_v3, %v2267_v22  ;;  %v8572_v58 = vmax.f32 %v1971_v25, %v1973_v31  ;;  %v960_v43 = vmax.f32 %v933_v36, 0.0  ;;  %v2013_v7 = vmax.f32 %v958_v32, %v962_v18  ;;  %v2314_v10 = vld [vmem:[#allocation3 + $0x14] sm:$0xff] }
 0x118   : > { %1978 = vst [vmem:[#allocation3 + $0x38] sm:$0xff] %v8555_v19  ;;  %v7172_v17 = vpop.f32.mrf.mxu0  ;;  %v8568_v39 = vpop.f32.mrf.mxu1  ;;  %v2297_v56 = vld [vmem:[#allocation3 + $0x19] sm:$0xff]  ;;  %v2336_v52 = vld [vmem:[#allocation3 + $0x21] sm:$0xff]  ;;  %v2333_v36 = vmul.f32 %v8408_v20, %v8517_v42  ;;  %v1181_v42 = vmax.f32 %v8528_v49, 0.0 }
 0x119   : > { %v963_v51 = vmax.f32 %v7172_v17, 0.0  ;;  %v2303_v53 = vld [vmem:[#allocation3 + $0x1a] sm:$0xff]  ;;  %v2279_v4 = vadd.f32 %v2277_v50, %v2273_v28  ;;  %v2299_v5 = vmul.f32 %v8420_v29, %v2297_v56  ;;  %1977 = vst [vmem:[#allocation3 + $0x30] sm:$0xff] %v8572_v58  ;;  %v2011_v31 = vmax.f32 %v956_v23, %v960_v43  ;;  %v2342_v18 = vld [vmem:[#allocation3 + $0x22] sm:$0xff] }
 0x11a   : > { %v936_v21 = vpop.f32.mrf.mxu0  ;;  %v8578_v34 = vpop.f32.mrf.mxu1  ;;  %v2309_v9 = vld [vmem:[#allocation3 + $0x1b] sm:$0xff]  ;;  %v2305_v15 = vmul.f32 %v8459_v54, %v2303_v53  ;;  %v2312_v56 = vadd.f32 %v2310_v59, %v2306_v6  ;;  %v2338_v23 = vmul.f32 %v8420_v29, %v2336_v52  ;;  %v2316_v43 = vmul.f32 %v8499_v55, %v2314_v10 }
 0x11b   : > { %v2014_v45 = vmax.f32 %v959_v33, %v963_v51  ;;  %v961_v8 = vmax.f32 %v936_v21, 0.0  ;;  %v6790_v22 = vpack.c.bf16 %v2279_v4, %v8551_v13  ;;  %v2301_v26 = vadd.f32 %v2299_v5, %v2295_v12  ;;  %v2315_v25 = vld [vmem:[#allocation3 + $0x1c] sm:$0xff] }
 0x11c   : > { %v1996_v44 = vld [vmem:[#allocation7 + $0x10] ss:$2 sm:$0xff]  ;;  %v1998_v46 = vld [vmem:[#allocation7 + $0x11] ss:$2 sm:$0xff]  ;;  %v8583_v14 = vpop.f32.mrf.mxu0  ;;  %v8586_v3 = vpop.f32.mrf.mxu1  ;;  %v2311_v50 = vmul.f32 %v8496_v60, %v2309_v9  ;;  %v1184_v33 = vmax.f32 %v8540_v1, 0.0  ;;  %v2317_v51 = vmul.f32 %v8499_v55, %v2315_v25  ;;  %v2340_v21 = vadd.f32 %v2338_v23, %v2334_v41 }
 0x11d   : > { %2017 = vst [vmem:[#allocation7 + $0x10] sm:$0xff] %v2013_v7  ;;  %2018 = vst [vmem:[#allocation7 + $0x18] sm:$0xff] %v2014_v45  ;;  %v2012_v32 = vmax.f32 %v957_v48, %v961_v8  ;;  %v2307_v12 = vadd.f32 %v2305_v15, %v2301_v26  ;;  %v2344_v4 = vmul.f32 %v8459_v54, %v2342_v18  ;;  %v1187_v6 = vmax.f32 %v8560_v37, 0.0  ;;  %v2348_v45 = vld [vmem:[#allocation3 + $0x23] sm:$0xff]  ;;  %v7874_v26 = vld [vmem:[%s9766_s2 + $0x58] sm:$0xff]  }
 0x11e   : > { %v1995_v13 = vld [vmem:[#allocation7] ss:$2 sm:$0xff]  ;;  %v1997_v28 = vld [vmem:[#allocation7 + $0x1] ss:$2 sm:$0xff]  ;;  %v8593_v17 = vpop.f32.mrf.mxu0  ;;  %6791 = vst [vmem:[#allocation4] sm:$0xff] %v6790_v22   ;;  %v8596_v57 = vpop.f32.mrf.mxu1  ;;  %v2335_v49 = vadd.f32 %v8434_v38, %v2333_v36  ;;  %v2372_v8 = vmul.f32 %v8408_v20, %v8572_v58  ;;  %v8614_v9 = vmax.f32 %v1996_v44, %v1998_v46  ;;  %v2318_v52 = vadd.f32 %v2316_v43, %v2312_v56 }
 0x11f   : > { %2015 = vst [vmem:[#allocation7] sm:$0xff] %v2011_v31  ;;  %2016 = vst [vmem:[#allocation7 + $0x8] sm:$0xff] %v2012_v32  ;;  %v2313_v0 = vadd.f32 %v2311_v50, %v2307_v12  ;;  %v8608_v5 = vmax.f32 %v1995_v13, %v1997_v28  ;;  %v2346_v59 = vadd.f32 %v2344_v4, %v2340_v21  ;;  %v1182_v44 = vmax.f32 %v8549_v11, 0.0  ;;  %v2354_v36 = vld [vmem:[#allocation3 + $0x24] sm:$0xff] }
 0x120   : > { %v8603_v53 = vpop.f32.mrf.mxu0  ;;  %v8605_v47 = vpop.f32.mrf.mxu1  ;;  %v2337_v48 = vld [vmem:[#allocation3 + $0x29] sm:$0xff]  ;;  %v2376_v25 = vld [vmem:[#allocation3 + $0x31] sm:$0xff]  ;;  %v2036_v58 = vmax.f32 %v1174_v62, %v1178_v27  ;;  %v1185_v46 = vmax.f32 %v8568_v39, 0.0  ;;  %v1188_v31 = vmax.f32 %v8578_v34, 0.0  ;;  %2002 = vst [vmem:[#allocation3 + $0x48] sm:$0xff] %v8614_v9  ;;  %v2350_v11 = vmul.f32 %v8496_v60, %v2348_v45 }
 0x121   : > { %v2343_v7 = vld [vmem:[#allocation3 + $0x2a] sm:$0xff]  ;;  %v2319_v22 = vadd.f32 %v2317_v51, %v2313_v0  ;;  %v2339_v37 = vmul.f32 %v8420_v29, %v2337_v48  ;;  %2001 = vst [vmem:[#allocation3 + $0x40] sm:$0xff] %v8608_v5  ;;  %v2382_v39 = vld [vmem:[#allocation3 + $0x32] sm:$0xff]  ;;  %v1186_v12 = vmax.f32 %v8586_v3, 0.0  ;;  %v2373_v50 = vmul.f32 %v8408_v20, %v8555_v19 }
 0x122   : > { %v8616_v10 = vpop.f32.mrf.mxu0  ;;  %v8621_v15 = vpop.f32.mrf.mxu1  ;;  %v2349_v32 = vld [vmem:[#allocation3 + $0x2b] sm:$0xff]  ;;  %v2345_v62 = vmul.f32 %v8459_v54, %v2343_v7  ;;  %v2374_v56 = vadd.f32 %v8434_v38, %v2372_v8  ;;  %v2378_v23 = vmul.f32 %v8420_v29, %v2376_v25  ;;  %v2061_v0 = vmax.f32 %v1183_v61, %v1187_v6  ;;  %v8676_v25 = vld [vmem:[#allocation3 + $0xe0] sm:$0xff] }
 0x123   : > { %v2355_v41 = vld [vmem:[#allocation3 + $0x2c] sm:$0xff]  ;;  %v6795_v24 = vpack.c.bf16 %v2319_v22, %v2318_v52  ;;  %v2341_v40 = vadd.f32 %v2339_v37, %v2335_v49  ;;  %v2352_v4 = vadd.f32 %v2350_v11, %v2346_v59  ;;  %v2059_v19 = vmax.f32 %v1181_v42, %v1185_v46 }
 0x124   : > { %v8633_v18 = vld [vmem:[#allocation7 + $0x10] ss:$2 sm:$0xff]  ;;  %v8635_v13 = vld [vmem:[#allocation7 + $0x11] ss:$2 sm:$0xff]  ;;  %v8637_v28 = vpop.f32.mrf.mxu0  ;;  %v8641_v27 = vpop.f32.mrf.mxu1  ;;  %v2356_v49 = vmul.f32 %v8499_v55, %v2354_v36  ;;  %v2357_v30 = vmul.f32 %v8499_v55, %v2355_v41  ;;  %v2380_v61 = vadd.f32 %v2378_v23, %v2374_v56  ;;  %v1400_v6 = vmax.f32 %v8583_v14, 0.0 }
 0x125   : > { %2041 = vst [vmem:[#allocation7 + $0x10] sm:$0xff] %v8547_v2  ;;  %2042 = vst [vmem:[#allocation7 + $0x18] sm:$0xff] %v8563_v16  ;;  %v7871_v34 = vld [vmem:[#allocation4] sm:$0xff]   ;;  %v2347_v2 = vadd.f32 %v2345_v62, %v2341_v40  ;;  %v2351_v16 = vmul.f32 %v8496_v60, %v2349_v32  ;;  %v7878_v42 = vld [vmem:[%s9766_s2 + $0x50] sm:$0xff]   ;;  %v1398_v8 = vmax.f32 %v8593_v17, 0.0  ;;  %v2062_v52 = vmax.f32 %v1184_v33, %v1188_v31 }
 0x126   : > { %v2019_v43 = vld [vmem:[#allocation7] ss:$2 sm:$0xff]  ;;  %v2021_v51 = vld [vmem:[#allocation7 + $0x1] ss:$2 sm:$0xff]  ;;  %v8652_v21 = vpop.f32.mrf.mxu0  ;;  %6857 = vst [vmem:[#allocation4 + $0x8] sm:$0xff] %v6795_v24   ;;  %v8655_v3 = vpop.f32.mrf.mxu1  ;;  %7286 = vmatmul.mubr.msk.bf16.vlgmr.msra.gmra.mxu0 %vm2878_vm2, %v7871_v34  ;;  %v2060_v22 = vmax.f32 %v1182_v44, %v1186_v12  ;;  %v2375_v37 = vadd.f32 %v8434_v38, %v2373_v50  ;;  %v2358_v46 = vadd.f32 %v2356_v49, %v2352_v4  ;;  %v2394_v33 = vld [vmem:[#allocation3 + $0x34] sm:$0xff] }
 0x127   : > { %2039 = vst [vmem:[#allocation7] sm:$0xff] %v8558_v35  ;;  %2040 = vst [vmem:[#allocation7 + $0x8] sm:$0xff] %v2036_v58  ;;  %7289 = vmatprep.mubr.msk.bf16.mxu0 %vm8074_vm1, %v8073_v63  ;;  %7332 = vmatpush3.bf16.msra.mxu0 %v7874_v26  ;;  %v2353_v7 = vadd.f32 %v2351_v16, %v2347_v2  ;;  %v2384_v35 = vmul.f32 %v8459_v54, %v2382_v39  ;;  %v2388_v26 = vld [vmem:[#allocation3 + $0x33] sm:$0xff]  ;;  %v1401_v44 = vmax.f32 %v8603_v53, 0.0  ;;  %v7873_v40 = vld [vmem:[%s9766_s2 + $0x40] sm:$0xff]  }
 0x128   : > { %v8662_v48 = vpop.f32.mrf.mxu0  ;;  %v8670_v45 = vmax.f32 %v2019_v43, %v2021_v51  ;;  %v2377_v59 = vld [vmem:[#allocation3 + $0x39] sm:$0xff]  ;;  %7333 = vmatprep.subr.bf16.mxu0 %v8676_v25  ;;  %v8681_v36 = vpop.f32.mrf.mxu1  ;;  %v1399_v31 = vmax.f32 %v8616_v10, 0.0  ;;  %v1404_v24 = vmax.f32 %v8637_v28, 0.0  ;;  %v2412_v39 = vmul.f32 %v8408_v20, %v8608_v5  ;;  %v2416_v43 = vld [vmem:[#allocation3 + $0x41] sm:$0xff] }
 0x129   : > { %v2383_v63 = vld [vmem:[#allocation3 + $0x3a] sm:$0xff]  ;;  %v2359_v32 = vadd.f32 %v2357_v30, %v2353_v7  ;;  %v2379_v41 = vmul.f32 %v8420_v29, %v2377_v59  ;;  %v2386_v1 = vadd.f32 %v2384_v35, %v2380_v61  ;;  %v2390_v28 = vmul.f32 %v8496_v60, %v2388_v26  ;;  %v7881_v51 = vld [vmem:[%s9766_s2 + $0x48] sm:$0xff]  }
 0x12a   : > { %v8679_v58 = vpop.f32.mrf.mxu0  ;;  %2025 = vst [vmem:[#allocation3 + $0x50] sm:$0xff] %v8670_v45  ;;  %v2389_v62 = vld [vmem:[#allocation3 + $0x3b] sm:$0xff]  ;;  %v2385_v23 = vmul.f32 %v8459_v54, %v2383_v63  ;;  %v1405_v5 = vmax.f32 %v8662_v48, 0.0  ;;  %v2396_v16 = vmul.f32 %v8499_v55, %v2394_v33  ;;  %v8709_v61 = vpop.f32.mrf.mxu1  ;;  %v2414_v59 = vadd.f32 %v8434_v38, %v2412_v39 }
 0x12b   : > { %v2395_v11 = vld [vmem:[#allocation3 + $0x3c] sm:$0xff]  ;;  %v6800_v53 = vpack.c.bf16 %v2359_v32, %v2358_v46  ;;  %v2381_v56 = vadd.f32 %v2379_v41, %v2375_v37  ;;  %7334 = vmatpush3.bf16.msra.mxu0 %v7878_v42  ;;  %v2391_v35 = vmul.f32 %v8496_v60, %v2389_v62  ;;  %v2392_v42 = vadd.f32 %v2390_v28, %v2386_v1  ;;  %v2434_v28 = vld [vmem:[#allocation3 + $0x44] sm:$0xff] }
 0x12c   : > { %v8693_v34 = vld [vmem:[#allocation7 + $0x10] ss:$2 sm:$0xff]  ;;  %v8695_v12 = vld [vmem:[#allocation7 + $0x11] ss:$2 sm:$0xff]  ;;  %v8697_v50 = vpop.f32.mrf.mxu0  ;;  %7335 = vmatprep.subr.bf16.mxu0 %v8676_v25  ;;  %v2422_v48 = vld [vmem:[#allocation3 + $0x42] sm:$0xff]  ;;  %v1403_v37 = vmax.f32 %v8679_v58, 0.0  ;;  %v2418_v63 = vmul.f32 %v8420_v29, %v2416_v43  ;;  %v2085_v26 = vmax.f32 %v1400_v6, %v1404_v24 }
 0x12d   : > { %2065 = vst [vmem:[#allocation7 + $0x10] sm:$0xff] %v2061_v0  ;;  %2066 = vst [vmem:[#allocation7 + $0x18] sm:$0xff] %v2062_v52  ;;  %v7872_v2 = vld [vmem:[#allocation4 + $0x8] sm:$0xff]   ;;  %v2387_v7 = vadd.f32 %v2385_v23, %v2381_v56  ;;  %v2413_v0 = vmul.f32 %v8408_v20, %v8614_v9  ;;  %v1402_v52 = vmax.f32 %v8652_v21, 0.0  ;;  %v7876_v9 = vld [vmem:[%s9766_s2 + $0x38] sm:$0xff]   ;;  %v2424_v32 = vmul.f32 %v8459_v54, %v2422_v48 }
 0x12e   : > { %v2043_v4 = vld [vmem:[#allocation7] ss:$2 sm:$0xff]  ;;  %v2045_v49 = vld [vmem:[#allocation7 + $0x1] ss:$2 sm:$0xff]  ;;  %v8707_v30 = vpop.f32.mrf.mxu0  ;;  %6858 = vst [vmem:[#allocation4 + $0x10] sm:$0xff] %v6800_v53   ;;  %7260 = vmatmul.mubr.msk.bf16.vlgmr.msra.gmra.mxu1 %vm2878_vm2, %v7872_v2  ;;  %7290 = vmatmul.mubr.msk.bf16.gmra.mxu0 %vm2878_vm2, %v7872_v2  ;;  %v2420_v6 = vadd.f32 %v2418_v63, %v2414_v59  ;;  %v2398_v33 = vadd.f32 %v2396_v16, %v2392_v42  ;;  %v1408_v53 = vmax.f32 %v8697_v50, 0.0 }
 0x12f   : > { %2063 = vst [vmem:[#allocation7] sm:$0xff] %v2059_v19  ;;  %2064 = vst [vmem:[#allocation7 + $0x8] sm:$0xff] %v2060_v22  ;;  %7306 = vmatpush3.bf16.msra.mxu1 %v7873_v40  ;;  %7263 = vmatprep.mubr.msk.bf16.mxu1 %vm8074_vm1, %v8676_v25  ;;  %v2393_v21 = vadd.f32 %v2391_v35, %v2387_v7  ;;  %v2397_v19 = vmul.f32 %v8499_v55, %v2395_v11  ;;  %v2428_v41 = vld [vmem:[#allocation3 + $0x43] sm:$0xff]  ;;  %v8736_v40 = vpop.f32.mrf.mxu1  ;;  %v7880_v43 = vld [vmem:[%s9766_s2 + $0x30] sm:$0xff]  }
 0x130   : > { %v8722_v46 = vpop.f32.mrf.mxu0  ;;  %v2086_v22 = vmax.f32 %v1401_v44, %v1405_v5  ;;  %7293 = vmatprep.mubr.msk.bf16.mxu0 %vm8074_vm1, %v8676_v25  ;;  %7307 = vmatprep.subr.bf16.mxu1 %v8676_v25  ;;  %v2415_v62 = vadd.f32 %v8434_v38, %v2413_v0  ;;  %v2083_v11 = vmax.f32 %v1398_v8, %v1402_v52 }
 0x131   : > { %v2417_v14 = vld [vmem:[#allocation3 + $0x49] sm:$0xff]  ;;  %v2399_v24 = vadd.f32 %v2397_v19, %v2393_v21  ;;  %7336 = vmatpush3.bf16.msra.mxu0 %v7881_v51  ;;  %v2084_v39 = vmax.f32 %v1399_v31, %v1403_v37  ;;  %v2426_v56 = vadd.f32 %v2424_v32, %v2420_v6  ;;  %v2430_v10 = vmul.f32 %v8496_v60, %v2428_v41  ;;  %v8756_v37 = vpop.f32.mrf.mxu1 }
 0x132   : > { %v2423_v58 = vld [vmem:[#allocation3 + $0x4a] sm:$0xff]  ;;  %v8734_v1 = vpop.f32.mrf.mxu0  ;;  %v2419_v44 = vmul.f32 %v8420_v29, %v2417_v14  ;;  %7383 = vmatprep.subr.bf16.mxu0 %v8676_v25  ;;  %v2024_v35 = vmax.f32 %v8633_v18, %v8635_v13  ;;  %v2047_v42 = vmax.f32 %v2043_v4, %v2045_v49  ;;  %v8761_v21 = vmax.f32 %v8693_v34, %v8695_v12 }
 0x133   : > { %v2429_v23 = vld [vmem:[#allocation3 + $0x4b] sm:$0xff]  ;;  %7308 = vmatpush3.bf16.msra.mxu1 %v7876_v9  ;;  %v6805_v51 = vpack.c.bf16 %v2399_v24, %v2398_v33  ;;  %v2425_v17 = vmul.f32 %v8459_v54, %v2423_v58  ;;  %v2432_v9 = vadd.f32 %v2430_v10, %v2426_v56  ;;  %v1409_v18 = vmax.f32 %v8722_v46, 0.0  ;;  %v8775_v19 = vpop.f32.mrf.mxu1 }
 0x134   : > { %v7211_v5 = vpop.f32.mrf.mxu0  ;;  %v2421_v2 = vadd.f32 %v2419_v44, %v2415_v62  ;;  %v2435_v8 = vld [vmem:[#allocation3 + $0x4c] sm:$0xff]  ;;  %7309 = vmatprep.subr.bf16.mxu1 %v8676_v25  ;;  %v2431_v63 = vmul.f32 %v8496_v60, %v2429_v23  ;;  %2026 = vst [vmem:[#allocation3 + $0x58] sm:$0xff] %v2024_v35  ;;  %2049 = vst [vmem:[#allocation3 + $0x60] sm:$0xff] %v2047_v42  ;;  %v2436_v34 = vmul.f32 %v8499_v55, %v2434_v28 }
 0x135   : > { %v2068_v31 = vld [vmem:[#allocation7 + $0x10] ss:$2 sm:$0xff]  ;;  %v2070_v50 = vld [vmem:[#allocation7 + $0x11] ss:$2 sm:$0xff]  ;;  %v1412_v16 = vmax.f32 %v7211_v5, 0.0  ;;  %6859 = vst [vmem:[#allocation4 + $0x18] sm:$0xff] %v6805_v51   ;;  %v2437_v12 = vmul.f32 %v8499_v55, %v2435_v8  ;;  %v2452_v6 = vmul.f32 %v8408_v20, %v8670_v45  ;;  %v2453_v33 = vmul.f32 %v8408_v20, %v2024_v35  ;;  %v8793_v28 = vpop.f32.mrf.mxu1 }
 0x136   : > { %v7875_v7 = vld [vmem:[#allocation4 + $0x10] sm:$0xff]   ;;  %2089 = vst [vmem:[#allocation7 + $0x10] sm:$0xff] %v2085_v26  ;;  %2090 = vst [vmem:[#allocation7 + $0x18] sm:$0xff] %v2086_v22  ;;  %v2067_v0 = vld [vmem:[#allocation7] ss:$2 sm:$0xff]  ;;  %v8754_v52 = vpop.f32.mrf.mxu0  ;;  %v2427_v59 = vadd.f32 %v2425_v17, %v2421_v2  ;;  %v2438_v22 = vadd.f32 %v2436_v34, %v2432_v9  ;;  %v1625_v32 = vmax.f32 %v8596_v57, 0.0  ;;  %v2492_v17 = vmul.f32 %v8408_v20, %v2047_v42 }
 0x137   : > { %v2069_v48 = vld [vmem:[#allocation7 + $0x1] ss:$2 sm:$0xff]  ;;  %7264 = vmatmul.mubr.msk.bf16.gmra.mxu1 %vm2878_vm2, %v7875_v7  ;;  %7294 = vmatmul.mubr.msk.bf16.gmra.mxu0 %vm2878_vm2, %v7875_v7  ;;  %2050 = vst [vmem:[#allocation3 + $0x68] sm:$0xff] %v8761_v21  ;;  %v2109_v49 = vmax.f32 %v1408_v53, %v1412_v16  ;;  %v1623_v24 = vmax.f32 %v8605_v47, 0.0  ;;  %v1629_v62 = vmax.f32 %v8655_v3, 0.0  ;;  %v1406_v56 = vmax.f32 %v8707_v30, 0.0  ;;  %v8824_v34 = vpop.f32.mrf.mxu1 }
 0x138   : > { %2087 = vst [vmem:[#allocation7] sm:$0xff] %v2083_v11  ;;  %2088 = vst [vmem:[#allocation7 + $0x8] sm:$0xff] %v2084_v39  ;;  %v7212_v13 = vpop.f32.mrf.mxu0  ;;  %7267 = vmatprep.mubr.msk.bf16.mxu1 %vm8074_vm1, %v8676_v25  ;;  %7297 = vmatprep.mubr.msk.bf16.mxu0 %vm8074_vm1, %v8676_v25  ;;  %v2433_v4 = vadd.f32 %v2431_v63, %v2427_v59  ;;  %v8780_v58 = vmax.f32 %v2067_v0, %v2069_v48  ;;  %v1410_v57 = vmax.f32 %v8754_v52, 0.0 }
 0x139   : > { %v1413_v26 = vmax.f32 %v7212_v13, 0.0  ;;  %7310 = vmatpush3.bf16.msra.mxu1 %v7880_v43  ;;  %v8789_v39 = vmax.f32 %v2068_v31, %v2070_v50  ;;  %v2454_v3 = vadd.f32 %v8434_v38, %v2452_v6  ;;  %v1626_v10 = vmax.f32 %v8621_v15, 0.0 }
 0x13a   : > { %v8773_v46 = vpop.f32.mrf.mxu0  ;;  %v2439_v14 = vadd.f32 %v2437_v12, %v2433_v4  ;;  %7357 = vmatprep.subr.bf16.mxu1 %v8676_v25  ;;  %2073 = vst [vmem:[#allocation3 + $0x70] sm:$0xff] %v8780_v58  ;;  %v2455_v8 = vadd.f32 %v8434_v38, %v2453_v33  ;;  %v1407_v35 = vmax.f32 %v8734_v1, 0.0  ;;  %v8810_v0 = vmax.f32 %v1625_v32, %v1629_v62 }
 0x13b   : > { %v2110_v41 = vmax.f32 %v1409_v18, %v1413_v26  ;;  %v2456_v43 = vld [vmem:[#allocation3 + $0x51] sm:$0xff]  ;;  %v2457_v5 = vld [vmem:[#allocation3 + $0x59] sm:$0xff]  ;;  %2074 = vst [vmem:[#allocation3 + $0x78] sm:$0xff] %v8789_v39  ;;  %v1411_v42 = vmax.f32 %v8773_v46, 0.0  ;;  %v2493_v52 = vmul.f32 %v8408_v20, %v8761_v21  ;;  %v2107_v13 = vmax.f32 %v1406_v56, %v1410_v57 }
 0x13c   : > { %v6810_v44 = vpack.c.bf16 %v2439_v14, %v2438_v22  ;;  %v8786_v11 = vpop.f32.mrf.mxu0  ;;  %v7877_v23 = vld [vmem:[#allocation4 + $0x18] sm:$0xff]   ;;  %v2462_v51 = vld [vmem:[#allocation3 + $0x52] sm:$0xff]  ;;  %v2458_v31 = vmul.f32 %v8420_v29, %v2456_v43  ;;  %v2459_v50 = vmul.f32 %v8420_v29, %v2457_v5  ;;  %v1630_v4 = vmax.f32 %v8709_v61, 0.0 }
 0x13d   : > { %v2092_v45 = vld [vmem:[#allocation7 + $0x10] ss:$2 sm:$0xff]  ;;  %v2094_v53 = vld [vmem:[#allocation7 + $0x11] ss:$2 sm:$0xff]  ;;  %v2464_v63 = vmul.f32 %v8459_v54, %v2462_v51  ;;  %v2494_v21 = vadd.f32 %v8434_v38, %v2492_v17  ;;  %v2108_v61 = vmax.f32 %v1407_v35, %v1411_v42  ;;  %v1633_v47 = vmax.f32 %v8756_v37, 0.0 }
 0x13e   : > { %2113 = vst [vmem:[#allocation7 + $0x10] sm:$0xff] %v2109_v49  ;;  %2114 = vst [vmem:[#allocation7 + $0x18] sm:$0xff] %v2110_v41  ;;  %v8796_v2 = vpop.f32.mrf.mxu0  ;;  %v8800_v30 = vmax.f32 %v2092_v45, %v2094_v53  ;;  %v2463_v16 = vld [vmem:[#allocation3 + $0x5a] sm:$0xff]  ;;  %v2460_v59 = vadd.f32 %v2458_v31, %v2454_v3  ;;  %v2461_v1 = vadd.f32 %v2459_v50, %v2455_v8  ;;  %v2502_v33 = vld [vmem:[#allocation3 + $0x62] sm:$0xff]  ;;  %v8838_v31 = vpop.f32.mrf.mxu1 }
 0x13f   : > { %6860 = vst [vmem:[#allocation4 + $0x20] sm:$0xff] %v6810_v44   ;;  %7268 = vmatmul.mubr.msk.bf16.gmra.mxu1 %vm2878_vm2, %v7877_v23  ;;  %7298 = vmatmul.mubr.msk.bf16.gmra.mxu0 %vm2878_vm2, %v7877_v23  ;;  %v2468_v7 = vld [vmem:[#allocation3 + $0x53] sm:$0xff]  ;;  %v2469_v15 = vld [vmem:[#allocation3 + $0x5b] sm:$0xff]  ;;  %v2465_v9 = vmul.f32 %v8459_v54, %v2463_v16  ;;  %v2495_v53 = vadd.f32 %v8434_v38, %v2493_v52  ;;  %v2508_v23 = vld [vmem:[#allocation3 + $0x63] sm:$0xff] }
 0x140   : > { %7271 = vmatprep.mubr.msk.bf16.mxu1 %vm8074_vm1, %v8676_v25  ;;  %7301 = vmatprep.mubr.msk.bf16.mxu0 %vm8074_vm1, %v8676_v25  ;;  %v8816_v48 = vpop.f32.mrf.mxu0  ;;  %2098 = vst [vmem:[#allocation3 + $0x88] sm:$0xff] %v8800_v30  ;;  %v2474_v18 = vld [vmem:[#allocation3 + $0x54] sm:$0xff]  ;;  %v2470_v12 = vmul.f32 %v8496_v60, %v2468_v7  ;;  %v2475_v49 = vld [vmem:[#allocation3 + $0x5c] sm:$0xff]  ;;  %v2466_v22 = vadd.f32 %v2464_v63, %v2460_v59  ;;  %v2514_v42 = vld [vmem:[#allocation3 + $0x64] sm:$0xff] }
 0x141   : > { %v2496_v46 = vld [vmem:[#allocation3 + $0x61] sm:$0xff]  ;;  %v2467_v14 = vadd.f32 %v2465_v9, %v2461_v1  ;;  %v2471_v6 = vmul.f32 %v8496_v60, %v2469_v15  ;;  %v2497_v32 = vld [vmem:[#allocation3 + $0x69] sm:$0xff]  ;;  %v2476_v44 = vmul.f32 %v8499_v55, %v2474_v18  ;;  %v2477_v51 = vmul.f32 %v8499_v55, %v2475_v49 }
 0x142   : > { %v8827_v26 = vpop.f32.mrf.mxu0  ;;  %v2498_v41 = vmul.f32 %v8420_v29, %v2496_v46  ;;  %v2503_v62 = vld [vmem:[#allocation3 + $0x6a] sm:$0xff]  ;;  %v2499_v56 = vmul.f32 %v8420_v29, %v2497_v32  ;;  %v2472_v43 = vadd.f32 %v2470_v12, %v2466_v22  ;;  %v2134_v8 = vmax.f32 %v1626_v10, %v1630_v4 }
 0x143   : > { %v2509_v57 = vld [vmem:[#allocation3 + $0x6b] sm:$0xff]  ;;  %v2473_v5 = vadd.f32 %v2471_v6, %v2467_v14  ;;  %v2504_v7 = vmul.f32 %v8459_v54, %v2502_v33  ;;  %v2505_v35 = vmul.f32 %v8459_v54, %v2503_v62  ;;  %v1624_v15 = vmax.f32 %v8641_v27, 0.0  ;;  %v8860_v14 = vpop.f32.mrf.mxu1 }
 0x144   : > { %v8833_v45 = vpop.f32.mrf.mxu0  ;;  %v2500_v17 = vadd.f32 %v2498_v41, %v2494_v21  ;;  %v2501_v16 = vadd.f32 %v2499_v56, %v2495_v53  ;;  %v2478_v52 = vadd.f32 %v2476_v44, %v2472_v43  ;;  %v2510_v10 = vmul.f32 %v8496_v60, %v2508_v23  ;;  %v2515_v4 = vld [vmem:[#allocation3 + $0x6c] sm:$0xff] }
 0x145   : > { %v2479_v59 = vadd.f32 %v2477_v51, %v2473_v5  ;;  %v1627_v1 = vmax.f32 %v8681_v36, 0.0  ;;  %v2511_v18 = vmul.f32 %v8496_v60, %v2509_v57  ;;  %v2091_v12 = vld [vmem:[#allocation7] ss:$2 sm:$0xff]  ;;  %v2093_v49 = vld [vmem:[#allocation7 + $0x1] ss:$2 sm:$0xff]  ;;  %v1628_v21 = vmax.f32 %v8736_v40, 0.0  ;;  %v7232_v5 = vpop.f32.mrf.mxu1 }
 0x146   : > { %v7879_v3 = vld [vmem:[#allocation4 + $0x20] sm:$0xff]   ;;  %v8840_v50 = vpop.f32.mrf.mxu0  ;;  %v2506_v9 = vadd.f32 %v2504_v7, %v2500_v17  ;;  %v2507_v27 = vadd.f32 %v2505_v35, %v2501_v16  ;;  %v2516_v36 = vmul.f32 %v8499_v55, %v2514_v42  ;;  %v2532_v22 = vmul.f32 %v8408_v20, %v8780_v58  ;;  %2111 = vst [vmem:[#allocation7] sm:$0xff] %v2107_v13  ;;  %v2536_v44 = vld [vmem:[#allocation3 + $0x71] sm:$0xff]  ;;  %v7883_v57 = vld [vmem:[#allocation4 + $0x18] sm:$0xff]  }
 0x147   : > { %7272 = vmatmul.mubr.msk.bf16.gmra.mxu1 %vm2878_vm2, %v7879_v3  ;;  %7302 = vmatmul.mubr.msk.bf16.gmra.mxu0 %vm2878_vm2, %v7879_v3  ;;  %v6815_v46 = vpack.c.bf16 %v2479_v59, %v2478_v52  ;;  %2112 = vst [vmem:[#allocation7 + $0x8] sm:$0xff] %v2108_v61  ;;  %v2517_v41 = vmul.f32 %v8499_v55, %v2515_v4  ;;  %v2116_v40 = vld [vmem:[#allocation7 + $0x10] ss:$2 sm:$0xff]  ;;  %v2118_v53 = vld [vmem:[#allocation7 + $0x11] ss:$2 sm:$0xff]  ;;  %v7887_v56 = vld [vmem:[%s9766_s2 + $0x28] sm:$0xff]  }
 0x148   : > { %7275 = vmatprep.mubr.msk.bf16.mxu1 %vm8074_vm1, %v8676_v25  ;;  %7337 = vmatprep.mubr.msk.bf16.mxu0 %vm8074_vm1, %v8676_v25  ;;  %v8853_v63 = vpop.f32.mrf.mxu0  ;;  %v2512_v6 = vadd.f32 %v2510_v10, %v2506_v9  ;;  %v2513_v32 = vadd.f32 %v2511_v18, %v2507_v27  ;;  %v2095_v33 = vmax.f32 %v2091_v12, %v2093_v49  ;;  %v2542_v7 = vld [vmem:[#allocation3 + $0x72] sm:$0xff]  ;;  %v1631_v35 = vmax.f32 %v8775_v19, 0.0  ;;  %v7885_v4 = vld [vmem:[#allocation4 + $0x20] sm:$0xff]  }
 0x149   : > { %6861 = vst [vmem:[#allocation4 + $0x28] sm:$0xff] %v6815_v46   ;;  %2137 = vst [vmem:[#allocation7 + $0x10] sm:$0xff] %v8810_v0  ;;  %v2131_v61 = vmax.f32 %v1623_v24, %v1627_v1  ;;  %v2132_v23 = vmax.f32 %v1624_v15, %v1628_v21  ;;  %v8873_v43 = vmax.f32 %v2116_v40, %v2118_v53  ;;  %v7893_v24 = vld [vmem:[%s9766_s2 + $0x20] sm:$0xff]   ;;  %v1634_v42 = vmax.f32 %v8793_v28, 0.0  ;;  %v1611_v1 = vpop.f32.mrf.mxu1  ;;  %v7897_v19 = vld [vmem:[%s9766_s2 + $0x18] sm:$0xff]  }
 0x14a   : > { %v8863_v62 = vpop.f32.mrf.mxu0  ;;  %v2518_v58 = vadd.f32 %v2516_v36, %v2512_v6  ;;  %v2519_v13 = vadd.f32 %v2517_v41, %v2513_v32  ;;  %2097 = vst [vmem:[#allocation3 + $0x80] sm:$0xff] %v2095_v33  ;;  %2138 = vst [vmem:[#allocation7 + $0x18] sm:$0xff] %v2134_v8  ;;  %v2534_v17 = vadd.f32 %v8434_v38, %v2532_v22  ;;  %v1637_v59 = vmax.f32 %v8838_v31, 0.0  ;;  %v2548_v18 = vld [vmem:[#allocation3 + $0x73] sm:$0xff] }
 0x14b   : > { %v2538_v16 = vmul.f32 %v8420_v29, %v2536_v44  ;;  %2122 = vst [vmem:[#allocation3 + $0x98] sm:$0xff] %v8873_v43  ;;  %v2533_v37 = vmul.f32 %v8408_v20, %v8789_v39  ;;  %v2544_v27 = vmul.f32 %v8459_v54, %v2542_v7  ;;  %v1635_v28 = vmax.f32 %v8860_v14, 0.0  ;;  %v7886_v53 = vld [vmem:[%s9766_s2 + $0x70] sm:$0xff]   ;;  %v7884_v7 = vld [vmem:[#allocation4 + $0x10] sm:$0xff]  }
 0x14c   : > { %v8871_v3 = vpop.f32.mrf.mxu0  ;;  %v6820_v51 = vpack.c.bf16 %v2519_v13, %v2518_v58  ;;  %v1638_v39 = vmax.f32 %v7232_v5, 0.0  ;;  %v1632_v31 = vmax.f32 %v8824_v34, 0.0  ;;  %v1636_v12 = vmax.f32 %v1611_v1, 0.0 }
 0x14d   : > { %v2540_v9 = vadd.f32 %v2538_v16, %v2534_v17  ;;  %v2535_v49 = vadd.f32 %v8434_v38, %v2533_v37  ;;  %v2572_v14 = vmul.f32 %v8408_v20, %v2095_v33  ;;  %v2550_v41 = vmul.f32 %v8496_v60, %v2548_v18  ;;  %v7890_v37 = vld [vmem:[%s9766_s2 + $0x68] sm:$0xff]  }
 0x14e   : > { %6862 = vst [vmem:[#allocation4 + $0x30] sm:$0xff] %v6820_v51   ;;  %v2115_v0 = vld [vmem:[#allocation7] ss:$2 sm:$0xff]  ;;  %v2117_v8 = vld [vmem:[#allocation7 + $0x1] ss:$2 sm:$0xff]  ;;  %v8890_v15 = vpop.f32.mrf.mxu0  ;;  %v8910_v44 = vmax.f32 %v1633_v47, %v1637_v59  ;;  %v2155_v40 = vmax.f32 %v1631_v35, %v1635_v28  ;;  %v2573_v33 = vmul.f32 %v8408_v20, %v8800_v30  ;;  %v8918_v58 = vmax.f32 %v1634_v42, %v1638_v39 }
 0x14f   : > { %7338 = vmatmul.mubr.msk.bf16.vlgmr.msra.gmra.mxu0 %vm2878_vm2, %v7883_v57  ;;  %v2119_v52 = vmax.f32 %v2115_v0, %v2117_v8  ;;  %2135 = vst [vmem:[#allocation7] sm:$0xff] %v2131_v61  ;;  %2136 = vst [vmem:[#allocation7 + $0x8] sm:$0xff] %v2132_v23  ;;  %v2546_v34 = vadd.f32 %v2544_v27, %v2540_v9  ;;  %v1848_v13 = vmax.f32 %v8796_v2, 0.0  ;;  %v1849_v51 = vmax.f32 %v8827_v26, 0.0 }
 0x150   : > { %7341 = vmatprep.mubr.msk.bf16.mxu0 %vm8074_vm1, %v8676_v25  ;;  %7384 = vmatpush3.bf16.msra.mxu0 %v7887_v56  ;;  %v7882_v10 = vld [vmem:[#allocation4 + $0x28] sm:$0xff]   ;;  %v8904_v22 = vpop.f32.mrf.mxu0  ;;  %v2156_v5 = vmax.f32 %v1632_v31, %v1636_v12  ;;  %v1852_v17 = vmax.f32 %v8840_v50, 0.0  ;;  %v2574_v30 = vadd.f32 %v8434_v38, %v2572_v14 }
 0x151   : > { %7385 = vmatprep.subr.bf16.mxu0 %v8676_v25  ;;  %2121 = vst [vmem:[#allocation3 + $0x90] sm:$0xff] %v2119_v52  ;;  %7276 = vmatmul.mubr.msk.bf16.gmra.mxu1 %vm2878_vm2, %v7882_v10  ;;  %v2537_v21 = vld [vmem:[#allocation3 + $0x79] sm:$0xff]  ;;  %v2576_v8 = vld [vmem:[#allocation3 + $0x81] sm:$0xff]  ;;  %v2612_v42 = vmul.f32 %v8408_v20, %v2119_v52  ;;  %v2575_v10 = vadd.f32 %v8434_v38, %v2573_v33  ;;  %v7889_v18 = vld [vmem:[#allocation4 + $0x28] sm:$0xff]  }
 0x152   : > { %7311 = vmatprep.mubr.msk.bf16.mxu1 %vm8074_vm1, %v8676_v25  ;;  %v2543_v46 = vld [vmem:[#allocation3 + $0x7a] sm:$0xff]  ;;  %v2539_v6 = vmul.f32 %v8420_v29, %v2537_v21  ;;  %v8926_v16 = vpop.f32.mrf.mxu0  ;;  %v2578_v1 = vmul.f32 %v8420_v29, %v2576_v8  ;;  %v2582_v27 = vld [vmem:[#allocation3 + $0x82] sm:$0xff]  ;;  %v1853_v21 = vmax.f32 %v8863_v62, 0.0 }
 0x153   : > { %v2549_v36 = vld [vmem:[#allocation3 + $0x7b] sm:$0xff]  ;;  %v2545_v32 = vmul.f32 %v8459_v54, %v2543_v46  ;;  %v2588_v28 = vld [vmem:[#allocation3 + $0x83] sm:$0xff]  ;;  %v2584_v52 = vmul.f32 %v8459_v54, %v2582_v27  ;;  %v2613_v27 = vmul.f32 %v8408_v20, %v8873_v43 }
 0x154   : > { %7386 = vmatpush3.bf16.msra.mxu0 %v7893_v24  ;;  %v2554_v56 = vld [vmem:[#allocation3 + $0x74] sm:$0xff]  ;;  %v2541_v61 = vadd.f32 %v2539_v6, %v2535_v49  ;;  %v2551_v23 = vmul.f32 %v8496_v60, %v2549_v36  ;;  %v2555_v57 = vld [vmem:[#allocation3 + $0x7c] sm:$0xff]  ;;  %v2552_v24 = vadd.f32 %v2550_v41, %v2546_v34  ;;  %v2590_v12 = vmul.f32 %v8496_v60, %v2588_v28  ;;  %v2594_v49 = vld [vmem:[#allocation3 + $0x84] sm:$0xff]  ;;  %v8946_v46 = vpop.f32.mrf.mxu0 }
 0x155   : > { %7387 = vmatprep.subr.bf16.mxu0 %v8676_v25  ;;  %v2556_v0 = vmul.f32 %v8499_v55, %v2554_v56  ;;  %v2557_v59 = vmul.f32 %v8499_v55, %v2555_v57  ;;  %v2580_v36 = vadd.f32 %v2578_v1, %v2574_v30  ;;  %v2596_v56 = vmul.f32 %v8499_v55, %v2594_v49  ;;  %v2142_v8 = vld [vmem:[#allocation7 + $0x11] ss:$2 sm:$0xff] }
 0x156   : > { %v2547_v47 = vadd.f32 %v2545_v32, %v2541_v61  ;;  %v2139_v33 = vld [vmem:[#allocation7] ss:$2 sm:$0xff]  ;;  %v2614_v61 = vadd.f32 %v8434_v38, %v2612_v42  ;;  %v8959_v42 = vpop.f32.mrf.mxu0  ;;  %v7892_v26 = vld [vmem:[#allocation4 + $0x30] sm:$0xff]   ;;  %v2615_v43 = vadd.f32 %v8434_v38, %v2613_v27 }
 0x157   : > { %7342 = vmatmul.mubr.msk.bf16.gmra.mxu0 %vm2878_vm2, %v7885_v4  ;;  %v2558_v34 = vadd.f32 %v2556_v0, %v2552_v24  ;;  %v2586_v62 = vadd.f32 %v2584_v52, %v2580_v36  ;;  %v2140_v0 = vld [vmem:[#allocation7 + $0x10] ss:$2 sm:$0xff] }
 0x158   : > { %7345 = vmatprep.mubr.msk.bf16.mxu0 %vm8074_vm1, %v8676_v25  ;;  %7388 = vmatpush3.bf16.msra.mxu0 %v7897_v19  ;;  %v2577_v35 = vld [vmem:[#allocation3 + $0x89] sm:$0xff]  ;;  %v2553_v39 = vadd.f32 %v2551_v23, %v2547_v47  ;;  %v2616_v23 = vld [vmem:[#allocation3 + $0x91] sm:$0xff]  ;;  %2161 = vst [vmem:[#allocation7 + $0x10] sm:$0xff] %v8910_v44  ;;  %2162 = vst [vmem:[#allocation7 + $0x18] sm:$0xff] %v8918_v58  ;;  %v8977_v50 = vpop.f32.mrf.mxu0 }
 0x159   : > { %7435 = vmatprep.subr.bf16.mxu0 %v8676_v25  ;;  %v2579_v9 = vmul.f32 %v8420_v29, %v2577_v35  ;;  %v2583_v19 = vld [vmem:[#allocation3 + $0x8a] sm:$0xff]  ;;  %7312 = vmatmul.mubr.msk.bf16.vlgmr.msra.gmra.mxu1 %vm2878_vm2, %v7884_v7  ;;  %v2618_v7 = vmul.f32 %v8420_v29, %v2616_v23  ;;  %v2622_v47 = vld [vmem:[#allocation3 + $0x92] sm:$0xff]  ;;  %v7896_v35 = vld [vmem:[%s9766_s2 + $0x60] sm:$0xff]  }
 0x15a   : > { %v2585_v4 = vmul.f32 %v8459_v54, %v2583_v19  ;;  %v2589_v31 = vld [vmem:[#allocation3 + $0x8b] sm:$0xff]  ;;  %7358 = vmatpush3.bf16.msra.mxu1 %v7886_v53  ;;  %7315 = vmatprep.mubr.msk.bf16.mxu1 %vm8074_vm1, %v8676_v25  ;;  %v2559_v41 = vadd.f32 %v2557_v59, %v2553_v39  ;;  %v2592_v59 = vadd.f32 %v2590_v12, %v2586_v62  ;;  %v2628_v2 = vld [vmem:[#allocation3 + $0x93] sm:$0xff]  ;;  %v1850_v12 = vmax.f32 %v8786_v11, 0.0 }
 0x15b   : > { %v2581_v14 = vadd.f32 %v2579_v9, %v2575_v10  ;;  %v2591_v6 = vmul.f32 %v8496_v60, %v2589_v31  ;;  %v2595_v32 = vld [vmem:[#allocation3 + $0x8c] sm:$0xff]  ;;  %7359 = vmatprep.subr.bf16.mxu1 %v8676_v25  ;;  %v2180_v9 = vmax.f32 %v1849_v51, %v1853_v21  ;;  %v2620_v44 = vadd.f32 %v2618_v7, %v2614_v61  ;;  %v2634_v52 = vld [vmem:[#allocation3 + $0x94] sm:$0xff] }
 0x15c   : > { %v2141_v53 = vld [vmem:[#allocation7 + $0x1] ss:$2 sm:$0xff]  ;;  %v6825_v24 = vpack.c.bf16 %v2559_v41, %v2558_v34  ;;  %v2597_v1 = vmul.f32 %v8499_v55, %v2595_v32  ;;  %v2598_v19 = vadd.f32 %v2596_v56, %v2592_v59  ;;  %v2624_v58 = vmul.f32 %v8459_v54, %v2622_v47  ;;  %v1836_v32 = vpop.f32.mrf.mxu0 }
 0x15d   : > { %v2587_v57 = vadd.f32 %v2585_v4, %v2581_v14  ;;  %v2143_v30 = vmax.f32 %v2139_v33, %v2141_v53  ;;  %2159 = vst [vmem:[#allocation7] sm:$0xff] %v2155_v40  ;;  %2160 = vst [vmem:[#allocation7 + $0x8] sm:$0xff] %v2156_v5  ;;  %v2144_v40 = vmax.f32 %v2140_v0, %v2142_v8  ;;  %v1851_v14 = vmax.f32 %v8816_v48, 0.0  ;;  %v7891_v11 = vld [vmem:[#allocation4 + $0x20] sm:$0xff]  }
 0x15e   : > { %7360 = vmatpush3.bf16.msra.mxu1 %v7890_v37  ;;  %v2179_v5 = vmax.f32 %v1848_v13, %v1852_v17  ;;  %v7888_v37 = vld [vmem:[#allocation4 + $0x18] sm:$0xff]   ;;  %6863 = vst [vmem:[#allocation4 + $0x38] sm:$0xff] %v6825_v24   ;;  %v2630_v39 = vmul.f32 %v8496_v60, %v2628_v2  ;;  %v1855_v56 = vmax.f32 %v8853_v63, 0.0  ;;  %v2636_v33 = vmul.f32 %v8499_v55, %v2634_v52 }
 0x15f   : > { %7346 = vmatmul.mubr.msk.bf16.gmra.mxu0 %vm2878_vm2, %v7889_v18  ;;  %v2593_v10 = vadd.f32 %v2591_v6, %v2587_v57  ;;  %2145 = vst [vmem:[#allocation3 + $0xa0] sm:$0xff] %v2143_v30  ;;  %7361 = vmatprep.subr.bf16.mxu1 %v8676_v25  ;;  %2146 = vst [vmem:[#allocation3 + $0xa8] sm:$0xff] %v2144_v40  ;;  %v2626_v18 = vadd.f32 %v2624_v58, %v2620_v44  ;;  %v1854_v6 = vmax.f32 %v8833_v45, 0.0 }
 0x160   : > { %7349 = vmatprep.mubr.msk.bf16.mxu0 %vm8074_vm1, %v8676_v25  ;;  %v2652_v31 = vmul.f32 %v8408_v20, %v2143_v30  ;;  %v2653_v53 = vmul.f32 %v8408_v20, %v2144_v40  ;;  %v1856_v57 = vmax.f32 %v8890_v15, 0.0  ;;  %v1857_v30 = vmax.f32 %v8926_v16, 0.0 }
 0x161   : > { %v2599_v28 = vadd.f32 %v2597_v1, %v2593_v10  ;;  %7316 = vmatmul.mubr.msk.bf16.gmra.mxu1 %vm2878_vm2, %v7888_v37  ;;  %v2632_v48 = vadd.f32 %v2630_v39, %v2626_v18  ;;  %v1860_v63 = vmax.f32 %v8959_v42, 0.0  ;;  %v1861_v7 = vmax.f32 %v1836_v32, 0.0 }
 0x162   : > { %7319 = vmatprep.mubr.msk.bf16.mxu1 %vm8074_vm1, %v8676_v25  ;;  %7362 = vmatpush3.bf16.msra.mxu1 %v7896_v35  ;;  %v2654_v45 = vadd.f32 %v8434_v38, %v2652_v31  ;;  %v2181_v15 = vmax.f32 %v1850_v12, %v1854_v6  ;;  %v2182_v40 = vmax.f32 %v1851_v14, %v1855_v56  ;;  %v1858_v16 = vmax.f32 %v8871_v3, 0.0  ;;  %v2166_v14 = vld [vmem:[#allocation7 + $0x11] ss:$2 sm:$0xff] }
 0x163   : > { %v6830_v13 = vpack.c.bf16 %v2599_v28, %v2598_v19  ;;  %7409 = vmatprep.subr.bf16.mxu1 %v8676_v25  ;;  %v2655_v42 = vadd.f32 %v8434_v38, %v2653_v53  ;;  %v2638_v37 = vadd.f32 %v2636_v33, %v2632_v48  ;;  %v1859_v28 = vmax.f32 %v8904_v22, 0.0 }
 0x164   : > { %v2163_v51 = vld [vmem:[#allocation7] ss:$2 sm:$0xff]  ;;  %v2165_v17 = vld [vmem:[#allocation7 + $0x1] ss:$2 sm:$0xff]  ;;  %v1862_v44 = vmax.f32 %v8946_v46, 0.0  ;;  %v2203_v58 = vmax.f32 %v1856_v57, %v1860_v63  ;;  %v2204_v2 = vmax.f32 %v1857_v30, %v1861_v7  ;;  %v1863_v22 = vmax.f32 %v8977_v50, 0.0 }
 0x165   : > { %6864 = vst [vmem:[#allocation4 + $0x40] sm:$0xff] %v6830_v13   ;;  %v8983_v4 = vmax.f32 %v2163_v51, %v2165_v17  ;;  %2183 = vst [vmem:[#allocation7] sm:$0xff] %v2179_v5  ;;  %v7895_v0 = vld [vmem:[#allocation4 + $0x38] sm:$0xff]   ;;  %v9029_v50 = vld [vmem:[#allocation4 + $0x30] sm:$0xff]  }
 0x166   : > { %2184 = vst [vmem:[#allocation7 + $0x8] sm:$0xff] %v2180_v9  ;;  %v2617_v49 = vld [vmem:[#allocation3 + $0x99] sm:$0xff]  ;;  %v2656_v47 = vld [vmem:[#allocation3 + $0xa1] sm:$0xff]  ;;  %v2206_v48 = vmax.f32 %v1859_v28, %v1863_v22 }
 0x167   : > { %7350 = vmatmul.mubr.msk.bf16.gmra.mxu0 %vm2878_vm2, %v7892_v26  ;;  %v2623_v21 = vld [vmem:[#allocation3 + $0x9a] sm:$0xff]  ;;  %v2619_v34 = vmul.f32 %v8420_v29, %v2617_v49  ;;  %2169 = vst [vmem:[#allocation3 + $0xb0] sm:$0xff] %v8983_v4  ;;  %v2662_v24 = vld [vmem:[#allocation3 + $0xa2] sm:$0xff]  ;;  %v2658_v59 = vmul.f32 %v8420_v29, %v2656_v47  ;;  %v2692_v57 = vmul.f32 %v8408_v20, %v8983_v4 }
 0x168   : > { %7353 = vmatprep.mubr.msk.bf16.mxu0 %vm8074_vm1, %v8676_v25  ;;  %v2629_v36 = vld [vmem:[#allocation3 + $0x9b] sm:$0xff]  ;;  %v2625_v41 = vmul.f32 %v8459_v54, %v2623_v21  ;;  %v2664_v10 = vmul.f32 %v8459_v54, %v2662_v24  ;;  %v2668_v1 = vld [vmem:[#allocation3 + $0xa3] sm:$0xff] }
 0x169   : > { %v2621_v61 = vadd.f32 %v2619_v34, %v2615_v43  ;;  %v2631_v23 = vmul.f32 %v8496_v60, %v2629_v36  ;;  %v2635_v62 = vld [vmem:[#allocation3 + $0x9c] sm:$0xff]  ;;  %7320 = vmatmul.mubr.msk.bf16.gmra.mxu1 %vm2878_vm2, %v7891_v11  ;;  %v2660_v9 = vadd.f32 %v2658_v59, %v2654_v45  ;;  %v2670_v27 = vmul.f32 %v8496_v60, %v2668_v1  ;;  %v2674_v19 = vld [vmem:[#allocation3 + $0xa4] sm:$0xff]  ;;  %v7894_v43 = vld [vmem:[#allocation4 + $0x28] sm:$0xff]  }
 0x16a   : > { %7323 = vmatprep.mubr.msk.bf16.mxu1 %vm8074_vm1, %v8676_v25  ;;  %v2637_v35 = vmul.f32 %v8499_v55, %v2635_v62  ;;  %v2676_v46 = vmul.f32 %v8499_v55, %v2674_v19  ;;  %v2164_v36 = vld [vmem:[#allocation7 + $0x10] ss:$2 sm:$0xff]  ;;  %v9049_v4 = vld [vmem:[#allocation4 + $0x38] sm:$0xff]  }
 0x16b   : > { %v2627_v8 = vadd.f32 %v2625_v41, %v2621_v61  ;;  %v2666_v39 = vadd.f32 %v2664_v10, %v2660_v9  ;;  %v2168_v32 = vmax.f32 %v2164_v36, %v2166_v14  ;;  %2185 = vst [vmem:[#allocation7 + $0x10] sm:$0xff] %v2181_v15  ;;  %2186 = vst [vmem:[#allocation7 + $0x18] sm:$0xff] %v2182_v40  ;;  %v9025_v41 = vld [vmem:[#allocation3 + $0xe0] sm:$0xff]  ;;  %v7909_v62 = vld [vmem:[%s9766_s2 + $0x38] sm:$0xff]  }
 0x16c   : > { %v7898_v63 = vld [vmem:[#allocation4 + $0x30] sm:$0xff]  }
 0x16d   : > { %v2633_v5 = vadd.f32 %v2631_v23, %v2627_v8  ;;  %v2672_v21 = vadd.f32 %v2670_v27, %v2666_v39  ;;  %v2187_v6 = vld [vmem:[#allocation7] ss:$2 sm:$0xff]  ;;  %v2189_v34 = vld [vmem:[#allocation7 + $0x1] ss:$2 sm:$0xff]  ;;  %2170 = vst [vmem:[#allocation3 + $0xb8] sm:$0xff] %v2168_v32  ;;  %v2205_v23 = vmax.f32 %v1858_v16, %v1862_v44  ;;  %v2693_v30 = vmul.f32 %v8408_v20, %v2168_v32  ;;  %v7902_v44 = vld [vmem:[%s9766_s2 + $0x10] sm:$0xff]  }
 0x16e   : > { %v2657_v3 = vld [vmem:[#allocation3 + $0xa9] sm:$0xff]  ;;  %v2191_v33 = vmax.f32 %v2187_v6, %v2189_v34  ;;  %2207 = vst [vmem:[#allocation7] sm:$0xff] %v2203_v58  ;;  %2208 = vst [vmem:[#allocation7 + $0x8] sm:$0xff] %v2204_v2 }
 0x16f   : > { %7354 = vmatmul.mubr.msk.bf16.gmra.mxu0 %vm2878_vm2, %v7895_v0  ;;  %v2663_v26 = vld [vmem:[#allocation3 + $0xaa] sm:$0xff]  ;;  %v2639_v51 = vadd.f32 %v2637_v35, %v2633_v5  ;;  %v2659_v17 = vmul.f32 %v8420_v29, %v2657_v3  ;;  %v2678_v61 = vadd.f32 %v2676_v46, %v2672_v21  ;;  %v2694_v35 = vadd.f32 %v8434_v38, %v2692_v57 }
 0x170   : > { %7389 = vmatprep.mubr.msk.bf16.mxu0 %vm8074_vm1, %v8676_v25  ;;  %v2669_v13 = vld [vmem:[#allocation3 + $0xab] sm:$0xff]  ;;  %v2665_v18 = vmul.f32 %v8459_v54, %v2663_v26  ;;  %v7903_v25 = vld [vmem:[%s9766_s2 + $0x40] sm:$0xff]   ;;  %2193 = vst [vmem:[#allocation3 + $0xc0] sm:$0xff] %v2191_v33  ;;  %v2695_v59 = vadd.f32 %v8434_v38, %v2693_v30 }
 0x171   : > { %v2675_v52 = vld [vmem:[#allocation3 + $0xac] sm:$0xff]  ;;  %v6835_v31 = vpack.c.bf16 %v2639_v51, %v2638_v37  ;;  %v2661_v12 = vadd.f32 %v2659_v17, %v2655_v42  ;;  %v2671_v49 = vmul.f32 %v8496_v60, %v2669_v13  ;;  %7324 = vmatmul.mubr.msk.bf16.gmra.mxu1 %vm2878_vm2, %v7894_v43  ;;  %v2732_v51 = vmul.f32 %v8408_v20, %v2191_v33 }
 0x172   : > { %7327 = vmatprep.mubr.msk.bf16.mxu1 %vm8074_vm1, %v9025_v41  ;;  %v2677_v11 = vmul.f32 %v8499_v55, %v2675_v52  ;;  %v2188_v47 = vld [vmem:[#allocation7 + $0x10] ss:$2 sm:$0xff]  ;;  %v2190_v24 = vld [vmem:[#allocation7 + $0x11] ss:$2 sm:$0xff]  ;;  %v7900_v13 = vld [vmem:[#allocation4 + $0x20] sm:$0xff]  }
 0x173   : > { %6865 = vst [vmem:[#allocation4 + $0x48] sm:$0xff] %v6835_v31   ;;  %v2667_v56 = vadd.f32 %v2665_v18, %v2661_v12  ;;  %v7913_v0 = vld [vmem:[%s9766_s2 + $0x30] sm:$0xff]   ;;  %v2192_v8 = vmax.f32 %v2188_v47, %v2190_v24  ;;  %2209 = vst [vmem:[#allocation7 + $0x10] sm:$0xff] %v2205_v23  ;;  %v7906_v31 = vld [vmem:[%s9766_s2 + $0x8] sm:$0xff]   ;;  %v2734_v34 = vadd.f32 %v8434_v38, %v2732_v51 }
 0x174   : > { %2210 = vst [vmem:[#allocation7 + $0x18] sm:$0xff] %v2206_v48  ;;  %v2696_v10 = vld [vmem:[#allocation3 + $0xb1] sm:$0xff]  ;;  %v9077_v21 = vld [vmem:[#allocation4 + $0x40] sm:$0xff]  }
 0x175   : > { %v2673_v53 = vadd.f32 %v2671_v49, %v2667_v56  ;;  %v2702_v15 = vld [vmem:[#allocation3 + $0xb2] sm:$0xff]  ;;  %2194 = vst [vmem:[#allocation3 + $0xc8] sm:$0xff] %v2192_v8  ;;  %v2698_v40 = vmul.f32 %v8420_v29, %v2696_v10  ;;  %v2211_v43 = vld [vmem:[#allocation7] ss:$2 sm:$0xff]  ;;  %v2213_v22 = vld [vmem:[#allocation7 + $0x1] ss:$2 sm:$0xff]  ;;  %v2733_v56 = vmul.f32 %v8408_v20, %v2192_v8 }
 0x176   : > { %v2704_v5 = vmul.f32 %v8459_v54, %v2702_v15  ;;  %v2708_v37 = vld [vmem:[#allocation3 + $0xb3] sm:$0xff]  ;;  %v2215_v12 = vmax.f32 %v2211_v43, %v2213_v22 }
 0x177   : > { %7390 = vmatmul.mubr.msk.bf16.vlgmr.msra.gmra.mxu0 %vm2878_vm2, %v9029_v50  ;;  %v2679_v45 = vadd.f32 %v2677_v11, %v2673_v53  ;;  %v2697_v1 = vld [vmem:[#allocation3 + $0xb9] sm:$0xff]  ;;  %v2700_v58 = vadd.f32 %v2698_v40, %v2694_v35  ;;  %v2710_v3 = vmul.f32 %v8496_v60, %v2708_v37  ;;  %v7904_v30 = vld [vmem:[#allocation4 + $0x28] sm:$0xff]   ;;  %v2735_v47 = vadd.f32 %v8434_v38, %v2733_v56 }
 0x178   : > { %7393 = vmatprep.mubr.msk.bf16.mxu0 %vm8074_vm1, %v9025_v41  ;;  %7436 = vmatpush3.bf16.msra.mxu0 %v7903_v25  ;;  %v2699_v16 = vmul.f32 %v8420_v29, %v2697_v1  ;;  %v2703_v42 = vld [vmem:[#allocation3 + $0xba] sm:$0xff]  ;;  %2217 = vst [vmem:[#allocation3 + $0xd0] sm:$0xff] %v2215_v12  ;;  %v2772_v53 = vmul.f32 %v8408_v20, %v2215_v12 }
 0x179   : > { %7437 = vmatprep.subr.bf16.mxu0 %v9025_v41  ;;  %v6840_v7 = vpack.c.bf16 %v2679_v45, %v2678_v61  ;;  %7328 = vmatmul.mubr.msk.bf16.gmra.mxu1 %vm2878_vm2, %v7898_v63  ;;  %v2709_v9 = vld [vmem:[#allocation3 + $0xbb] sm:$0xff]  ;;  %v2705_v27 = vmul.f32 %v8459_v54, %v2703_v42  ;;  %v2706_v17 = vadd.f32 %v2704_v5, %v2700_v58 }
 0x17a   : > { %7363 = vmatprep.mubr.msk.bf16.mxu1 %vm8074_vm1, %v9025_v41  ;;  %v2714_v19 = vld [vmem:[#allocation3 + $0xb4] sm:$0xff]  ;;  %v2715_v28 = vld [vmem:[#allocation3 + $0xbc] sm:$0xff]  ;;  %v2701_v2 = vadd.f32 %v2699_v16, %v2695_v59  ;;  %v2711_v26 = vmul.f32 %v8496_v60, %v2709_v9  ;;  %v2774_v10 = vadd.f32 %v8434_v38, %v2772_v53 }
 0x17b   : > { %6866 = vst [vmem:[#allocation4 + $0x50] sm:$0xff] %v6840_v7   ;;  %v2716_v39 = vmul.f32 %v8499_v55, %v2714_v19  ;;  %v2717_v25 = vmul.f32 %v8499_v55, %v2715_v28  ;;  %v2212_v52 = vld [vmem:[#allocation7 + $0x10] ss:$2 sm:$0xff]  ;;  %v2214_v46 = vld [vmem:[#allocation7 + $0x11] ss:$2 sm:$0xff]  ;;  %v2712_v36 = vadd.f32 %v2710_v3, %v2706_v17  ;;  %v7912_v61 = vld [vmem:[%s9766_s2] sm:$0xff]  }
 0x17c   : > { %7438 = vmatpush3.bf16.msra.mxu0 %v7909_v62  ;;  %v2707_v18 = vadd.f32 %v2705_v27, %v2701_v2  ;;  %v2216_v49 = vmax.f32 %v2212_v52, %v2214_v46  ;;  %v2736_v11 = vld [vmem:[#allocation3 + $0xc1] sm:$0xff]  ;;  %v9095_v7 = vld [vmem:[#allocation4 + $0x48] sm:$0xff]  }
 0x17d   : > { %7439 = vmatprep.subr.bf16.mxu0 %v9025_v41  ;;  %v2718_v6 = vadd.f32 %v2716_v39, %v2712_v36  ;;  %v2742_v33 = vld [vmem:[#allocation3 + $0xc2] sm:$0xff]  ;;  %v2738_v48 = vmul.f32 %v8420_v29, %v2736_v11  ;;  %v7919_v53 = vld [vmem:[%s9766_s2 + $0x70] sm:$0xff]  }
 0x17e   : > { %v2713_v14 = vadd.f32 %v2711_v26, %v2707_v18  ;;  %2218 = vst [vmem:[#allocation3 + $0xd8] sm:$0xff] %v2216_v49  ;;  %v2744_v62 = vmul.f32 %v8459_v54, %v2742_v33  ;;  %v2748_v45 = vld [vmem:[#allocation3 + $0xc3] sm:$0xff]  ;;  %v2773_v57 = vmul.f32 %v8408_v20, %v2216_v49 }
 0x17f   : > { %7394 = vmatmul.mubr.msk.bf16.gmra.mxu0 %vm2878_vm2, %v9049_v4  ;;  %v2740_v63 = vadd.f32 %v2738_v48, %v2734_v34  ;;  %v2750_v24 = vmul.f32 %v8496_v60, %v2748_v45  ;;  %v2737_v8 = vld [vmem:[#allocation3 + $0xc9] sm:$0xff]  ;;  %v7910_v33 = vld [vmem:[#allocation4 + $0x38] sm:$0xff]  }
 0x180   : > { %7397 = vmatprep.mubr.msk.bf16.mxu0 %vm8074_vm1, %v9025_v41  ;;  %7440 = vmatpush3.bf16.msra.mxu0 %v7913_v0  ;;  %v2719_v32 = vadd.f32 %v2717_v25, %v2713_v14  ;;  %v2754_v0 = vld [vmem:[#allocation3 + $0xc4] sm:$0xff]  ;;  %v2775_v1 = vadd.f32 %v8434_v38, %v2773_v57  ;;  %v2739_v15 = vmul.f32 %v8420_v29, %v2737_v8  ;;  %v2755_v16 = vld [vmem:[#allocation3 + $0xcc] sm:$0xff]  ;;  %v7907_v25 = vld [vmem:[#allocation4 + $0x30] sm:$0xff]  }
 0x181   : > { %7487 = vmatprep.subr.bf16.mxu0 %v9025_v41  ;;  %7364 = vmatmul.mubr.msk.bf16.vlgmr.msra.gmra.mxu1 %vm2878_vm2, %v7900_v13  ;;  %v2743_v20 = vld [vmem:[#allocation3 + $0xca] sm:$0xff]  ;;  %v2746_v35 = vadd.f32 %v2744_v62, %v2740_v63  ;;  %v2756_v9 = vmul.f32 %v8499_v55, %v2754_v0  ;;  %v2757_v52 = vmul.f32 %v8499_v55, %v2755_v16  ;;  %v7926_v62 = vld [vmem:[%s9766_s2 + $0x60] sm:$0xff]   ;;  %v7918_v57 = vld [vmem:[%s9766_s2 + $0x58] sm:$0xff]  }
 0x182   : > { %7410 = vmatpush3.bf16.msra.mxu1 %v7902_v44  ;;  %7367 = vmatprep.mubr.msk.bf16.mxu1 %vm8074_vm1, %v9025_v41  ;;  %v6845_v23 = vpack.c.bf16 %v2719_v32, %v2718_v6  ;;  %v2749_v59 = vld [vmem:[#allocation3 + $0xcb] sm:$0xff]  ;;  %v2745_v40 = vmul.f32 %v8459_v54, %v2743_v20  ;;  %v2741_v58 = vadd.f32 %v2739_v15, %v2735_v47  ;;  %v7911_v14 = vld [vmem:[#allocation4 + $0x50] sm:$0xff]  }
 0x183   : > { %7411 = vmatprep.subr.bf16.mxu1 %v9025_v41  ;;  %v2751_v37 = vmul.f32 %v8496_v60, %v2749_v59  ;;  %v2752_v2 = vadd.f32 %v2750_v24, %v2746_v35  ;;  %v7914_v48 = vld [vmem:[#allocation4 + $0x40] sm:$0xff]   ;;  %v7920_v63 = vld [vmem:[#allocation4 + $0x48] sm:$0xff]   ;;  %v7922_v0 = vld [vmem:[#allocation4 + $0x50] sm:$0xff]  }
 0x184   : > { %6867 = vst [vmem:[#allocation4 + $0x58] sm:$0xff] %v6845_v23   ;;  %v2747_v22 = vadd.f32 %v2745_v40, %v2741_v58  ;;  %v7923_v23 = vld [vmem:[%s9766_s2 + $0x68] sm:$0xff]   ;;  %v7921_v47 = vld [vmem:[%s9766_s2 + $0x50] sm:$0xff]   ;;  %v7937_v59 = vld [vmem:[%s9767_s3 + $0x18] sm:$0xff]  }
 0x185   : > { %v2776_v42 = vld [vmem:[#allocation3 + $0xd1] sm:$0xff]  ;;  %v2777_v5 = vld [vmem:[#allocation3 + $0xd9] sm:$0xff]  ;;  %v2758_v36 = vadd.f32 %v2756_v9, %v2752_v2  ;;  %v7917_v45 = vld [vmem:[#allocation4 + $0x40] sm:$0xff]  }
 0x186   : > { %7412 = vmatpush3.bf16.msra.mxu1 %v7906_v31  ;;  %v2778_v27 = vmul.f32 %v8420_v29, %v2776_v42  ;;  %v2779_v38 = vmul.f32 %v8420_v29, %v2777_v5  ;;  %v2782_v19 = vld [vmem:[#allocation3 + $0xd2] sm:$0xff]  ;;  %v2783_v28 = vld [vmem:[#allocation3 + $0xda] sm:$0xff]  ;;  %v7925_v24 = vld [vmem:[%s9766_s2 + $0x48] sm:$0xff]  }
 0x187   : > { %7398 = vmatmul.mubr.msk.bf16.gmra.mxu0 %vm2878_vm2, %v9077_v21  ;;  %7413 = vmatprep.subr.bf16.mxu1 %v9025_v41  ;;  %v2788_v44 = vld [vmem:[#allocation3 + $0xd3] sm:$0xff]  ;;  %v2784_v3 = vmul.f32 %v8459_v54, %v2782_v19  ;;  %v2785_v26 = vmul.f32 %v8459_v54, %v2783_v28  ;;  %v2789_v13 = vld [vmem:[#allocation3 + $0xdb] sm:$0xff]  ;;  %v2753_v54 = vadd.f32 %v2751_v37, %v2747_v22  ;;  %v7938_v40 = vld [vmem:[%s9767_s3 + $0x48] sm:$0xff]  }
 0x188   : > { %7401 = vmatprep.mubr.msk.bf16.mxu0 %vm8074_vm1, %v9025_v41  ;;  %v2794_v43 = vld [vmem:[#allocation3 + $0xd4] sm:$0xff]  ;;  %v2795_v51 = vld [vmem:[#allocation3 + $0xdc] sm:$0xff]  ;;  %v2780_v17 = vadd.f32 %v2778_v27, %v2774_v10  ;;  %v2781_v18 = vadd.f32 %v2779_v38, %v2775_v1  ;;  %v2790_v39 = vmul.f32 %v8496_v60, %v2788_v44  ;;  %v2791_v29 = vmul.f32 %v8496_v60, %v2789_v13 }
 0x189   : > { %7368 = vmatmul.mubr.msk.bf16.gmra.mxu1 %vm2878_vm2, %v7904_v30  ;;  %v2796_v12 = vmul.f32 %v8499_v55, %v2794_v43  ;;  %v2797_v49 = vmul.f32 %v8499_v55, %v2795_v51  ;;  %v2759_v32 = vadd.f32 %v2757_v52, %v2753_v54  ;;  %v7916_v30 = vld [vmem:[#allocation4 + $0x28] sm:$0xff]   ;;  %v7932_v10 = vld [vmem:[#allocation4 + $0x50] sm:$0xff]   ;;  %v7940_v9 = vld [vmem:[%s9767_s3 + $0x40] sm:$0xff]  }
 0x18a   : > { %7371 = vmatprep.mubr.msk.bf16.mxu1 %vm8074_vm1, %v9025_v41  ;;  %7414 = vmatpush3.bf16.msra.mxu1 %v7912_v61  ;;  %v2786_v46 = vadd.f32 %v2784_v3, %v2780_v17  ;;  %v2787_v31 = vadd.f32 %v2785_v26, %v2781_v18  ;;  %v7915_v61 = vld [vmem:[#allocation4 + $0x38] sm:$0xff]   ;;  %v7939_v37 = vld [vmem:[%s9767_s3 + $0x10] sm:$0xff]  }
 0x18b   : > { %7461 = vmatprep.subr.bf16.mxu1 %v9025_v41  ;;  %v6850_v11 = vpack.c.bf16 %v2759_v32, %v2758_v36  ;;  %v7924_v8 = vld [vmem:[#allocation4 + $0x58] sm:$0xff]  }
 0x18c   : > { %v2792_v6 = vadd.f32 %v2790_v39, %v2786_v46  ;;  %v2793_v60 = vadd.f32 %v2791_v29, %v2787_v31  ;;  %v7931_v20 = vld [vmem:[#allocation4 + $0x58] sm:$0xff]  }
 0x18d   : > { %6868 = vst [vmem:[#allocation4 + $0x60] sm:$0xff] %v6850_v11   ;;  %v7934_v42 = vld [vmem:[#allocation4 + $0x58] sm:$0xff]  }
 0x18e   : > { %v2798_v34 = vadd.f32 %v2796_v12, %v2792_v6  ;;  %v2799_v56 = vadd.f32 %v2797_v49, %v2793_v60 }
 0x18f   : > { %7402 = vmatmul.mubr.msk.bf16.gmra.mxu0 %vm2878_vm2, %v9095_v7 }
 0x190   : > { %7405 = vmatprep.mubr.msk.bf16.mxu0 %vm8074_vm1, %v9025_v41  ;;  %v6855_v55 = vpack.c.bf16 %v2799_v56, %v2798_v34 }
 0x191   : > { %7372 = vmatmul.mubr.msk.bf16.gmra.mxu1 %vm2878_vm2, %v7907_v25 }
 0x192   : > { %7375 = vmatprep.mubr.msk.bf16.mxu1 %vm8074_vm1, %v9025_v41  ;;  %6869 = vst [vmem:[#allocation4 + $0x68] sm:$0xff] %v6855_v55  }
 0x194   : > { %v7933_v35 = vld [vmem:[#allocation4 + $0x60] sm:$0xff]  }
 0x195   : > { %v7936_v2 = vld [vmem:[#allocation4 + $0x60] sm:$0xff]  }
 0x197   : > { %7406 = vmatmul.mubr.msk.bf16.gmra.mxu0 %vm2878_vm2, %v7911_v14 }
 0x198   : > { %7441 = vmatprep.mubr.msk.bf16.mxu0 %vm8074_vm1, %v9025_v41 }
 0x199   : > { %7376 = vmatmul.mubr.msk.bf16.gmra.mxu1 %vm2878_vm2, %v7910_v33  ;;  %v7935_v1 = vld [vmem:[#allocation4 + $0x68] sm:$0xff]  }
 0x19a   : > { %7379 = vmatprep.mubr.msk.bf16.mxu1 %vm8074_vm1, %v9025_v41 }
 0x19f   : > { %7442 = vmatmul.mubr.msk.bf16.vlgmr.msra.gmra.mxu0 %vm2878_vm2, %v7915_v61 }
 0x1a0   : > { %7445 = vmatprep.mubr.msk.bf16.mxu0 %vm8074_vm1, %v9025_v41  ;;  %7488 = vmatpush3.bf16.msra.mxu0 %v7919_v53 }
 0x1a1   : > { %7489 = vmatprep.subr.bf16.mxu0 %v9025_v41  ;;  %7380 = vmatmul.mubr.msk.bf16.gmra.mxu1 %vm2878_vm2, %v7914_v48 }
 0x1a2   : > { %7415 = vmatprep.mubr.msk.bf16.mxu1 %vm8074_vm1, %v9025_v41 }
 0x1a4   : > { %7490 = vmatpush3.bf16.msra.mxu0 %v7923_v23 }
 0x1a5   : > { %7491 = vmatprep.subr.bf16.mxu0 %v9025_v41 }
 0x1a7   : > { %7446 = vmatmul.mubr.msk.bf16.gmra.mxu0 %vm2878_vm2, %v7917_v45 }
 0x1a8   : > { %7449 = vmatprep.mubr.msk.bf16.mxu0 %vm8074_vm1, %v9025_v41  ;;  %7492 = vmatpush3.bf16.msra.mxu0 %v7926_v62 }
 0x1a9   : > { %7545 = vmatprep.subr.bf16.mxu0 %v9025_v41  ;;  %7416 = vmatmul.mubr.msk.bf16.vlgmr.msra.gmra.mxu1 %vm2878_vm2, %v7916_v30 }
 0x1aa   : > { %7462 = vmatpush3.bf16.msra.mxu1 %v7918_v57  ;;  %7419 = vmatprep.mubr.msk.bf16.mxu1 %vm8074_vm1, %v9025_v41 }
 0x1ab   : > { %7463 = vmatprep.subr.bf16.mxu1 %v9025_v41 }
 0x1ae   : > { %7464 = vmatpush3.bf16.msra.mxu1 %v7921_v47 }
 0x1af   : > { %7450 = vmatmul.mubr.msk.bf16.gmra.mxu0 %vm2878_vm2, %v7920_v63  ;;  %7465 = vmatprep.subr.bf16.mxu1 %v9025_v41 }
 0x1b0   : > { %7453 = vmatprep.mubr.msk.bf16.mxu0 %vm8074_vm1, %v9025_v41 }
 0x1b1   : > { %7420 = vmatmul.mubr.msk.bf16.gmra.mxu1 %vm2878_vm2, %v9029_v50  ;;  %v7927_v50 = vld [vmem:[#allocation4 + $0x48] sm:$0xff]  }
 0x1b2   : > { %7423 = vmatprep.mubr.msk.bf16.mxu1 %vm8074_vm1, %v9025_v41  ;;  %7466 = vmatpush3.bf16.msra.mxu1 %v7925_v24 }
 0x1b3   : > { %7513 = vmatprep.subr.bf16.mxu1 %v9025_v41 }
 0x1b7   : > { %7454 = vmatmul.mubr.msk.bf16.gmra.mxu0 %vm2878_vm2, %v7922_v0 }
 0x1b8   : > { %7457 = vmatprep.mubr.msk.bf16.mxu0 %vm8074_vm1, %v9025_v41 }
 0x1b9   : > { %7424 = vmatmul.mubr.msk.bf16.gmra.mxu1 %vm2878_vm2, %v9049_v4  ;;  %v7929_v4 = vld [vmem:[#allocation4 + $0x50] sm:$0xff]  }
 0x1ba   : > { %7427 = vmatprep.mubr.msk.bf16.mxu1 %vm8074_vm1, %v9025_v41 }
 0x1bf   : > { %7458 = vmatmul.mubr.msk.bf16.gmra.mxu0 %vm2878_vm2, %v7924_v8 }
 0x1c0   : > { %7493 = vmatprep.mubr.msk.bf16.mxu0 %vm8074_vm1, %v9025_v41 }
 0x1c1   : > { %7428 = vmatmul.mubr.msk.bf16.gmra.mxu1 %vm2878_vm2, %v9077_v21  ;;  %v7928_v21 = vld [vmem:[#allocation4 + $0x40] sm:$0xff]  }
 0x1c2   : > { %7431 = vmatprep.mubr.msk.bf16.mxu1 %vm8074_vm1, %v9025_v41 }
 0x1c7   : > { %7494 = vmatmul.mubr.msk.bf16.vlgmr.msra.gmra.mxu0 %vm2878_vm2, %v7927_v50 }
 0x1c8   : > { %7497 = vmatprep.mubr.msk.bf16.mxu0 %vm8074_vm1, %v9025_v41  ;;  %7546 = vmatpush3.bf16.msra.mxu0 %v7938_v40 }
 0x1c9   : > { %7432 = vmatmul.mubr.msk.bf16.gmra.mxu1 %vm2878_vm2, %v9095_v7  ;;  %v7930_v7 = vld [vmem:[#allocation4 + $0x48] sm:$0xff]   ;;  %7547 = vmatprep.subr.bf16.mxu0 %v9025_v41 }
 0x1ca   : > { %7467 = vmatprep.mubr.msk.bf16.mxu1 %vm8074_vm1, %v9025_v41 }
 0x1cc   : > { %7548 = vmatpush3.bf16.msra.mxu0 %v7940_v9 }
 0x1cd   : > { %7561 = vmatprep.subr.bf16.mxu0 %v9025_v41 }
 0x1cf   : > { %7498 = vmatmul.mubr.msk.bf16.gmra.mxu0 %vm2878_vm2, %v7929_v4 }
 0x1d0   : > { %7501 = vmatprep.mubr.msk.bf16.mxu0 %vm8074_vm1, %v9025_v41 }
 0x1d1   : > { %7468 = vmatmul.mubr.msk.bf16.vlgmr.msra.gmra.mxu1 %vm2878_vm2, %v7928_v21 }
 0x1d2   : > { %7471 = vmatprep.mubr.msk.bf16.mxu1 %vm8074_vm1, %v9025_v41  ;;  %7514 = vmatpush3.bf16.msra.mxu1 %v7937_v59 }
 0x1d3   : > { %7515 = vmatprep.subr.bf16.mxu1 %v9025_v41 }
 0x1d6   : > { %7516 = vmatpush3.bf16.msra.mxu1 %v7939_v37 }
 0x1d7   : > { %7502 = vmatmul.mubr.msk.bf16.gmra.mxu0 %vm2878_vm2, %v7931_v20  ;;  %7521 = vmatprep.subr.bf16.mxu1 %v9025_v41 }
 0x1d8   : > { %7505 = vmatprep.mubr.msk.bf16.mxu0 %vm8074_vm1, %v9025_v41 }
 0x1d9   : > { %7472 = vmatmul.mubr.msk.bf16.gmra.mxu1 %vm2878_vm2, %v7930_v7 }
 0x1da   : > { %7475 = vmatprep.mubr.msk.bf16.mxu1 %vm8074_vm1, %v9025_v41 }
 0x1df   : > { %7506 = vmatmul.mubr.msk.bf16.gmra.mxu0 %vm2878_vm2, %v7933_v35 }
 0x1e0   : > { %7509 = vmatprep.mubr.msk.bf16.mxu0 %vm8074_vm1, %v9025_v41 }
 0x1e1   : > { %7476 = vmatmul.mubr.msk.bf16.gmra.mxu1 %vm2878_vm2, %v7932_v10 }
 0x1e2   : > { %7479 = vmatprep.mubr.msk.bf16.mxu1 %vm8074_vm1, %v9025_v41 }
 0x1e6   : > { %v3027_v15 = vpop.f32.mrf.mxu0 }
 0x1e7   : > { %7510 = vmatmul.mubr.msk.bf16.gmra.mxu0 %vm2878_vm2, %v7935_v1 }
 0x1e8   : > { %7549 = vmatprep.mubr.msk.bf16.mxu0 %vm8074_vm1, %v9025_v41  ;;  %v7287_v16 = vpop.f32.mrf.mxu0 }
 0x1e9   : > { %7480 = vmatmul.mubr.msk.bf16.gmra.mxu1 %vm2878_vm2, %v7934_v42 }
 0x1ea   : > { %v3030_v5 = vpop.f32.mrf.mxu0  ;;  %7483 = vmatprep.mubr.msk.bf16.mxu1 %vm8074_vm1, %v9025_v41 }
 0x1ec   : > { %v7288_v27 = vpop.f32.mrf.mxu0 }
 0x1ee   : > { %v2928_v38 = vpop.f32.mrf.mxu1  ;;  %v3035_v19 = vpop.f32.mrf.mxu0 }
 0x1ef   : > { %v9234_v28 = vadd.f32 %v3027_v15, %v2928_v38 }
 0x1f0   : > { %v7261_v44 = vpop.f32.mrf.mxu1  ;;  %v7291_v58 = vpop.f32.mrf.mxu0 }
 0x1f1   : > { %7484 = vmatmul.mubr.msk.bf16.gmra.mxu1 %vm2878_vm2, %v7936_v2 }
 0x1f2   : > { %v2931_v3 = vpop.f32.mrf.mxu1  ;;  %v3038_v26 = vpop.f32.mrf.mxu0  ;;  %7517 = vmatprep.mubr.msk.bf16.mxu1 %vm8074_vm1, %v9025_v41 }
 0x1f3   : > { %v9237_v13 = vadd.f32 %v3030_v5, %v2931_v3 }
 0x1f4   : > { %v7262_v43 = vpop.f32.mrf.mxu1  ;;  %v7292_v51 = vpop.f32.mrf.mxu0 }
 0x1f7   : > { %v2936_v17 = vpop.f32.mrf.mxu1  ;;  %v3043_v18 = vpop.f32.mrf.mxu0 }
 0x1f8   : > { %v9241_v39 = vadd.f32 %v3035_v19, %v2936_v17 }
 0x1f9   : > { %v7265_v29 = vpop.f32.mrf.mxu1  ;;  %v7295_v25 = vpop.f32.mrf.mxu0 }
 0x1fb   : > { %v2939_v22 = vpop.f32.mrf.mxu1  ;;  %v3046_v52 = vpop.f32.mrf.mxu0 }
 0x1fc   : > { %v9243_v46 = vadd.f32 %v3038_v26, %v2939_v22 }
 0x1fd   : > { %v7266_v31 = vpop.f32.mrf.mxu1  ;;  %v7296_v12 = vpop.f32.mrf.mxu0 }
 0x1ff   : > { %v2944_v49 = vpop.f32.mrf.mxu1  ;;  %v3051_v54 = vpop.f32.mrf.mxu0 }
 0x200   : > { %v9245_v36 = vadd.f32 %v3043_v18, %v2944_v49 }
 0x201   : > { %v7269_v14 = vpop.f32.mrf.mxu1  ;;  %v7299_v6 = vpop.f32.mrf.mxu0 }
 0x203   : > { %v2947_v60 = vpop.f32.mrf.mxu1  ;;  %v3054_v32 = vpop.f32.mrf.mxu0 }
 0x204   : > { %v9247_v34 = vadd.f32 %v3046_v52, %v2947_v60 }
 0x205   : > { %v7270_v56 = vpop.f32.mrf.mxu1  ;;  %v7300_v11 = vpop.f32.mrf.mxu0 }
 0x207   : > { %v2952_v55 = vpop.f32.mrf.mxu1  ;;  %v3059_v33 = vpop.f32.mrf.mxu0 }
 0x208   : > { %v9249_v53 = vadd.f32 %v3051_v54, %v2952_v55 }
 0x209   : > { %v7273_v61 = vpop.f32.mrf.mxu1  ;;  %v7303_v23 = vpop.f32.mrf.mxu0 }
 0x20b   : > { %v2955_v48 = vpop.f32.mrf.mxu1  ;;  %v3062_v62 = vpop.f32.mrf.mxu0 }
 0x20c   : > { %v9251_v45 = vadd.f32 %v3054_v32, %v2955_v48 }
 0x20d   : > { %v7274_v57 = vpop.f32.mrf.mxu1  ;;  %v7304_v30 = vpop.f32.mrf.mxu0 }
 0x20f   : > { %v9253_v63 = vpop.f32.mrf.mxu0 }
 0x211   : > { %v7339_v47 = vpop.f32.mrf.mxu0  ;;  %v2960_v0 = vpop.f32.mrf.mxu1 }
 0x212   : > { %v3060_v8 = vadd.f32 %v3059_v33, %v2960_v0 }
 0x213   : > { %v9255_v24 = vpop.f32.mrf.mxu0  ;;  %v7277_v4 = vpop.f32.mrf.mxu1 }
 0x215   : > { %v7340_v50 = vpop.f32.mrf.mxu0  ;;  %v2963_v20 = vpop.f32.mrf.mxu1 }
 0x216   : > { %v3063_v7 = vadd.f32 %v3062_v62, %v2963_v20 }
 0x217   : > { %v9257_v21 = vpop.f32.mrf.mxu0  ;;  %v7278_v59 = vpop.f32.mrf.mxu1 }
 0x219   : > { %v7343_v35 = vpop.f32.mrf.mxu0  ;;  %v3175_v1 = vpop.f32.mrf.mxu1 }
 0x21a   : > { %v3214_v4 = vadd.f32 %v3175_v1, %v9234_v28 }
 0x21b   : > { %v9259_v10 = vpop.f32.mrf.mxu0  ;;  %v7313_v40 = vpop.f32.mrf.mxu1 }
 0x21d   : > { %v7344_v15 = vpop.f32.mrf.mxu0  ;;  %v3178_v42 = vpop.f32.mrf.mxu1 }
 0x21e   : > { %v3215_v40 = vadd.f32 %v3178_v42, %v9237_v13 }
 0x21f   : > { %v9261_v16 = vpop.f32.mrf.mxu0  ;;  %v7314_v37 = vpop.f32.mrf.mxu1 }
 0x220   : > { %v3373_v1 = vadd.f32 %v9255_v24, %v3215_v40 }
 0x221   : > { %v7347_v5 = vpop.f32.mrf.mxu0  ;;  %v3183_v27 = vpop.f32.mrf.mxu1 }
 0x223   : > { %v9263_v9 = vpop.f32.mrf.mxu0  ;;  %v7317_v19 = vpop.f32.mrf.mxu1 }
 0x225   : > { %v7348_v38 = vpop.f32.mrf.mxu0  ;;  %v3186_v58 = vpop.f32.mrf.mxu1 }
 0x226   : > { %v3217_v38 = vadd.f32 %v3186_v58, %v9243_v46 }
 0x227   : > { %v9265_v44 = vpop.f32.mrf.mxu0  ;;  %v7318_v3 = vpop.f32.mrf.mxu1 }
 0x229   : > { %v7351_v2 = vpop.f32.mrf.mxu0  ;;  %v9269_v43 = vpop.f32.mrf.mxu1 }
 0x22b   : > { %v9267_v26 = vpop.f32.mrf.mxu0  ;;  %v7321_v17 = vpop.f32.mrf.mxu1 }
 0x22d   : > { %v7352_v51 = vpop.f32.mrf.mxu0  ;;  %v9271_v29 = vpop.f32.mrf.mxu1 }
 0x22f   : > { %v3365_v18 = vpop.f32.mrf.mxu0  ;;  %v7322_v22 = vpop.f32.mrf.mxu1 }
 0x231   : > { %v7355_v25 = vpop.f32.mrf.mxu0  ;;  %v3199_v31 = vpop.f32.mrf.mxu1 }
 0x233   : > { %v3368_v52 = vpop.f32.mrf.mxu0  ;;  %v7325_v49 = vpop.f32.mrf.mxu1 }
 0x235   : > { %v7356_v12 = vpop.f32.mrf.mxu0  ;;  %v3202_v14 = vpop.f32.mrf.mxu1 }
 0x237   : > { %v9273_v54 = vpop.f32.mrf.mxu0  ;;  %v7326_v60 = vpop.f32.mrf.mxu1 }
 0x239   : > { %v7391_v6 = vpop.f32.mrf.mxu0  ;;  %v3207_v56 = vpop.f32.mrf.mxu1 }
 0x23a   : > { %v3222_v11 = vadd.f32 %v3207_v56, %v3060_v8  ;;  %v3216_v8 = vadd.f32 %v3183_v27, %v9241_v39  ;;  %v3218_v6 = vadd.f32 %v9269_v43, %v9245_v36 }
 0x23b   : > { %v9275_v32 = vpop.f32.mrf.mxu0  ;;  %v7329_v33 = vpop.f32.mrf.mxu1 }
 0x23c   : > { %v9279_v23 = vadd.f32 %v3365_v18, %v3222_v11  ;;  %v3374_v2 = vadd.f32 %v9257_v21, %v3216_v8 }
 0x23d   : > { %v7392_v55 = vpop.f32.mrf.mxu0  ;;  %v3210_v48 = vpop.f32.mrf.mxu1 }
 0x23e   : > { %v3223_v62 = vadd.f32 %v3210_v48, %v3063_v7  ;;  %v3372_v7 = vadd.f32 %v9253_v63, %v3214_v4  ;;  %v3375_v63 = vadd.f32 %v9259_v10, %v3217_v38  ;;  %v3220_v10 = vadd.f32 %v3199_v31, %v9249_v53 }
 0x23f   : > { %v9277_v61 = vpop.f32.mrf.mxu0  ;;  %v7330_v30 = vpop.f32.mrf.mxu1  ;;  %v3219_v48 = vadd.f32 %v9271_v29, %v9247_v34 }
 0x240   : > { %v9283_v0 = vadd.f32 %v3368_v52, %v3223_v62  ;;  %v3376_v62 = vadd.f32 %v9261_v16, %v3218_v6  ;;  %v3221_v30 = vadd.f32 %v3202_v14, %v9251_v45  ;;  %v3378_v36 = vadd.f32 %v9265_v44, %v3220_v10 }
 0x241   : > { %v7395_v57 = vpop.f32.mrf.mxu0  ;;  %v3491_v50 = vpop.f32.mrf.mxu1  ;;  %v3377_v53 = vadd.f32 %v9263_v9, %v3219_v48 }
 0x242   : > { %v3530_v19 = vadd.f32 %v3491_v50, %v3372_v7 }
 0x243   : > { %v9281_v47 = vpop.f32.mrf.mxu0  ;;  %v7365_v35 = vpop.f32.mrf.mxu1 }
 0x244   : > { %v3540_v17 = vmax.f32 %v3530_v19, 0.0 }
 0x245   : > { %v7396_v20 = vpop.f32.mrf.mxu0  ;;  %v3494_v15 = vpop.f32.mrf.mxu1 }
 0x246   : > { %v3531_v18 = vadd.f32 %v3494_v15, %v3373_v1  ;;  %v3379_v15 = vadd.f32 %v9267_v26, %v3221_v30  ;;  %v7943_v30 = vld [vmem:[%s9767_s3 + $0x28] sm:$0xff]  }
 0x247   : > { %v9287_v59 = vpop.f32.mrf.mxu0  ;;  %v7366_v37 = vpop.f32.mrf.mxu1 }
 0x248   : > { %v3541_v52 = vmax.f32 %v3531_v18, 0.0 }
 0x249   : > { %v7399_v5 = vpop.f32.mrf.mxu0  ;;  %v3499_v28 = vpop.f32.mrf.mxu1 }
 0x24a   : > { %v3532_v39 = vadd.f32 %v3499_v28, %v3374_v2 }
 0x24b   : > { %v9293_v3 = vpop.f32.mrf.mxu0  ;;  %v7369_v51 = vpop.f32.mrf.mxu1 }
 0x24c   : > { %v3542_v13 = vmax.f32 %v3532_v39, 0.0 }
 0x24d   : > { %v7400_v27 = vpop.f32.mrf.mxu0  ;;  %v3502_v25 = vpop.f32.mrf.mxu1 }
 0x24e   : > { %v4309_v46 = vmax.f32 %v3540_v17, %v3542_v13  ;;  %v3533_v58 = vadd.f32 %v3502_v25, %v3375_v63  ;;  %v7941_v63 = vld [vmem:[%s9767_s3 + $0x8] sm:$0xff]  }
 0x24f   : > { %v9297_v42 = vpop.f32.mrf.mxu0  ;;  %v7370_v21 = vpop.f32.mrf.mxu1 }
 0x250   : > { %4311 = vst [vmem:[#allocation7] sm:$0xff] %v4309_v46  ;;  %v3543_v12 = vmax.f32 %v3533_v58, 0.0 }
 0x251   : > { %v7403_v22 = vpop.f32.mrf.mxu0  ;;  %v3507_v24 = vpop.f32.mrf.mxu1 }
 0x252   : > { %v4310_v60 = vmax.f32 %v3541_v52, %v3543_v12  ;;  %v3534_v4 = vadd.f32 %v3507_v24, %v3376_v62  ;;  %v7944_v22 = vld [vmem:[%s9767_s3 + $0x68] sm:$0xff]   ;;  %v7942_v24 = vld [vmem:[%s9767_s3] sm:$0xff]  }
 0x253   : > { %v9299_v49 = vpop.f32.mrf.mxu0  ;;  %v7373_v11 = vpop.f32.mrf.mxu1 }
 0x254   : > { %4312 = vst [vmem:[#allocation7 + $0x8] sm:$0xff] %v4310_v60  ;;  %v3544_v16 = vmax.f32 %v3534_v4, 0.0  ;;  %v7946_v60 = vld [vmem:[%s9767_s3 + $0x60] sm:$0xff]  }
 0x255   : > { %v7404_v56 = vpop.f32.mrf.mxu0  ;;  %v3510_v33 = vpop.f32.mrf.mxu1 }
 0x256   : > { %v3535_v40 = vadd.f32 %v3510_v33, %v3377_v53 }
 0x257   : > { %v9304_v55 = vpop.f32.mrf.mxu0  ;;  %v7374_v50 = vpop.f32.mrf.mxu1 }
 0x258   : > { %v3545_v9 = vmax.f32 %v3535_v40, 0.0  ;;  %v7947_v40 = vld [vmem:[%s9767_s3 + $0x38] sm:$0xff]  }
 0x259   : > { %v7407_v57 = vpop.f32.mrf.mxu0  ;;  %v3515_v20 = vpop.f32.mrf.mxu1 }
 0x25a   : > { %v3536_v31 = vadd.f32 %v3515_v20, %v3378_v36 }
 0x25b   : > { %v9311_v43 = vpop.f32.mrf.mxu0  ;;  %v7377_v8 = vpop.f32.mrf.mxu1  ;;  %v4313_v34 = vld [vmem:[#allocation7] ss:$2 sm:$0xff]  ;;  %v4314_v29 = vld [vmem:[#allocation7 + $0x1] ss:$2 sm:$0xff] }
 0x25c   : > { %v3546_v7 = vmax.f32 %v3536_v31, 0.0  ;;  %v4315_v14 = vmax.f32 %v4313_v34, %v4314_v29  ;;  %v7945_v31 = vld [vmem:[%s9767_s3 + $0x20] sm:$0xff]  }
 0x25d   : > { %v7408_v35 = vpop.f32.mrf.mxu0  ;;  %v3518_v5 = vpop.f32.mrf.mxu1 }
 0x25e   : > { %v4321_v44 = vmax.f32 %v3544_v16, %v3546_v7  ;;  %v3537_v37 = vadd.f32 %v3518_v5, %v3379_v15  ;;  %4316 = vst [vmem:[#allocation6] sm:$0xff] %v4315_v14  ;;  %v7948_v7 = vld [vmem:[%s9767_s3 + $0x88] sm:$0xff]   ;;  %v9379_v5 = vld [vmem:[#allocation3 + $0xe0] sm:$0xff] }
 0x25f   : > { %v9315_v45 = vpop.f32.mrf.mxu0  ;;  %v7378_v19 = vpop.f32.mrf.mxu1 }
 0x260   : > { %v3547_v2 = vmax.f32 %v3537_v37, 0.0  ;;  %4323 = vst [vmem:[#allocation7] sm:$0xff] %v4321_v44 }
 0x261   : > { %v7443_v38 = vpop.f32.mrf.mxu0  ;;  %v9319_v26 = vpop.f32.mrf.mxu1 }
 0x262   : > { %v4322_v1 = vmax.f32 %v3545_v9, %v3547_v2  ;;  %v7949_v9 = vld [vmem:[%s9767_s3 + $0x30] sm:$0xff]   ;;  %v7950_v2 = vld [vmem:[%s9767_s3 + $0x80] sm:$0xff]  }
 0x263   : > { %v9317_v28 = vpop.f32.mrf.mxu0  ;;  %v7381_v27 = vpop.f32.mrf.mxu1 }
 0x264   : > { %4324 = vst [vmem:[#allocation7 + $0x8] sm:$0xff] %v4322_v1 }
 0x265   : > { %v7444_v39 = vpop.f32.mrf.mxu0  ;;  %v9323_v17 = vpop.f32.mrf.mxu1  ;;  %v4371_v18 = vld [vmem:[#allocation6 + $0x1] sm:$0x1]  ;;  %v4614_v13 = vld [vmem:[#allocation6 + $0x4] sm:$0x1]  ;;  %v4365_v11 = vld [vmem:[#allocation6] sm:$0x1] }
 0x266   : > { %v4372_v25 = vpack.c.bf16 %v4371_v18, %v4371_v18  ;;  %v4615_v46 = vpack.c.bf16 %v4614_v13, %v4614_v13  ;;  %v4366_v50 = vpack.c.bf16 %v4365_v11, %v4365_v11  ;;  %v4488_v15 = vld [vmem:[#allocation6 + $0x2] sm:$0x1]  ;;  %v4551_v27 = vld [vmem:[#allocation6 + $0x3] sm:$0x1] }
 0x267   : > { %v9321_v51 = vpop.f32.mrf.mxu0  ;;  %v7382_v21 = vpop.f32.mrf.mxu1  ;;  %v4489_v14 = vpack.c.bf16 %v4488_v15, %v4488_v15 }
 0x268   : > { %7518 = vmatmul.mubr.msk.bf16.vlgmr.msra.gmra.mxu1 %vm376_vm0, %v4372_v25  ;;  %7550 = vmatmul.mubr.msk.bf16.vlgmr.msra.gmra.mxu0 %vm376_vm0, %v4615_v46  ;;  %v7951_v25 = vld [vmem:[%s9767_s3 + $0x58] sm:$0xff]   ;;  %v4552_v46 = vpack.c.bf16 %v4551_v27, %v4551_v27  ;;  %v7957_v21 = vld [vmem:[%s9767_s3 + $0xa8] sm:$0xff]  }
 0x269   : > { %v7447_v58 = vpop.f32.mrf.mxu0  ;;  %v9335_v12 = vpop.f32.mrf.mxu1  ;;  %7522 = vmatpush3.bf16.msra.mxu1 %v7941_v63  ;;  %7525 = vmatprep.mubr.msk.bf16.mxu1 %vm8074_vm1, %v9025_v41 }
 0x26a   : > { %7523 = vmatprep.subr.bf16.mxu1 %v9025_v41  ;;  %7562 = vmatpush3.bf16.msra.mxu0 %v7944_v22 }
 0x26b   : > { %v9333_v52 = vpop.f32.mrf.mxu0  ;;  %v7417_v56 = vpop.f32.mrf.mxu1  ;;  %7563 = vmatprep.subr.bf16.mxu0 %v9025_v41  ;;  %7565 = vmatprep.mubr.msk.bf16.mxu0 %vm8074_vm1, %v9025_v41  ;;  %v4325_v10 = vld [vmem:[#allocation7] ss:$2 sm:$0xff]  ;;  %v4326_v33 = vld [vmem:[#allocation7 + $0x1] ss:$2 sm:$0xff] }
 0x26c   : > { %v4327_v62 = vmax.f32 %v4325_v10, %v4326_v33  ;;  %v7952_v56 = vld [vmem:[%s9767_s3 + $0x50] sm:$0xff]   ;;  %v7959_v10 = vld [vmem:[%s9767_s3 + $0xa0] sm:$0xff]  }
 0x26d   : > { %v7448_v6 = vpop.f32.mrf.mxu0  ;;  %v9351_v57 = vpop.f32.mrf.mxu1  ;;  %7524 = vmatpush3.bf16.msra.mxu1 %v7942_v24 }
 0x26e   : > { %7529 = vmatprep.subr.bf16.mxu1 %v9025_v41  ;;  %7564 = vmatpush3.bf16.msra.mxu0 %v7946_v60  ;;  %4328 = vst [vmem:[#allocation6 + $0x8] sm:$0xff] %v4327_v62  ;;  %v3779_v27 = vadd.f32 %v9351_v57, %v9275_v32 }
 0x26f   : > { %v9349_v48 = vpop.f32.mrf.mxu0  ;;  %v7418_v36 = vpop.f32.mrf.mxu1  ;;  %7577 = vmatprep.subr.bf16.mxu0 %v9025_v41 }
 0x270   : > { %7526 = vmatmul.mubr.msk.bf16.vlgmr.msra.gmra.mxu1 %vm376_vm0, %v4366_v50 }
 0x271   : > { %v7451_v4 = vpop.f32.mrf.mxu0  ;;  %v9361_v53 = vpop.f32.mrf.mxu1  ;;  %7530 = vmatpush3.bf16.msra.mxu1 %v7943_v30  ;;  %7533 = vmatprep.mubr.msk.bf16.mxu1 %vm8074_vm1, %v9025_v41 }
 0x272   : > { %7531 = vmatprep.subr.bf16.mxu1 %v9025_v41  ;;  %v7953_v4 = vld [vmem:[%s9767_s3 + $0x78] sm:$0xff]  }
 0x273   : > { %v9359_v20 = vpop.f32.mrf.mxu0  ;;  %v7421_v8 = vpop.f32.mrf.mxu1 }
 0x275   : > { %v7452_v35 = vpop.f32.mrf.mxu0  ;;  %v9371_v29 = vpop.f32.mrf.mxu1  ;;  %7532 = vmatpush3.bf16.msra.mxu1 %v7945_v31  ;;  %v4740_v16 = vld [vmem:[#allocation6 + $0x9] sm:$0x1]  ;;  %v4866_v18 = vld [vmem:[#allocation6 + $0xb] sm:$0x1]  ;;  %v4677_v62 = vld [vmem:[#allocation6 + $0x8] sm:$0x1] }
 0x276   : > { %7537 = vmatprep.subr.bf16.mxu1 %v9379_v5  ;;  %v4741_v41 = vpack.c.bf16 %v4740_v16, %v4740_v16  ;;  %v4867_v58 = vpack.c.bf16 %v4866_v18, %v4866_v18  ;;  %v4678_v36 = vpack.c.bf16 %v4677_v62, %v4677_v62  ;;  %v7954_v16 = vld [vmem:[%s9767_s3 + $0x70] sm:$0xff]   ;;  %v3538_v18 = vadd.f32 %v9319_v26, %v9279_v23 }
 0x277   : > { %v9369_v34 = vpop.f32.mrf.mxu0  ;;  %v7422_v37 = vpop.f32.mrf.mxu1 }
 0x278   : > { %7534 = vmatmul.mubr.msk.bf16.vlgmr.msra.gmra.mxu1 %vm376_vm0, %v4489_v14  ;;  %7566 = vmatmul.mubr.msk.bf16.vlgmr.msra.gmra.mxu0 %vm376_vm0, %v4741_v41  ;;  %v4803_v14 = vld [vmem:[#allocation6 + $0xa] sm:$0x1]  ;;  %v3776_v41 = vadd.f32 %v9335_v12, %v9273_v54  ;;  %v3548_v23 = vmax.f32 %v3538_v18, 0.0 }
 0x279   : > { %v7455_v44 = vpop.f32.mrf.mxu0  ;;  %v9386_v19 = vpop.f32.mrf.mxu1  ;;  %7538 = vmatpush3.bf16.msra.mxu1 %v7947_v40  ;;  %7578 = vmatpush3.bf16.msra.mxu0 %v7948_v7 }
 0x27a   : > { %7539 = vmatprep.subr.bf16.mxu1 %v9379_v5  ;;  %7579 = vmatprep.subr.bf16.mxu0 %v9379_v5  ;;  %v3961_v54 = vadd.f32 %v9315_v45, %v3776_v41  ;;  %v4929_v45 = vld [vmem:[#allocation6 + $0xc] sm:$0x1] }
 0x27b   : > { %v9384_v38 = vpop.f32.mrf.mxu0  ;;  %v7425_v39 = vpop.f32.mrf.mxu1  ;;  %7541 = vmatprep.mubr.msk.bf16.mxu1 %vm8074_vm1, %v9379_v5  ;;  %7581 = vmatprep.mubr.msk.bf16.mxu0 %vm8074_vm1, %v9379_v5  ;;  %v4930_v62 = vpack.c.bf16 %v4929_v45, %v4929_v45 }
 0x27d   : > { %v7456_v1 = vpop.f32.mrf.mxu0  ;;  %v9402_v63 = vpop.f32.mrf.mxu1  ;;  %7540 = vmatpush3.bf16.msra.mxu1 %v7949_v9  ;;  %7580 = vmatpush3.bf16.msra.mxu0 %v7950_v2  ;;  %v7955_v9 = vld [vmem:[%s9767_s3 + $0x98] sm:$0xff]   ;;  %v4804_v2 = vpack.c.bf16 %v4803_v14, %v4803_v14  ;;  %v3792_v14 = vadd.f32 %v9386_v19, %v9287_v59 }
 0x27e   : > { %7553 = vmatprep.subr.bf16.mxu1 %v9379_v5  ;;  %7593 = vmatprep.subr.bf16.mxu0 %v9379_v5 }
 0x27f   : > { %v9400_v13 = vpop.f32.mrf.mxu0  ;;  %v7426_v24 = vpop.f32.mrf.mxu1 }
 0x280   : > { %7542 = vmatmul.mubr.msk.bf16.vlgmr.msra.gmra.mxu1 %vm376_vm0, %v4552_v46  ;;  %7582 = vmatmul.mubr.msk.bf16.vlgmr.msra.gmra.mxu0 %vm376_vm0, %v4867_v58  ;;  %v7956_v46 = vld [vmem:[%s9767_s3 + $0x90] sm:$0xff]  }
 0x281   : > { %v7459_v22 = vpop.f32.mrf.mxu0  ;;  %v9416_v60 = vpop.f32.mrf.mxu1  ;;  %7554 = vmatpush3.bf16.msra.mxu1 %v7951_v25  ;;  %7557 = vmatprep.mubr.msk.bf16.mxu1 %vm8074_vm1, %v9379_v5 }
 0x282   : > { %7555 = vmatprep.subr.bf16.mxu1 %v9379_v5  ;;  %7594 = vmatpush3.bf16.msra.mxu0 %v7957_v21  ;;  %v3962_v21 = vadd.f32 %v9317_v28, %v3779_v27  ;;  %v3784_v28 = vadd.f32 %v9361_v53, %v9277_v61 }
 0x283   : > { %v9414_v6 = vpop.f32.mrf.mxu0  ;;  %v7429_v33 = vpop.f32.mrf.mxu1  ;;  %7595 = vmatprep.subr.bf16.mxu0 %v9379_v5  ;;  %7597 = vmatprep.mubr.msk.bf16.mxu0 %vm8074_vm1, %v9379_v5 }
 0x284   : > { %v3963_v61 = vadd.f32 %v9321_v51, %v3784_v28  ;;  %v3795_v51 = vadd.f32 %v9402_v63, %v9293_v3  ;;  %v3800_v3 = vadd.f32 %v9416_v60, %v9297_v42 }
 0x285   : > { %v7460_v11 = vpop.f32.mrf.mxu0  ;;  %v9430_v50 = vpop.f32.mrf.mxu1  ;;  %7556 = vmatpush3.bf16.msra.mxu1 %v7952_v56  ;;  %v7958_v56 = vld [vmem:[%s9767_s3 + $0xb8] sm:$0xff]  }
 0x286   : > { %7569 = vmatprep.subr.bf16.mxu1 %v9379_v5  ;;  %7596 = vmatpush3.bf16.msra.mxu0 %v7959_v10  ;;  %v3539_v11 = vadd.f32 %v9323_v17, %v9283_v0  ;;  %v7960_v0 = vld [vmem:[%s9767_s3 + $0xb0] sm:$0xff]   ;;  %v3967_v42 = vadd.f32 %v9369_v34, %v3800_v3  ;;  %v3803_v28 = vadd.f32 %v9430_v50, %v9299_v49  ;;  %v7962_v49 = vld [vmem:[%s9767_s3 + $0xd8] sm:$0xff]   ;;  %v7967_v3 = vld [vmem:[%s9767_s3 + $0xe0] sm:$0xff]  }
 0x287   : > { %v4236_v30 = vpop.f32.mrf.mxu0  ;;  %v7430_v35 = vpop.f32.mrf.mxu1  ;;  %7609 = vmatprep.subr.bf16.mxu0 %v9379_v5 }
 0x288   : > { %7558 = vmatmul.mubr.msk.bf16.vlgmr.msra.gmra.mxu1 %vm376_vm0, %v4678_v36  ;;  %v3549_v17 = vmax.f32 %v3539_v11, 0.0 }
 0x289   : > { %v7495_v31 = vpop.f32.mrf.mxu0  ;;  %v9438_v15 = vpop.f32.mrf.mxu1  ;;  %7570 = vmatpush3.bf16.msra.mxu1 %v7953_v4  ;;  %7573 = vmatprep.mubr.msk.bf16.mxu1 %vm8074_vm1, %v9379_v5 }
 0x28a   : > { %7571 = vmatprep.subr.bf16.mxu1 %v9379_v5 }
 0x28b   : > { %v4239_v8 = vpop.f32.mrf.mxu0  ;;  %v7433_v7 = vpop.f32.mrf.mxu1 }
 0x28d   : > { %v7496_v40 = vpop.f32.mrf.mxu0  ;;  %v9450_v37 = vpop.f32.mrf.mxu1  ;;  %7572 = vmatpush3.bf16.msra.mxu1 %v7954_v16 }
 0x28e   : > { %7585 = vmatprep.subr.bf16.mxu1 %v9379_v5 }
 0x28f   : > { %v9448_v44 = vpop.f32.mrf.mxu0  ;;  %v7434_v39 = vpop.f32.mrf.mxu1 }
 0x290   : > { %7574 = vmatmul.mubr.msk.bf16.vlgmr.msra.gmra.mxu1 %vm376_vm0, %v4804_v2 }
 0x291   : > { %v7499_v1 = vpop.f32.mrf.mxu0  ;;  %v4079_v25 = vpop.f32.mrf.mxu1  ;;  %7586 = vmatpush3.bf16.msra.mxu1 %v7955_v9  ;;  %7589 = vmatprep.mubr.msk.bf16.mxu1 %vm8074_vm1, %v9379_v5 }
 0x292   : > { %v4118_v58 = vadd.f32 %v4079_v25, %v3961_v54  ;;  %7587 = vmatprep.subr.bf16.mxu1 %v9379_v5 }
 0x293   : > { %v9460_v12 = vpop.f32.mrf.mxu0  ;;  %v7469_v57 = vpop.f32.mrf.mxu1 }
 0x294   : > { %v4275_v22 = vadd.f32 %v4236_v30, %v4118_v58  ;;  %v3966_v57 = vadd.f32 %v9359_v20, %v3795_v51 }
 0x295   : > { %v7500_v32 = vpop.f32.mrf.mxu0  ;;  %v4082_v26 = vpop.f32.mrf.mxu1  ;;  %7588 = vmatpush3.bf16.msra.mxu1 %v7956_v46 }
 0x296   : > { %v4285_v10 = vmax.f32 %v4275_v22, 0.0  ;;  %v4119_v33 = vadd.f32 %v4082_v26, %v3962_v21  ;;  %7601 = vmatprep.subr.bf16.mxu1 %v9379_v5 }
 0x297   : > { %v4252_v24 = vpop.f32.mrf.mxu0  ;;  %v7470_v30 = vpop.f32.mrf.mxu1 }
 0x298   : > { %v4333_v36 = vmax.f32 %v3548_v23, %v4285_v10  ;;  %v4276_v31 = vadd.f32 %v4239_v8, %v4119_v33  ;;  %7590 = vmatmul.mubr.msk.bf16.vlgmr.msra.gmra.mxu1 %vm376_vm0, %v4930_v62  ;;  %v3787_v8 = vadd.f32 %v9371_v29, %v9281_v47  ;;  %v3965_v47 = vadd.f32 %v9349_v48, %v3792_v14 }
 0x299   : > { %v7503_v4 = vpop.f32.mrf.mxu0  ;;  %v4087_v16 = vpop.f32.mrf.mxu1  ;;  %7602 = vmatpush3.bf16.msra.mxu1 %v7958_v56  ;;  %7605 = vmatprep.mubr.msk.bf16.mxu1 %vm8074_vm1, %v9379_v5 }
 0x29a   : > { %4335 = vst [vmem:[#allocation7] sm:$0xff] %v4333_v36  ;;  %v4286_v40 = vmax.f32 %v4276_v31, 0.0  ;;  %7603 = vmatprep.subr.bf16.mxu1 %v9379_v5  ;;  %v4120_v2 = vadd.f32 %v4087_v16, %v3963_v61  ;;  %v3964_v54 = vadd.f32 %v9333_v52, %v3787_v8 }
 0x29b   : > { %v4255_v35 = vpop.f32.mrf.mxu0  ;;  %v7473_v53 = vpop.f32.mrf.mxu1 }
 0x29c   : > { %v4334_v41 = vmax.f32 %v3549_v17, %v4286_v40  ;;  %v4277_v59 = vadd.f32 %v9448_v44, %v4120_v2 }
 0x29d   : > { %v7504_v7 = vpop.f32.mrf.mxu0  ;;  %v4090_v1 = vpop.f32.mrf.mxu1  ;;  %7604 = vmatpush3.bf16.msra.mxu1 %v7960_v0  ;;  %v3968_v0 = vadd.f32 %v9384_v38, %v3803_v28 }
 0x29e   : > { %4336 = vst [vmem:[#allocation7 + $0x8] sm:$0xff] %v4334_v41  ;;  %7617 = vmatprep.subr.bf16.mxu1 %v9379_v5  ;;  %v4121_v18 = vadd.f32 %v4090_v1, %v3964_v54  ;;  %v4287_v63 = vmax.f32 %v4277_v59, 0.0 }
 0x29f   : > { %v4260_v9 = vpop.f32.mrf.mxu0  ;;  %v7474_v27 = vpop.f32.mrf.mxu1 }
 0x2a0   : > { %v4278_v21 = vadd.f32 %v9460_v12, %v4121_v18  ;;  %v3808_v12 = vadd.f32 %v9438_v15, %v9304_v55  ;;  %v3811_v55 = vadd.f32 %v9450_v37, %v9311_v43  ;;  %v7964_v43 = vld [vmem:[%s9767_s3 + $0xd0] sm:$0xff]  }
 0x2a1   : > { %v7507_v39 = vpop.f32.mrf.mxu0  ;;  %v4095_v19 = vpop.f32.mrf.mxu1 }
 0x2a2   : > { %v4122_v25 = vadd.f32 %v4095_v19, %v3965_v47  ;;  %v4288_v62 = vmax.f32 %v4278_v21, 0.0  ;;  %v3969_v17 = vadd.f32 %v9400_v13, %v3808_v12  ;;  %v7963_v13 = vld [vmem:[%s9767_s3 + $0xc0] sm:$0xff]   ;;  %v7969_v21 = vld [vmem:[%s9767_s3 + $0x108] sm:$0xff]  }
 0x2a3   : > { %v9496_v29 = vpop.f32.mrf.mxu0  ;;  %v7477_v58 = vpop.f32.mrf.mxu1  ;;  %v7975_v12 = vld [vmem:[%s9767_s3 + $0x120] sm:$0xff]  }
 0x2a4   : > { %v4279_v32 = vadd.f32 %v4252_v24, %v4122_v25  ;;  %v7965_v25 = vld [vmem:[%s9767_s3 + $0xe8] sm:$0xff]  }
 0x2a5   : > { %v7508_v46 = vpop.f32.mrf.mxu0  ;;  %v4098_v52 = vpop.f32.mrf.mxu1  ;;  %v4337_v22 = vld [vmem:[#allocation7] ss:$2 sm:$0xff]  ;;  %v4338_v48 = vld [vmem:[#allocation7 + $0x1] ss:$2 sm:$0xff] }
 0x2a6   : > { %v4289_v23 = vmax.f32 %v4279_v32, 0.0  ;;  %v4123_v44 = vadd.f32 %v4098_v52, %v3966_v57  ;;  %v4339_v56 = vmax.f32 %v4337_v22, %v4338_v48  ;;  %v7966_v46 = vld [vmem:[%s9767_s3 + $0xf8] sm:$0xff]  }
 0x2a7   : > { %v4268_v45 = vpop.f32.mrf.mxu0  ;;  %v7478_v11 = vpop.f32.mrf.mxu1 }
 0x2a8   : > { %v4345_v10 = vmax.f32 %v4287_v63, %v4289_v23  ;;  %v4280_v33 = vadd.f32 %v4255_v35, %v4123_v44  ;;  %4340 = vst [vmem:[#allocation6 + $0x10] sm:$0xff] %v4339_v56  ;;  %v7961_v35 = vld [vmem:[%s9767_s3 + $0xc8] sm:$0xff]   ;;  %v7968_v63 = vld [vmem:[%s9767_s3 + $0xf0] sm:$0xff]   ;;  %v7970_v23 = vld [vmem:[%s9767_s3 + $0x118] sm:$0xff]  }
 0x2a9   : > { %v7511_v26 = vpop.f32.mrf.mxu0  ;;  %v4103_v20 = vpop.f32.mrf.mxu1  ;;  %v7971_v56 = vld [vmem:[%s9767_s3 + $0x100] sm:$0xff]   ;;  %v7972_v11 = vld [vmem:[%s9767_s3 + $0x110] sm:$0xff]  }
 0x2aa   : > { %v4290_v4 = vmax.f32 %v4280_v33, 0.0  ;;  %4347 = vst [vmem:[#allocation7] sm:$0xff] %v4345_v10  ;;  %v4124_v31 = vadd.f32 %v4103_v20, %v3967_v42  ;;  %v7974_v42 = vld [vmem:[%s9767_s3 + $0x138] sm:$0xff]  }
 0x2ab   : > { %v4271_v24 = vpop.f32.mrf.mxu0  ;;  %v7481_v30 = vpop.f32.mrf.mxu1 }
 0x2ac   : > { %v4346_v36 = vmax.f32 %v4288_v62, %v4290_v4  ;;  %v4281_v50 = vadd.f32 %v4260_v9, %v4124_v31  ;;  %v3970_v9 = vadd.f32 %v9414_v6, %v3811_v55  ;;  %v7973_v4 = vld [vmem:[%s9767_s3 + $0x128] sm:$0xff]   ;;  %v7976_v30 = vld [vmem:[%s9767_s3 + $0x130] sm:$0xff]  }
 0x2ad   : > { %v7512_v60 = vpop.f32.mrf.mxu0  ;;  %v4106_v16 = vpop.f32.mrf.mxu1  ;;  %v7981_v55 = vld [vmem:[%s9767_s3 + $0x168] sm:$0xff]  }
 0x2ae   : > { %4348 = vst [vmem:[#allocation7 + $0x8] sm:$0xff] %v4346_v36  ;;  %v4125_v8 = vadd.f32 %v4106_v16, %v3968_v0  ;;  %v4291_v37 = vmax.f32 %v4281_v50, 0.0  ;;  %v7977_v16 = vld [vmem:[%s9767_s3 + $0x148] sm:$0xff]   ;;  %v7982_v50 = vld [vmem:[%s9767_s3 + $0x178] sm:$0xff]  }
 0x2af   : > { %v7482_v34 = vpop.f32.mrf.mxu1  ;;  %v4992_v40 = vld [vmem:[#allocation6 + $0x10] sm:$0x1]  ;;  %v5055_v7 = vld [vmem:[#allocation6 + $0x11] sm:$0x1]  ;;  %v5118_v2 = vld [vmem:[#allocation6 + $0x12] sm:$0x1] }
 0x2b0   : > { %v4993_v15 = vpack.c.bf16 %v4992_v40, %v4992_v40  ;;  %v5056_v61 = vpack.c.bf16 %v5055_v7, %v5055_v7  ;;  %v5181_v39 = vld [vmem:[#allocation6 + $0x13] sm:$0x1]  ;;  %v4282_v54 = vadd.f32 %v9496_v29, %v4125_v8  ;;  %v5119_v18 = vpack.c.bf16 %v5118_v2, %v5118_v2  ;;  %v5244_v22 = vld [vmem:[#allocation6 + $0x14] sm:$0x1]  ;;  %v7980_v40 = vld [vmem:[%s9767_s3 + $0x150] sm:$0xff]  }
 0x2b1   : > { %v4111_v53 = vpop.f32.mrf.mxu1  ;;  %v5182_v57 = vpack.c.bf16 %v5181_v39, %v5181_v39  ;;  %v5245_v44 = vpack.c.bf16 %v5244_v22, %v5244_v22  ;;  %v7984_v8 = vld [vmem:[%s9767_s3 + $0x170] sm:$0xff]  }
 0x2b2   : > { %v4126_v14 = vadd.f32 %v4111_v53, %v3969_v17  ;;  %7598 = vmatmul.mubr.msk.bf16.vlgmr.msra.gmra.mxu0 %vm376_vm0, %v4993_v15  ;;  %7606 = vmatmul.mubr.msk.bf16.vlgmr.msra.gmra.mxu1 %vm376_vm0, %v5056_v61  ;;  %v4292_v29 = vmax.f32 %v4282_v54, 0.0  ;;  %v7979_v17 = vld [vmem:[%s9767_s3 + $0x140] sm:$0xff]   ;;  %v7988_v39 = vld [vmem:[%s9769_s5 + $0x30] sm:$0xff]   ;;  %v7991_v54 = vld [vmem:[%s9769_s5 + $0x18] sm:$0xff]  }
 0x2b3   : > { %v7485_v38 = vpop.f32.mrf.mxu1  ;;  %7610 = vmatpush3.bf16.msra.mxu0 %v7961_v35  ;;  %7618 = vmatpush3.bf16.msra.mxu1 %v7962_v49  ;;  %v7978_v35 = vld [vmem:[%s9767_s3 + $0x158] sm:$0xff]   ;;  %v7983_v53 = vld [vmem:[%s9767_s3 + $0x160] sm:$0xff]  }
 0x2b4   : > { %v4283_v41 = vadd.f32 %v4268_v45, %v4126_v14  ;;  %7611 = vmatprep.subr.bf16.mxu0 %v9379_v5  ;;  %7619 = vmatprep.subr.bf16.mxu1 %v9379_v5 }
 0x2b5   : > { %v4114_v1 = vpop.f32.mrf.mxu1  ;;  %7613 = vmatprep.mubr.msk.bf16.mxu0 %vm8074_vm1, %v9379_v5  ;;  %7621 = vmatprep.mubr.msk.bf16.mxu1 %vm8074_vm1, %v9379_v5  ;;  %v4349_v27 = vld [vmem:[#allocation7] ss:$2 sm:$0xff]  ;;  %v4350_v51 = vld [vmem:[#allocation7 + $0x1] ss:$2 sm:$0xff] }
 0x2b6   : > { %v4293_v47 = vmax.f32 %v4283_v41, 0.0  ;;  %v4127_v59 = vadd.f32 %v4114_v1, %v3970_v9  ;;  %v4351_v6 = vmax.f32 %v4349_v27, %v4350_v51  ;;  %v7986_v41 = vld [vmem:[%s9767_s3 + $0x180] sm:$0xff]   ;;  %v7987_v1 = vld [vmem:[%s9769_s5 + $0x38] sm:$0xff]   ;;  %v7989_v27 = vld [vmem:[%s9769_s5 + $0x28] sm:$0xff]  }
 0x2b7   : > { %v7486_v19 = vpop.f32.mrf.mxu1  ;;  %7612 = vmatpush3.bf16.msra.mxu0 %v7963_v13  ;;  %7620 = vmatpush3.bf16.msra.mxu1 %v7964_v43  ;;  %v7985_v13 = vld [vmem:[%s9767_s3 + $0x188] sm:$0xff]   ;;  %v7990_v51 = vld [vmem:[%s9769_s5 + $0x20] sm:$0xff]  }
 0x2b8   : > { %v4357_v58 = vmax.f32 %v4291_v37, %v4293_v47  ;;  %v4284_v32 = vadd.f32 %v4271_v24, %v4127_v59  ;;  %7625 = vmatprep.subr.bf16.mxu0 %v9379_v5  ;;  %7633 = vmatprep.subr.bf16.mxu1 %v9379_v5  ;;  %4352 = vst [vmem:[#allocation6 + $0x18] sm:$0xff] %v4351_v6  ;;  %v7992_v6 = vld [vmem:[%s9769_s5 + $0x10] sm:$0xff]  }
 0x2ba   : > { %v4294_v45 = vmax.f32 %v4284_v32, 0.0  ;;  %7614 = vmatmul.mubr.msk.bf16.vlgmr.msra.gmra.mxu0 %vm376_vm0, %v5119_v18  ;;  %7622 = vmatmul.mubr.msk.bf16.vlgmr.msra.gmra.mxu1 %vm376_vm0, %v5182_v57  ;;  %4359 = vst [vmem:[#allocation7] sm:$0xff] %v4357_v58 }
 0x2bb   : > { %7626 = vmatpush3.bf16.msra.mxu0 %v7965_v25  ;;  %7634 = vmatpush3.bf16.msra.mxu1 %v7966_v46 }
 0x2bc   : > { %v4358_v52 = vmax.f32 %v4292_v29, %v4294_v45  ;;  %7627 = vmatprep.subr.bf16.mxu0 %v9379_v5  ;;  %7635 = vmatprep.subr.bf16.mxu1 %v9379_v5  ;;  %v7993_v45 = vld [vmem:[%s9769_s5 + $0x8] sm:$0xff]  }
 0x2bd   : > { %7629 = vmatprep.mubr.msk.bf16.mxu0 %vm8074_vm1, %v9379_v5  ;;  %7637 = vmatprep.mubr.msk.bf16.mxu1 %vm8074_vm1, %v9379_v5 }
 0x2be   : > { %4360 = vst [vmem:[#allocation7 + $0x8] sm:$0xff] %v4358_v52  ;;  %v7995_v52 = vld [vmem:[%s9771_s7 + $0x38] sm:$0xff]  }
 0x2bf   : > { %7628 = vmatpush3.bf16.msra.mxu0 %v7967_v3  ;;  %7636 = vmatpush3.bf16.msra.mxu1 %v7968_v63  ;;  %v5307_v48 = vld [vmem:[#allocation6 + $0x18] sm:$0x1]  ;;  %v5370_v10 = vld [vmem:[#allocation6 + $0x19] sm:$0x1]  ;;  %v5433_v33 = vld [vmem:[#allocation6 + $0x1a] sm:$0x1] }
 0x2c0   : > { %v5308_v26 = vpack.c.bf16 %v5307_v48, %v5307_v48  ;;  %7641 = vmatprep.subr.bf16.mxu0 %v9379_v5  ;;  %7649 = vmatprep.subr.bf16.mxu1 %v9379_v5  ;;  %v5371_v60 = vpack.c.bf16 %v5370_v10, %v5370_v10  ;;  %v5434_v28 = vpack.c.bf16 %v5433_v33, %v5433_v33  ;;  %v5496_v36 = vld [vmem:[#allocation6 + $0x1b] sm:$0x1]  ;;  %v5559_v31 = vld [vmem:[#allocation6 + $0x1c] sm:$0x1]  ;;  %v7994_v63 = vld [vmem:[%s9769_s5] sm:$0xff]  }
 0x2c1   : > { %v5497_v0 = vpack.c.bf16 %v5496_v36, %v5496_v36  ;;  %v5560_v34 = vpack.c.bf16 %v5559_v31, %v5559_v31  ;;  %v7996_v48 = vld [vmem:[%s9771_s7 + $0x30] sm:$0xff]  }
 0x2c2   : > { %7630 = vmatmul.mubr.msk.bf16.vlgmr.msra.gmra.mxu0 %vm376_vm0, %v5245_v44  ;;  %7638 = vmatmul.mubr.msk.bf16.vlgmr.msra.gmra.mxu1 %vm376_vm0, %v5308_v26 }
 0x2c3   : > { %7642 = vmatpush3.bf16.msra.mxu0 %v7969_v21  ;;  %7650 = vmatpush3.bf16.msra.mxu1 %v7970_v23 }
 0x2c4   : > { %7643 = vmatprep.subr.bf16.mxu0 %v9379_v5  ;;  %7651 = vmatprep.subr.bf16.mxu1 %v9379_v5 }
 0x2c5   : > { %7645 = vmatprep.mubr.msk.bf16.mxu0 %vm8074_vm1, %v9379_v5  ;;  %7653 = vmatprep.mubr.msk.bf16.mxu1 %vm8074_vm1, %v9379_v5  ;;  %v4361_v24 = vld [vmem:[#allocation7] ss:$2 sm:$0xff]  ;;  %v4362_v20 = vld [vmem:[#allocation7 + $0x1] ss:$2 sm:$0xff] }
 0x2c6   : > { %v4363_v62 = vmax.f32 %v4361_v24, %v4362_v20  ;;  %v7998_v20 = vld [vmem:[%s9771_s7 + $0x20] sm:$0xff]  }
 0x2c7   : > { %7644 = vmatpush3.bf16.msra.mxu0 %v7971_v56  ;;  %7652 = vmatpush3.bf16.msra.mxu1 %v7972_v11  ;;  %v7997_v56 = vld [vmem:[%s9771_s7 + $0x28] sm:$0xff]  }
 0x2c8   : > { %7657 = vmatprep.subr.bf16.mxu0 %v9379_v5  ;;  %7665 = vmatprep.subr.bf16.mxu1 %v9379_v5  ;;  %4364 = vst [vmem:[#allocation6 + $0x20] sm:$0xff] %v4363_v62 }
 0x2ca   : > { %7646 = vmatmul.mubr.msk.bf16.vlgmr.msra.gmra.mxu0 %vm376_vm0, %v5371_v60  ;;  %7654 = vmatmul.mubr.msk.bf16.vlgmr.msra.gmra.mxu1 %vm376_vm0, %v5434_v28 }
 0x2cb   : > { %7658 = vmatpush3.bf16.msra.mxu0 %v7973_v4  ;;  %7666 = vmatpush3.bf16.msra.mxu1 %v7974_v42 }
 0x2cc   : > { %7659 = vmatprep.subr.bf16.mxu0 %v9379_v5  ;;  %7667 = vmatprep.subr.bf16.mxu1 %v9379_v5 }
 0x2cd   : > { %7661 = vmatprep.mubr.msk.bf16.mxu0 %vm8074_vm1, %v9379_v5  ;;  %7669 = vmatprep.mubr.msk.bf16.mxu1 %vm8074_vm1, %v9379_v5 }
 0x2cf   : > { %7660 = vmatpush3.bf16.msra.mxu0 %v7975_v12  ;;  %7668 = vmatpush3.bf16.msra.mxu1 %v7976_v30  ;;  %v5622_v7 = vld [vmem:[#allocation6 + $0x20] sm:$0x1]  ;;  %v5685_v49 = vld [vmem:[#allocation6 + $0x21] sm:$0x1]  ;;  %v5748_v14 = vld [vmem:[#allocation6 + $0x22] sm:$0x1] }
 0x2d0   : > { %7673 = vmatprep.subr.bf16.mxu0 %v9379_v5  ;;  %7681 = vmatprep.subr.bf16.mxu1 %v9379_v5  ;;  %v5623_v15 = vpack.c.bf16 %v5622_v7, %v5622_v7  ;;  %v5686_v61 = vpack.c.bf16 %v5685_v49, %v5685_v49  ;;  %v5811_v38 = vld [vmem:[#allocation6 + $0x23] sm:$0x1]  ;;  %v5749_v43 = vpack.c.bf16 %v5748_v14, %v5748_v14  ;;  %v5874_v9 = vld [vmem:[#allocation6 + $0x24] sm:$0x1] }
 0x2d1   : > { %v5812_v37 = vpack.c.bf16 %v5811_v38, %v5811_v38  ;;  %v5875_v2 = vpack.c.bf16 %v5874_v9, %v5874_v9  ;;  %v7999_v12 = vld [vmem:[%s9771_s7 + $0x18] sm:$0xff]  }
 0x2d2   : > { %7662 = vmatmul.mubr.msk.bf16.vlgmr.msra.gmra.mxu0 %vm376_vm0, %v5497_v0  ;;  %7670 = vmatmul.mubr.msk.bf16.vlgmr.msra.gmra.mxu1 %vm376_vm0, %v5560_v34  ;;  %v8000_v0 = vld [vmem:[%s9771_s7 + $0x10] sm:$0xff]  }
 0x2d3   : > { %7674 = vmatpush3.bf16.msra.mxu0 %v7977_v16  ;;  %7682 = vmatpush3.bf16.msra.mxu1 %v7978_v35 }
 0x2d4   : > { %7675 = vmatprep.subr.bf16.mxu0 %v9379_v5  ;;  %7683 = vmatprep.subr.bf16.mxu1 %v9379_v5 }
 0x2d5   : > { %7677 = vmatprep.mubr.msk.bf16.mxu0 %vm8074_vm1, %v9379_v5  ;;  %7685 = vmatprep.mubr.msk.bf16.mxu1 %vm8074_vm1, %v9379_v5 }
 0x2d7   : > { %7676 = vmatpush3.bf16.msra.mxu0 %v7979_v17  ;;  %7684 = vmatpush3.bf16.msra.mxu1 %v7980_v40 }
 0x2d8   : > { %7689 = vmatprep.subr.bf16.mxu0 %v9379_v5  ;;  %7697 = vmatprep.subr.bf16.mxu1 %v9379_v5 }
 0x2da   : > { %7678 = vmatmul.mubr.msk.bf16.vlgmr.msra.gmra.mxu0 %vm376_vm0, %v5623_v15  ;;  %7686 = vmatmul.mubr.msk.bf16.vlgmr.msra.gmra.mxu1 %vm376_vm0, %v5686_v61 }
 0x2db   : > { %7690 = vmatpush3.bf16.msra.mxu0 %v7981_v55  ;;  %7698 = vmatpush3.bf16.msra.mxu1 %v7982_v50 }
 0x2dc   : > { %7691 = vmatprep.subr.bf16.mxu0 %v9379_v5  ;;  %7699 = vmatprep.subr.bf16.mxu1 %v9379_v5 }
 0x2dd   : > { %7693 = vmatprep.mubr.msk.bf16.mxu0 %vm8074_vm1, %v9379_v5  ;;  %7701 = vmatprep.mubr.msk.bf16.mxu1 %vm8074_vm1, %v9379_v5 }
 0x2df   : > { %7692 = vmatpush3.bf16.msra.mxu0 %v7983_v53  ;;  %7700 = vmatpush3.bf16.msra.mxu1 %v7984_v8 }
 0x2e0   : > { %7705 = vmatprep.subr.bf16.mxu0 %v9379_v5  ;;  %7713 = vmatprep.subr.bf16.mxu1 %v9379_v5 }
 0x2e2   : > { %7694 = vmatmul.mubr.msk.bf16.vlgmr.msra.gmra.mxu0 %vm376_vm0, %v5749_v43  ;;  %7702 = vmatmul.mubr.msk.bf16.vlgmr.msra.gmra.mxu1 %vm376_vm0, %v5812_v37 }
 0x2e3   : > { %7706 = vmatpush3.bf16.msra.mxu0 %v7985_v13  ;;  %7709 = vmatprep.mubr.msk.bf16.mxu0 %vm8074_vm1, %v9379_v5 }
 0x2e4   : > { %7707 = vmatprep.subr.bf16.mxu0 %v9379_v5  ;;  %7729 = vmatprep.mubr.msk.bf16.mxu1 %vm8074_vm1, %v9379_v5 }
 0x2e5   : > { %7714 = vmatpush3.bf16.msra.mxu1 %v7987_v1 }
 0x2e6   : > { %7715 = vmatprep.subr.bf16.mxu1 %v9379_v5 }
 0x2e7   : > { %7708 = vmatpush3.bf16.msra.mxu0 %v7986_v41 }
 0x2e8   : > { %7733 = vmatprep.subr.bf16.mxu0 %v9379_v5 }
 0x2e9   : > { %7716 = vmatpush3.bf16.msra.mxu1 %v7988_v39 }
 0x2ea   : > { %7710 = vmatmul.mubr.msk.bf16.vlgmr.msra.gmra.mxu0 %vm376_vm0, %v5875_v2  ;;  %7717 = vmatprep.subr.bf16.mxu1 %v9379_v5  ;;  %vm6152_vm0 = vcmask 1040384  }
 0x2eb   : > { %7749 = vmatprep.mubr.msk.bf16.mxu0 %vm8074_vm1, %v9379_v5  ;;  %7734 = vmatpush3.bf16.msra.mxu0 %v7995_v52 }
 0x2ec   : > { %7735 = vmatprep.subr.bf16.mxu0 %v9379_v5 }
 0x2ed   : > { %7718 = vmatpush3.bf16.msra.mxu1 %v7989_v27 }
 0x2ee   : > { %7719 = vmatprep.subr.bf16.mxu1 %v9379_v5 }
 0x2ef   : > { %7736 = vmatpush3.bf16.msra.mxu0 %v7996_v48 }
 0x2f0   : > { %7737 = vmatprep.subr.bf16.mxu0 %v9379_v5 }
 0x2f1   : > { %7720 = vmatpush3.bf16.msra.mxu1 %v7990_v51 }
 0x2f2   : > { %7721 = vmatprep.subr.bf16.mxu1 %v9379_v5 }
 0x2f3   : > { %7738 = vmatpush3.bf16.msra.mxu0 %v7997_v56 }
 0x2f4   : > { %7739 = vmatprep.subr.bf16.mxu0 %v9379_v5 }
 0x2f5   : > { %7722 = vmatpush3.bf16.msra.mxu1 %v7991_v54 }
 0x2f6   : > { %7723 = vmatprep.subr.bf16.mxu1 %v9379_v5 }
 0x2f7   : > { %7740 = vmatpush3.bf16.msra.mxu0 %v7998_v20 }
 0x2f8   : > { %7741 = vmatprep.subr.bf16.mxu0 %v9379_v5 }
 0x2f9   : > { %7724 = vmatpush3.bf16.msra.mxu1 %v7992_v6 }
 0x2fa   : > { %7725 = vmatprep.subr.bf16.mxu1 %v9379_v5 }
 0x2fb   : > { %7742 = vmatpush3.bf16.msra.mxu0 %v7999_v12 }
 0x2fc   : > { %7743 = vmatprep.subr.bf16.mxu0 %v9379_v5 }
 0x2fd   : > { %7726 = vmatpush3.bf16.msra.mxu1 %v7993_v45 }
 0x2fe   : > { %7727 = vmatprep.subr.bf16.mxu1 %v9379_v5 }
 0x2ff   : > { %7744 = vmatpush3.bf16.msra.mxu0 %v8000_v0 }
 0x300   : > { %7745 = vmatprep.subr.bf16.mxu0 %v9379_v5 }
 0x301   : > { %7728 = vmatpush3.bf16.msra.mxu1 %v7994_v63 }
 0x328   : > { %v4427_v47 = vpop.f32.mrf.mxu1  ;;  %v4670_v59 = vpop.f32.mrf.mxu0 }
 0x32a   : > { %v7519_v19 = vpop.f32.mrf.mxu1  ;;  %v7551_v18 = vpop.f32.mrf.mxu0 }
 0x32c   : > { %v4430_v25 = vpop.f32.mrf.mxu1  ;;  %v4673_v46 = vpop.f32.mrf.mxu0 }
 0x32e   : > { %v7520_v58 = vpop.f32.mrf.mxu1  ;;  %v7552_v32 = vpop.f32.mrf.mxu0 }
 0x330   : > { %v4482_v57 = vpop.f32.mrf.mxu1 }
 0x331   : > { %v4483_v29 = vadd.f32 %v4482_v57, %v4427_v47 }
 0x332   : > { %v7527_v3 = vpop.f32.mrf.mxu1 }
 0x334   : > { %v4485_v22 = vpop.f32.mrf.mxu1 }
 0x336   : > { %v7528_v21 = vpop.f32.mrf.mxu1 }
 0x338   : > { %v4544_v23 = vpop.f32.mrf.mxu1  ;;  %v4796_v44 = vpop.f32.mrf.mxu0 }
 0x339   : > { %v4550_v26 = vadd.f32 %v4544_v23, %v4483_v29 }
 0x33a   : > { %v7535_v11 = vpop.f32.mrf.mxu1  ;;  %v7567_v10 = vpop.f32.mrf.mxu0 }
 0x33c   : > { %v4547_v33 = vpop.f32.mrf.mxu1  ;;  %v4799_v24 = vpop.f32.mrf.mxu0 }
 0x33e   : > { %v7536_v62 = vpop.f32.mrf.mxu1  ;;  %v7568_v4 = vpop.f32.mrf.mxu0 }
 0x340   : > { %v4607_v42 = vpop.f32.mrf.mxu1  ;;  %v4922_v60 = vpop.f32.mrf.mxu0 }
 0x341   : > { %v4613_v28 = vadd.f32 %v4607_v42, %v4550_v26 }
 0x342   : > { %v7543_v30 = vpop.f32.mrf.mxu1  ;;  %v7583_v36 = vpop.f32.mrf.mxu0 }
 0x343   : > { %v4676_v31 = vadd.f32 %v4670_v59, %v4613_v28 }
 0x344   : > { %v4610_v16 = vpop.f32.mrf.mxu1  ;;  %v4925_v35 = vpop.f32.mrf.mxu0 }
 0x346   : > { %v7544_v34 = vpop.f32.mrf.mxu1  ;;  %v7584_v17 = vpop.f32.mrf.mxu0 }
 0x348   : > { %v4733_v40 = vpop.f32.mrf.mxu1 }
 0x349   : > { %v4739_v7 = vadd.f32 %v4733_v40, %v4676_v31 }
 0x34a   : > { %v7559_v49 = vpop.f32.mrf.mxu1 }
 0x34b   : > { %v4802_v55 = vadd.f32 %v4796_v44, %v4739_v7 }
 0x34c   : > { %v4736_v50 = vpop.f32.mrf.mxu1 }
 0x34e   : > { %v7560_v15 = vpop.f32.mrf.mxu1 }
 0x350   : > { %v4859_v61 = vpop.f32.mrf.mxu1 }
 0x351   : > { %v4865_v53 = vadd.f32 %v4859_v61, %v4802_v55 }
 0x352   : > { %v7575_v8 = vpop.f32.mrf.mxu1 }
 0x353   : > { %v4928_v14 = vadd.f32 %v4922_v60, %v4865_v53 }
 0x354   : > { %v4862_v38 = vpop.f32.mrf.mxu1 }
 0x356   : > { %v7576_v13 = vpop.f32.mrf.mxu1 }
 0x358   : > { %v4985_v43 = vpop.f32.mrf.mxu1 }
 0x359   : > { %v4991_v58 = vadd.f32 %v4985_v43, %v4928_v14 }
 0x35a   : > { %v7591_v37 = vpop.f32.mrf.mxu1 }
 0x35c   : > { %v4988_v41 = vpop.f32.mrf.mxu1 }
 0x35e   : > { %v7592_v9 = vpop.f32.mrf.mxu1 }
 0x372   : > { %v5048_v2 = vpop.f32.mrf.mxu0  ;;  %v5111_v1 = vpop.f32.mrf.mxu1 }
 0x373   : > { %v5054_v29 = vadd.f32 %v5048_v2, %v4991_v58 }
 0x374   : > { %v7599_v39 = vpop.f32.mrf.mxu0  ;;  %v7607_v27 = vpop.f32.mrf.mxu1 }
 0x375   : > { %v5117_v22 = vadd.f32 %v5111_v1, %v5054_v29  ;;  %v8002_v29 = vld [vmem:[%s9771_s7] sm:$0xff]  }
 0x376   : > { %v5051_v51 = vpop.f32.mrf.mxu0  ;;  %v5114_v54 = vpop.f32.mrf.mxu1 }
 0x378   : > { %v7600_v5 = vpop.f32.mrf.mxu0  ;;  %v7608_v47 = vpop.f32.mrf.mxu1 }
 0x37a   : > { %v5174_v59 = vpop.f32.mrf.mxu0  ;;  %v5237_v6 = vpop.f32.mrf.mxu1 }
 0x37b   : > { %v5180_v23 = vadd.f32 %v5174_v59, %v5117_v22  ;;  %v5937_v59 = vld [vmem:[%s9768_s4] sm:$0x1] }
 0x37c   : > { %v7615_v19 = vpop.f32.mrf.mxu0  ;;  %v7623_v18 = vpop.f32.mrf.mxu1 }
 0x37d   : > { %v5243_v10 = vadd.f32 %v5237_v6, %v5180_v23 }
 0x37e   : > { %v5177_v25 = vpop.f32.mrf.mxu0  ;;  %v5240_v46 = vpop.f32.mrf.mxu1 }
 0x380   : > { %v7616_v32 = vpop.f32.mrf.mxu0  ;;  %v7624_v57 = vpop.f32.mrf.mxu1 }
 0x381   : > { %v8001_v57 = vld [vmem:[%s9771_s7 + $0x8] sm:$0xff]  }
 0x382   : > { %v5300_v45 = vpop.f32.mrf.mxu0  ;;  %v5363_v3 = vpop.f32.mrf.mxu1  ;;  %7746 = vmatpush3.bf16.msra.mxu0 %v8001_v57 }
 0x383   : > { %v5306_v20 = vadd.f32 %v5300_v45, %v5243_v10  ;;  %v8010_v45 = vld [vmem:[#allocation3 + $0xe0] sm:$0xff] }
 0x384   : > { %v7631_v63 = vpop.f32.mrf.mxu0  ;;  %v7639_v52 = vpop.f32.mrf.mxu1  ;;  %7747 = vmatprep.subr.bf16.mxu0 %v8010_v45 }
 0x385   : > { %v5369_v28 = vadd.f32 %v5363_v3, %v5306_v20  ;;  %v5957_v3 = vld [vmem:[%s9770_s6] sm:$0x1] }
 0x386   : > { %v5303_v48 = vpop.f32.mrf.mxu0  ;;  %v5366_v21 = vpop.f32.mrf.mxu1  ;;  %7748 = vmatpush3.bf16.msra.mxu0 %v8002_v29 }
 0x388   : > { %v7632_v44 = vpop.f32.mrf.mxu0  ;;  %v7640_v26 = vpop.f32.mrf.mxu1 }
 0x38a   : > { %v5426_v56 = vpop.f32.mrf.mxu0  ;;  %v5489_v11 = vpop.f32.mrf.mxu1 }
 0x38b   : > { %v5432_v36 = vadd.f32 %v5426_v56, %v5369_v28 }
 0x38c   : > { %v7647_v33 = vpop.f32.mrf.mxu0  ;;  %v7655_v24 = vpop.f32.mrf.mxu1 }
 0x38d   : > { %v5495_v34 = vadd.f32 %v5489_v11, %v5432_v36 }
 0x38e   : > { %v5429_v62 = vpop.f32.mrf.mxu0  ;;  %v5492_v4 = vpop.f32.mrf.mxu1 }
 0x390   : > { %v7648_v42 = vpop.f32.mrf.mxu0  ;;  %v7656_v60 = vpop.f32.mrf.mxu1 }
 0x392   : > { %v5552_v12 = vpop.f32.mrf.mxu0  ;;  %v5615_v30 = vpop.f32.mrf.mxu1 }
 0x393   : > { %v5558_v7 = vadd.f32 %v5552_v12, %v5495_v34 }
 0x394   : > { %v7663_v31 = vpop.f32.mrf.mxu0  ;;  %v7671_v16 = vpop.f32.mrf.mxu1 }
 0x395   : > { %v5621_v61 = vadd.f32 %v5615_v30, %v5558_v7 }
 0x396   : > { %v5555_v35 = vpop.f32.mrf.mxu0  ;;  %v5618_v0 = vpop.f32.mrf.mxu1 }
 0x398   : > { %v7664_v17 = vpop.f32.mrf.mxu0  ;;  %v7672_v40 = vpop.f32.mrf.mxu1 }
 0x39a   : > { %v5678_v49 = vpop.f32.mrf.mxu0  ;;  %v5741_v55 = vpop.f32.mrf.mxu1 }
 0x39b   : > { %v5684_v14 = vadd.f32 %v5678_v49, %v5621_v61 }
 0x39c   : > { %v7679_v50 = vpop.f32.mrf.mxu0  ;;  %v7687_v15 = vpop.f32.mrf.mxu1 }
 0x39d   : > { %v5747_v41 = vadd.f32 %v5741_v55, %v5684_v14 }
 0x39e   : > { %v5681_v53 = vpop.f32.mrf.mxu0  ;;  %v5744_v8 = vpop.f32.mrf.mxu1 }
 0x3a0   : > { %v7680_v38 = vpop.f32.mrf.mxu0  ;;  %v7688_v13 = vpop.f32.mrf.mxu1 }
 0x3a2   : > { %v5804_v43 = vpop.f32.mrf.mxu0  ;;  %v5867_v37 = vpop.f32.mrf.mxu1 }
 0x3a3   : > { %v5810_v1 = vadd.f32 %v5804_v43, %v5747_v41 }
 0x3a4   : > { %v7695_v9 = vpop.f32.mrf.mxu0  ;;  %v7703_v2 = vpop.f32.mrf.mxu1 }
 0x3a5   : > { %v5873_v5 = vadd.f32 %v5867_v37, %v5810_v1 }
 0x3a6   : > { %v5807_v39 = vpop.f32.mrf.mxu0  ;;  %v5870_v27 = vpop.f32.mrf.mxu1 }
 0x3a8   : > { %v7696_v51 = vpop.f32.mrf.mxu0  ;;  %v7704_v54 = vpop.f32.mrf.mxu1 }
 0x3aa   : > { %v5930_v47 = vpop.f32.mrf.mxu0 }
 0x3ab   : > { %v5936_v6 = vadd.f32 %v5930_v47, %v5873_v5 }
 0x3ac   : > { %v7711_v19 = vpop.f32.mrf.mxu0 }
 0x3ad   : > { %v5938_v18 = vadd.f32 %v5937_v59, %v5936_v6 }
 0x3ae   : > { %v5933_v25 = vpop.f32.mrf.mxu0 }
 0x3af   : > { %v5939_v46 = vmax.f32 %v5938_v18, 0.0 }
 0x3b0   : > { %v7712_v58 = vpop.f32.mrf.mxu0 }
 0x3b1   : > { %v5940_v32 = vpack.c.bf16 %v5939_v46, %v5939_v46 }
 0x3b3   : > { %7730 = vmatmul.mubr.bf16.vlgmr.msra.gmra.mxu1 %v5940_v32 }
 0x473   : > { %v6040_v63 = vpop.f32.mrf.mxu1 }
 0x474   : > { %v6041_v52 = vadd.f32 %v6040_v63, %v5957_v3 }
 0x475   : > { %v7731_v22 = vpop.f32.mrf.mxu1 }
 0x476   : > { %v6046_v48 = vmax.f32 %v6041_v52, 0.0 }
 0x477   : > { %v6043_v21 = vpop.f32.mrf.mxu1 }
 0x478   : > { %v6047_v23 = vpack.c.bf16 %v6046_v48, %v6046_v48 }
 0x479   : > { %v7732_v44 = vpop.f32.mrf.mxu1 }
 0x47a   : > { %7750 = vmatmul.mubr.bf16.vlgmr.msra.gmra.mxu0 %v6047_v23 }
 0x53a   : > { %v6146_v26 = vpop.f32.mrf.mxu0 }
 0x53b   : > { %v6153_v56 = vsel %vm6152_vm0, %v6146_v26, -inf }
 0x53c   : > { %6154 = vmax.xlane.f32.xlu0 %v6153_v56  ;;  %v7751_v11 = vpop.f32.mrf.mxu0 }
 0x53e   : > { %v6149_v10 = vpop.f32.mrf.mxu0 }
 0x540   : > { %v7752_v33 = vpop.f32.mrf.mxu0 }
 0x5c5   : > { %v6155_v24 = vpop.xlane.xlu0 %6154 }
 0x5c6   : > { %v6156_v20 = vsub.f32 %v6146_v26, %v6155_v24 }
 0x5c8   : > { %v6157_v62 = vmul.f32 1.442695, %v6156_v20 }
 0x5ca   : > { %8003 = vpow2.f32 %v6157_v62 }
 0x5d7   : > { %v8004_v4 = vpop.eup %8003 }
 0x5d8   : > { %v6159_v42 = vsel %vm6152_vm0, %v8004_v4, 0.0 }
 0x5d9   : > { %6160 = vadd.xlane.f32.xlu0 %v6159_v42 }
 0x662   : > { %v6161_v60 = vpop.xlane.xlu0 %6160 }
 0x663   : > { %8005 = vlog2.f32 %v6161_v60 }
 0x670   : > { %v8006_v28 = vpop.eup %8005 }
 0x671   : > { %v6163_v12 = vmul.f32 0.6931472, %v8006_v28 }
 0x673   : > { %v6164_v30 = vsub.f32 %v6156_v20, %v6163_v12 }
 0x675   : > { %6165 = vst [vmem:[%s297_s12] sm:$0x1] %v6164_v30 }
 0x676   : > { %8024 = shalt.err (!%p8021_p3)
}
 0x677   : > { %s8025_s24 = scalar_lea.hbm %s6177_s19, 16  ;;  %s8029_s10 = scalar_lea.hbm %s9772_s8, 32 }
 0x678   : > { %p8026_p4 = scmp.ne.s32.totalorder %s6177_s19, %s8025_s24  ;;  %p8030_p9 = scmp.lt.s32.totalorder %s6177_s19, %s9772_s8 }
 0x679   : > { %p8031_p10 = scmp.lt.s32.totalorder %s8029_s10, %s8025_s24 }
 0x67a   : > { %p8027_p7 = pnand %p8026_p4, %p8159_p5 }
 0x67b   : > { %p8032_p11 = por %p8031_p10, %p8030_p9 }
 0x67c   : > { %p8028_p8 = pneg %p8027_p7 }
 0x67e   : > { %p8033_p12 = pnand %p8032_p11, %p8028_p8 }
 0x680   : > { %8036 = shalt.err (!%p8033_p12)
}
 0x681   : > { %7754 = dma.vmem_to_hbm [thread:$0]  (%p8159_p5), %s6180_s13, 16, %s6177_s19, %s6167_s20  }
 0x682 PF: > { %p7760_p13 = scmp.ge.s32.totalorder %s8071_s30, 2  ;;  %s6191_s18 = sand.u32 1, %s8059_s27  }
 0x683   : > { %s6192_s21 = scalar_lea.sflag [#allocation9], %s6191_s18 }
 0x684   : > { %p7757_p0 = pnand %p7760_p13, %p8163_p6 }
 0x686   : > { %p7758_p1 = pneg %p7757_p0 }
 0x688   : > { %8054 = dma.done.wait (%p7758_p1), %s6192_s21, 16  }
 0x689   : > { %8056 = vsyncadd (%p7758_p1), %s6192_s21, 4294967280  ;;  %p18_p2 = scmp.ge.s32.totalorder %s8146_s11, 4   ;;  %s9779_s27 = smov %s8063_s28 }
 0x68a   : > { %s9780_s28 = smov %s8067_s29  ;;  %s9781_s29 = smov %s8157_s14 }
 0x68b   : > { %s9782_s30 = smov %s8146_s11  ;;  %20 = sbr.rel (!%p18_p2) target bundleno = 3 (0x3), region = 118 }
 0x690   :  { %6196 = vsyncpa [#allocation9], 1 }
 0x691   :  { %6198 = vsyncpa [#allocation9 + $0x1], 1 }

</bundles_post_ra>
